<compile_context>
chip_gen: v5e
topology: v5e:2x2
jax: 0.10.0
libtpu: 0.0.40
codegen_flags: <defaults>
</compile_context>

<pallas_src>
import functools

import jax
import jax.numpy as jnp
from jax.experimental import pallas as pl
from jax.experimental.pallas import tpu as pltpu

_NEG_BIG = -1e30  # finite "-inf" for masked similarities


def _round_up(x: int, m: int) -> int:
    return (x + m - 1) // m * m


def _contrastive_loss_kernel(
    f_row_ref, f_col_ref, o_ref, m_ref, l_ref, ps_ref,
    *, n_valid, batch_size, inv_temp, inv_pos_cnt, tm, tn,
):
    i = pl.program_id(0)  # anchor (row) tile   -- "parallel" axis
    j = pl.program_id(1)  # contrast (col) tile -- "arbitrary" reduction axis (last)

    @pl.when(j == 0)
    def _init():
        m_ref[...] = jnp.full_like(m_ref, _NEG_BIG)
        l_ref[...] = jnp.zeros_like(l_ref)
        ps_ref[...] = jnp.zeros_like(ps_ref)

    # bf16 (or f32) operands straight into the MXU, f32 accumulation; the
    # 1/temperature scale is applied once on the f32 result (TMxTN muls),
    # never on the low-precision operand.
    sim = jax.lax.dot_general(
        f_row_ref[...], f_col_ref[...],
        dimension_numbers=(((1,), (1,)), ((), ())),  # contract last dims; no .T
        preferred_element_type=jnp.float32,
    ) * inv_temp  # (tm, tn) f32

    # Masks from 1-D absolute/sample-id vectors + broadcast compares.
    row_abs = i * tm + jax.lax.broadcasted_iota(jnp.int32, (tm, 1), 0)
    col_abs = j * tn + jax.lax.broadcasted_iota(jnp.int32, (1, tn), 1)
    not_self = row_abs != col_abs                      # (tm, tn)
    col_valid = col_abs < n_valid                      # (1, tn) padding mask
    denom_mask = jnp.logical_and(not_self, col_valid)  # columns in softmax denom
    same_sample = (row_abs % batch_size) == (col_abs % batch_size)
    pos_mask = jnp.logical_and(denom_mask, same_sample)

    # Single masked tile reused for both the row max and the exp:
    # exp(_NEG_BIG - finite m) underflows to exactly 0 on masked lanes.
    sim_masked = jnp.where(denom_mask, sim, _NEG_BIG)

    m_prev = m_ref[...]
    m_new = jnp.maximum(m_prev, jnp.max(sim_masked, axis=1, keepdims=True))
    alpha = jnp.exp(m_prev - m_new)
    p = jnp.exp(sim_masked - m_new)
    l_ref[...] = alpha * l_ref[...] + jnp.sum(p, axis=1, keepdims=True)
    # Sum of *unshifted* scaled similarities over positives (exact
    # decomposition: sum_pos log_prob = pos_sum - pos_cnt * (m + log denom)).
    ps_ref[...] = ps_ref[...] + jnp.sum(
        jnp.where(pos_mask, sim, 0.0), axis=1, keepdims=True)
    m_ref[...] = m_new

    @pl.when(j == pl.num_programs(1) - 1)
    def _finalize():
        log_z = m_ref[...] + jnp.log(l_ref[...])          # logsumexp (self excluded)
        mean_log_prob_pos = ps_ref[...] * inv_pos_cnt - log_z
        o_ref[...] = -mean_log_prob_pos                   # per-anchor loss term


def contrastive_loss(features: jax.Array, temperature: float = 0.07,
                     compute_dtype=jnp.bfloat16) -> jax.Array:
    """features: [B, n_views, ...] -> scalar f32 SimCLR contrastive loss."""
    assert features.ndim >= 3, "features needs to be [B, n_views, ...]"
    b, n_views = features.shape[0], features.shape[1]
    assert n_views >= 2, "need at least 2 views per sample (pos_cnt = n_views - 1)"
    feats = features.reshape(b, n_views, -1)
    d = feats.shape[-1]
    n = n_views * b

    # torch.cat(torch.unbind(features, dim=1), dim=0) -> [n_views*B, D]
    cf = jnp.transpose(feats, (1, 0, 2)).reshape(n, d)

    # Lane-aligned D, 256-aligned N (matches the 2x256^2 MXU on v6e/v7x and
    # halves grid-step overhead vs 128 tiles); padding is masked in-kernel.
    d_pad = _round_up(d, 128)
    n_pad = _round_up(n, 256)

    itemsize = jnp.dtype(compute_dtype).itemsize
    tn = 256
    # Row tile: largest of {256, 512, 1024} that divides n_pad and still
    # leaves >= 2 row tiles (so the second TensorCore on v7x gets work).
    tm = 256
    for cand in (512, 1024):
        if n_pad % cand == 0 and n_pad // cand >= 2:
            tm = cand

    # Conservative VMEM budget (double-buffered row + col blocks, output and
    # three (tm,1) accumulators) -- shrink TM if a huge D would overflow.
    def _vmem_est(tm_):
        blocks = 2 * (tm_ + tn) * d_pad * itemsize
        vecs = (2 + 3) * tm_ * 128 * 4
        return blocks + vecs
    while tm > 256 and _vmem_est(tm) > 40 * 1024 * 1024:
        tm //= 2

    cf_pad = jnp.zeros((n_pad, d_pad), dtype=compute_dtype).at[:n, :d].set(
        cf.astype(compute_dtype))

    kernel = functools.partial(
        _contrastive_loss_kernel,
        n_valid=n,
        batch_size=b,
        inv_temp=1.0 / float(temperature),
        inv_pos_cnt=1.0 / float(n_views - 1),
        tm=tm,
        tn=tn,
    )

    grid = (n_pad // tm, n_pad // tn)
    cost = pl.CostEstimate(
        flops=2 * n_pad * n_pad * d_pad,
        transcendentals=n_pad * n_pad,
        bytes_accessed=(grid[0] * n_pad * d_pad + n_pad * d_pad) * itemsize
        + n_pad * 4,
    )

    per_anchor = pl.pallas_call(
        kernel,
        out_shape=jax.ShapeDtypeStruct((n_pad, 1), jnp.float32),
        grid_spec=pltpu.PrefetchScalarGridSpec(
            num_scalar_prefetch=0,
            grid=grid,
            in_specs=[
                pl.BlockSpec((tm, d_pad), lambda i, j: (i, 0)),  # anchor rows (resident over j)
                pl.BlockSpec((tn, d_pad), lambda i, j: (j, 0)),  # contrast cols (streamed)
            ],
            out_specs=pl.BlockSpec((tm, 1), lambda i, j: (i, 0)),
            scratch_shapes=[pltpu.VMEM((tm, 1), jnp.float32)] * 3,  # m, l, pos_sum
        ),
        compiler_params=pltpu.CompilerParams(
            dimension_semantics=("parallel", "arbitrary"),
            vmem_limit_bytes=64 * 1024 * 1024,  # v5e default scope is only 16 MiB
        ),
        cost_estimate=cost,
    )(cf_pad, cf_pad)

    # Tiny final reduction (N scalars) outside the kernel.
    return jnp.mean(per_anchor[:n, 0])


def _contrastive_loss_ref(features: jax.Array, temperature: float = 0.07) -> jax.Array:
    """Pure-JAX reference mirroring the PyTorch forward exactly (f32)."""
    b, n_views = features.shape[0], features.shape[1]
    feats = features.reshape(b, n_views, -1).astype(jnp.float32)
    cf = jnp.transpose(feats, (1, 0, 2)).reshape(n_views * b, -1)
    sim = (cf @ cf.T) / temperature
    logits = sim - jnp.max(sim, axis=1, keepdims=True)
    n = n_views * b
    eye_n = jnp.eye(n, dtype=jnp.float32)
    logits_mask = 1.0 - eye_n
    pos_mask = jnp.tile(jnp.eye(b, dtype=jnp.float32), (n_views, n_views)) * logits_mask
    exp_logits = jnp.exp(logits) * logits_mask
    log_prob = logits - jnp.log(jnp.sum(exp_logits, axis=1, keepdims=True))
    mean_log_prob_pos = jnp.sum(pos_mask * log_prob, axis=1) / jnp.sum(pos_mask, axis=1)
    return -jnp.mean(mean_log_prob_pos)


if __name__ == "__main__":
    key = jax.random.PRNGKey(0)
    k1, k2 = jax.random.split(key)

    # Small config consistent with the module: batch=8, n_views=2, hidden=32.
    feats_small = jax.random.normal(k1, (8, 2, 32), dtype=jnp.float32)
    feats_small = feats_small / jnp.linalg.norm(feats_small, axis=-1, keepdims=True)
    ref_s = jax.block_until_ready(_contrastive_loss_ref(feats_small, 0.07))
    # Exactness check of the online-softmax tiling with f32 operands.
    loss_s = jax.block_until_ready(
        contrastive_loss(feats_small, 0.07, compute_dtype=jnp.float32))
    assert jnp.allclose(loss_s, ref_s, rtol=2e-5, atol=2e-5), (loss_s, ref_s)

    # Multi-tile case with padding (N = 380 -> 512 padded, 2x2 grid of 256
    # tiles) exercising the online-softmax reduction + padding masks.
    feats_big = jax.random.normal(k2, (190, 2, 64), dtype=jnp.float32)
    feats_big = feats_big / jnp.linalg.norm(feats_big, axis=-1, keepdims=True)
    ref_b = jax.block_until_ready(_contrastive_loss_ref(feats_big, 0.07))
    loss_b_f32 = jax.block_until_ready(
        contrastive_loss(feats_big, 0.07, compute_dtype=jnp.float32))
    assert jnp.allclose(loss_b_f32, ref_b, rtol=2e-5, atol=2e-5), (loss_b_f32, ref_b)
    # Default bf16 MXU path (perf config) -- bf16-level tolerance.
    loss_b_bf16 = jax.block_until_ready(contrastive_loss(feats_big, 0.07))
    assert jnp.allclose(loss_b_bf16, ref_b, rtol=5e-2, atol=5e-2), (loss_b_bf16, ref_b)

    print("KERNEL_OK")
</pallas_src>

<mosaic_0001>
module attributes {stable_mosaic.version = 11 : i64} {
  func.func @_contrastive_loss_kernel(%arg0: i32, %arg1: i32, %arg2: memref<256x128xf32, #tpu.memory_space<vmem>>, %arg3: memref<256x128xf32, #tpu.memory_space<vmem>>, %arg4: memref<256x1xf32, #tpu.memory_space<vmem>>, %arg5: memref<256x1xf32, #tpu.memory_space<vmem>>, %arg6: memref<256x1xf32, #tpu.memory_space<vmem>>, %arg7: memref<256x1xf32, #tpu.memory_space<vmem>>) attributes {dimension_semantics = [#tpu.dimension_semantics<parallel>, #tpu.dimension_semantics<arbitrary>], iteration_bounds = array<i64: 1, 1>, scalar_prefetch = 0 : i64, scratch_operands = 3 : i64, tpu.core_type = #tpu.core_type<tc>, window_params = [{transform_indices = @transform_0, window_bounds = array<i64: 256, 128>}, {transform_indices = @transform_1, window_bounds = array<i64: 256, 128>}, {transform_indices = @transform_2, window_bounds = array<i64: 256, 1>}]} {
    %c0_i32 = arith.constant 0 : i32
    %0 = arith.cmpi eq, %arg1, %c0_i32 : i32
    %1 = arith.extui %0 : i1 to i32
    %c0_i32_0 = arith.constant 0 : i32
    %2 = arith.cmpi ne, %1, %c0_i32_0 : i32
    scf.if %2 {
      %cst_35 = arith.constant -1.000000e+30 : f32
      %87 = vector.broadcast %cst_35 : f32 to vector<256x1xf32>
      %c0_36 = arith.constant 0 : index
      %c0_37 = arith.constant 0 : index
      %88 = vector.load %arg5[%c0_36, %c0_37] : memref<256x1xf32, #tpu.memory_space<vmem>>, vector<256x1xf32>
      tpu.vector_store %arg5[%c0_36, %c0_37], %87 {strides = array<i32>} : memref<256x1xf32, #tpu.memory_space<vmem>>, vector<256x1xf32>,
      %cst_38 = arith.constant 0.000000e+00 : f32
      %89 = vector.broadcast %cst_38 : f32 to vector<256x1xf32>
      %c0_39 = arith.constant 0 : index
      %c0_40 = arith.constant 0 : index
      %90 = vector.load %arg6[%c0_39, %c0_40] : memref<256x1xf32, #tpu.memory_space<vmem>>, vector<256x1xf32>
      tpu.vector_store %arg6[%c0_39, %c0_40], %89 {strides = array<i32>} : memref<256x1xf32, #tpu.memory_space<vmem>>, vector<256x1xf32>,
      %cst_41 = arith.constant 0.000000e+00 : f32
      %91 = vector.broadcast %cst_41 : f32 to vector<256x1xf32>
      %c0_42 = arith.constant 0 : index
      %c0_43 = arith.constant 0 : index
      %92 = vector.load %arg7[%c0_42, %c0_43] : memref<256x1xf32, #tpu.memory_space<vmem>>, vector<256x1xf32>
      tpu.vector_store %arg7[%c0_42, %c0_43], %91 {strides = array<i32>} : memref<256x1xf32, #tpu.memory_space<vmem>>, vector<256x1xf32>,
    } else {
    }
    %c0 = arith.constant 0 : index
    %c0_1 = arith.constant 0 : index
    %3 = vector.load %arg2[%c0, %c0_1] : memref<256x128xf32, #tpu.memory_space<vmem>>, vector<256x128xf32>
    %c0_2 = arith.constant 0 : index
    %c0_3 = arith.constant 0 : index
    %4 = vector.load %arg3[%c0_2, %c0_3] : memref<256x128xf32, #tpu.memory_space<vmem>>, vector<256x128xf32>
    %cst = arith.constant dense<0.000000e+00> : vector<256x256xf32>
    %5 = tpu.matmul %3, %4, %cst {dimension_numbers = #tpu.dot_dimension_numbers<[1], [1], [0], [0], [0, 0, 1, 0], [], []>} : vector<256x128xf32>, vector<256x128xf32>, vector<256x256xf32> -> vector<256x256xf32>
    %cst_4 = arith.constant 14.2857141 : f32
    %6 = vector.broadcast %cst_4 : f32 to vector<256x256xf32>
    %7 = arith.mulf %5, %6 : vector<256x256xf32>
    %c256_i32 = arith.constant 256 : i32
    %8 = arith.muli %arg0, %c256_i32 : i32
    %9 = tpu.iota {dimensions = array<i32: 0>} : vector<256x1xi32>
    %10 = vector.broadcast %8 : i32 to vector<256x1xi32>
    %11 = arith.addi %10, %9 : vector<256x1xi32>
    %c256_i32_5 = arith.constant 256 : i32
    %12 = arith.muli %arg1, %c256_i32_5 : i32
    %13 = tpu.iota {dimensions = array<i32: 1>} : vector<1x256xi32>
    %14 = vector.broadcast %12 : i32 to vector<1x256xi32>
    %15 = arith.addi %14, %13 : vector<1x256xi32>
    %16 = vector.broadcast %11 : vector<256x1xi32> to vector<256x256xi32>
    %17 = vector.broadcast %15 : vector<1x256xi32> to vector<256x256xi32>
    %18 = arith.cmpi ne, %16, %17 : vector<256x256xi32>
    %c16_i32 = arith.constant 16 : i32
    %19 = vector.broadcast %c16_i32 : i32 to vector<1x256xi32>
    %20 = arith.cmpi slt, %15, %19 : vector<1x256xi32>
    %21 = vector.broadcast %20 : vector<1x256xi1> to vector<256x256xi1>
    %22 = arith.andi %18, %21 : vector<256x256xi1>
    %c8_i32 = arith.constant 8 : i32
    %c0_i32_6 = arith.constant 0 : i32
    %23 = arith.cmpi eq, %c8_i32, %c0_i32_6 : i32
    %c1_i32 = arith.constant 1 : i32
    %24 = arith.select %23, %c1_i32, %c8_i32 : i32
    %25 = vector.broadcast %24 : i32 to vector<256x1xi32>
    %26 = arith.remsi %11, %25 : vector<256x1xi32>
    %c0_i32_7 = arith.constant 0 : i32
    %27 = vector.broadcast %c0_i32_7 : i32 to vector<256x1xi32>
    %28 = arith.cmpi ne, %26, %27 : vector<256x1xi32>
    %c0_i32_8 = arith.constant 0 : i32
    %29 = vector.broadcast %c0_i32_8 : i32 to vector<256x1xi32>
    %30 = arith.cmpi slt, %26, %29 : vector<256x1xi32>
    %c0_i32_9 = arith.constant 0 : i32
    %31 = arith.cmpi slt, %24, %c0_i32_9 : i32
    %32 = vector.broadcast %31 : i1 to vector<256x1xi1>
    %33 = vector.broadcast %32 : vector<256x1xi1> to vector<256x1xi1>
    %34 = arith.xori %30, %33 : vector<256x1xi1>
    %35 = arith.andi %34, %28 : vector<256x1xi1>
    %36 = vector.broadcast %24 : i32 to vector<256x1xi32>
    %37 = arith.addi %26, %36 : vector<256x1xi32>
    %38 = arith.select %35, %37, %26 : vector<256x1xi1>, vector<256x1xi32>
    %c8_i32_10 = arith.constant 8 : i32
    %c0_i32_11 = arith.constant 0 : i32
    %39 = arith.cmpi eq, %c8_i32_10, %c0_i32_11 : i32
    %c1_i32_12 = arith.constant 1 : i32
    %40 = arith.select %39, %c1_i32_12, %c8_i32_10 : i32
    %41 = vector.broadcast %40 : i32 to vector<1x256xi32>
    %42 = arith.remsi %15, %41 : vector<1x256xi32>
    %c0_i32_13 = arith.constant 0 : i32
    %43 = vector.broadcast %c0_i32_13 : i32 to vector<1x256xi32>
    %44 = arith.cmpi ne, %42, %43 : vector<1x256xi32>
    %c0_i32_14 = arith.constant 0 : i32
    %45 = vector.broadcast %c0_i32_14 : i32 to vector<1x256xi32>
    %46 = arith.cmpi slt, %42, %45 : vector<1x256xi32>
    %c0_i32_15 = arith.constant 0 : i32
    %47 = arith.cmpi slt, %40, %c0_i32_15 : i32
    %48 = vector.broadcast %47 : i1 to vector<1x256xi1>
    %49 = vector.broadcast %48 : vector<1x256xi1> to vector<1x256xi1>
    %50 = arith.xori %46, %49 : vector<1x256xi1>
    %51 = arith.andi %50, %44 : vector<1x256xi1>
    %52 = vector.broadcast %40 : i32 to vector<1x256xi32>
    %53 = arith.addi %42, %52 : vector<1x256xi32>
    %54 = arith.select %51, %53, %42 : vector<1x256xi1>, vector<1x256xi32>
    %55 = vector.broadcast %38 : vector<256x1xi32> to vector<256x256xi32>
    %56 = vector.broadcast %54 : vector<1x256xi32> to vector<256x256xi32>
    %57 = arith.cmpi eq, %55, %56 : vector<256x256xi32>
    %58 = arith.andi %22, %57 : vector<256x256xi1>
    %cst_16 = arith.constant -1.000000e+30 : f32
    %59 = vector.broadcast %cst_16 : f32 to vector<256x256xf32>
    %60 = arith.select %22, %7, %59 : vector<256x256xi1>, vector<256x256xf32>
    %c0_17 = arith.constant 0 : index
    %c0_18 = arith.constant 0 : index
    %61 = vector.load %arg5[%c0_17, %c0_18] : memref<256x1xf32, #tpu.memory_space<vmem>>, vector<256x1xf32>
    %cst_19 = arith.constant dense<0xFF800000> : vector<256xf32>
    %62 = vector.multi_reduction <maximumf>, %60, %cst_19 [1] : vector<256x256xf32> to vector<256xf32>
    %63 = vector.shape_cast %62 : vector<256xf32> to vector<256x1xf32>
    %64 = arith.maximumf %61, %63 : vector<256x1xf32>
    %65 = arith.subf %61, %64 : vector<256x1xf32>
    %66 = math.exp %65 : vector<256x1xf32>
    %67 = vector.broadcast %64 : vector<256x1xf32> to vector<256x256xf32>
    %68 = arith.subf %60, %67 : vector<256x256xf32>
    %69 = math.exp %68 : vector<256x256xf32>
    %c0_20 = arith.constant 0 : index
    %c0_21 = arith.constant 0 : index
    %70 = vector.load %arg6[%c0_20, %c0_21] : memref<256x1xf32, #tpu.memory_space<vmem>>, vector<256x1xf32>
    %71 = arith.mulf %66, %70 : vector<256x1xf32>
    %cst_22 = arith.constant dense<0.000000e+00> : vector<256xf32>
    %72 = vector.multi_reduction <add>, %69, %cst_22 [1] : vector<256x256xf32> to vector<256xf32>
    %73 = vector.shape_cast %72 : vector<256xf32> to vector<256x1xf32>
    %74 = arith.addf %71, %73 : vector<256x1xf32>
    %c0_23 = arith.constant 0 : index
    %c0_24 = arith.constant 0 : index
    %75 = vector.load %arg6[%c0_23, %c0_24] : memref<256x1xf32, #tpu.memory_space<vmem>>, vector<256x1xf32>
    tpu.vector_store %arg6[%c0_23, %c0_24], %74 {strides = array<i32>} : memref<256x1xf32, #tpu.memory_space<vmem>>, vector<256x1xf32>,
    %c0_25 = arith.constant 0 : index
    %c0_26 = arith.constant 0 : index
    %76 = vector.load %arg7[%c0_25, %c0_26] : memref<256x1xf32, #tpu.memory_space<vmem>>, vector<256x1xf32>
    %cst_27 = arith.constant 0.000000e+00 : f32
    %77 = vector.broadcast %cst_27 : f32 to vector<256x256xf32>
    %78 = arith.select %58, %7, %77 : vector<256x256xi1>, vector<256x256xf32>
    %cst_28 = arith.constant dense<0.000000e+00> : vector<256xf32>
    %79 = vector.multi_reduction <add>, %78, %cst_28 [1] : vector<256x256xf32> to vector<256xf32>
    %80 = vector.shape_cast %79 : vector<256xf32> to vector<256x1xf32>
    %81 = arith.addf %76, %80 : vector<256x1xf32>
    %c0_29 = arith.constant 0 : index
    %c0_30 = arith.constant 0 : index
    %82 = vector.load %arg7[%c0_29, %c0_30] : memref<256x1xf32, #tpu.memory_space<vmem>>, vector<256x1xf32>
    tpu.vector_store %arg7[%c0_29, %c0_30], %81 {strides = array<i32>} : memref<256x1xf32, #tpu.memory_space<vmem>>, vector<256x1xf32>,
    %c0_31 = arith.constant 0 : index
    %c0_32 = arith.constant 0 : index
    %83 = vector.load %arg5[%c0_31, %c0_32] : memref<256x1xf32, #tpu.memory_space<vmem>>, vector<256x1xf32>
    tpu.vector_store %arg5[%c0_31, %c0_32], %64 {strides = array<i32>} : memref<256x1xf32, #tpu.memory_space<vmem>>, vector<256x1xf32>,
    %c0_i32_33 = arith.constant 0 : i32
    %84 = arith.cmpi eq, %arg1, %c0_i32_33 : i32
    %85 = arith.extui %84 : i1 to i32
    %c0_i32_34 = arith.constant 0 : i32
    %86 = arith.cmpi ne, %85, %c0_i32_34 : i32
    scf.if %86 {
      %c0_35 = arith.constant 0 : index
      %c0_36 = arith.constant 0 : index
      %87 = vector.load %arg5[%c0_35, %c0_36] : memref<256x1xf32, #tpu.memory_space<vmem>>, vector<256x1xf32>
      %c0_37 = arith.constant 0 : index
      %c0_38 = arith.constant 0 : index
      %88 = vector.load %arg6[%c0_37, %c0_38] : memref<256x1xf32, #tpu.memory_space<vmem>>, vector<256x1xf32>
      %89 = math.log %88 : vector<256x1xf32>
      %90 = arith.addf %87, %89 : vector<256x1xf32>
      %c0_39 = arith.constant 0 : index
      %c0_40 = arith.constant 0 : index
      %91 = vector.load %arg7[%c0_39, %c0_40] : memref<256x1xf32, #tpu.memory_space<vmem>>, vector<256x1xf32>
      %cst_41 = arith.constant 1.000000e+00 : f32
      %92 = vector.broadcast %cst_41 : f32 to vector<256x1xf32>
      %93 = arith.mulf %91, %92 : vector<256x1xf32>
      %94 = arith.subf %93, %90 : vector<256x1xf32>
      %cst_42 = arith.constant 0.000000e+00 : f32
      %95 = vector.broadcast %cst_42 : f32 to vector<256x1xf32>
      %96 = arith.subf %95, %94 : vector<256x1xf32>
      %c0_43 = arith.constant 0 : index
      %c0_44 = arith.constant 0 : index
      %97 = vector.load %arg4[%c0_43, %c0_44] : memref<256x1xf32, #tpu.memory_space<vmem>>, vector<256x1xf32>
      tpu.vector_store %arg4[%c0_43, %c0_44], %96 {strides = array<i32>} : memref<256x1xf32, #tpu.memory_space<vmem>>, vector<256x1xf32>,
    } else {
    }
    return
  }
  func.func @transform_0(%arg0: i32, %arg1: i32) -> (i32, i32) {
    %c0_i32 = arith.constant 0 : i32
    %c0_i32_0 = arith.constant 0 : i32
    return %arg0, %c0_i32 : i32, i32
  }
  func.func @transform_1(%arg0: i32, %arg1: i32) -> (i32, i32) {
    %c0_i32 = arith.constant 0 : i32
    %c0_i32_0 = arith.constant 0 : i32
    return %arg1, %c0_i32 : i32, i32
  }
  func.func @transform_2(%arg0: i32, %arg1: i32) -> (i32, i32) {
    %c0_i32 = arith.constant 0 : i32
    %c0_i32_0 = arith.constant 0 : i32
    return %arg0, %c0_i32 : i32, i32
  }
}

</mosaic_0001>

<bundles_post_ra>
// kernel: tpu_custom_call.1
= control target key start
LH: loop header
LB: loop body
LE: loop exit
PB: predicated region body
PF: predicated region fallthrough
CT: control target
= control target key end

     0   :  { %7 = vsyncpa [#allocation6], 0  ;;  %s4450_s0 = inlined_call_operand.hbm [shape: f32[256,128], index: 0, kind: input, shape index: {}]   ;;  %s4451_s1 = inlined_call_operand.hbm [shape: f32[256,128], index: 1, kind: input, shape index: {}]   ;;  %s4452_s2 = inlined_call_operand.vmem [shape: f32[256,1], index: 2, kind: output, shape index: {}]  }
   0x1   :  { %s13_s11 = sshll.u32 %s4450_s0, 4  ;;  %s14_s11 = int_to_ptr.hbm [resolvable:$true] %s13_s11 }
   0x2   :  { %8 = vsyncpa [#allocation8], 0  ;;  %s3106_s12 = smov [#allocation5]   ;;  %s26_s16 = sshll.u32 %s4451_s1, 4  ;;  %s27_s16 = int_to_ptr.hbm [resolvable:$true] %s26_s16 }
   0x3   :  { %s15_s13 = sshll.u32 %s3106_s12, 4  ;;  %s3107_s17 = smov 128   ;;  %s16_s13 = int_to_ptr.vmem [resolvable:$true] %s15_s13 }
   0x4   :  { %s3108_s18 = smov 8   ;;  %s3109_s19 = smov [#allocation7]  }
   0x5   :  { %21 = dma.hbm_to_vmem [thread:$0]  %s14_s11, 4096, %s16_s13, [#allocation6], %s3107_s17, %s3107_s17, %s3108_s18  }
   0x6   :  { %s28_s20 = sshll.u32 %s3109_s19, 4  ;;  %s29_s20 = int_to_ptr.vmem [resolvable:$true] %s28_s20 }
   0x7   :  { %34 = dma.hbm_to_vmem [thread:$0]  %s27_s16, 4096, %s29_s20, [#allocation8], %s3107_s17, %s3107_s17, %s3108_s18  }
   0x8   :  { %3102 = dma.done.wait [#allocation6], 4096  }
   0x9   :  { %3103 = vsyncadd [#allocation6], 4294963200 }
   0xa   :  { %3104 = dma.done.wait [#allocation8], 4096  }
   0xb   :  { %3105 = vsyncadd [#allocation8], 4294963200  ;;  %v191_v0 = vld [vmem:[#allocation7 + $0x78] sm:$0xff]  ;;  %v190_v1 = vld [vmem:[#allocation7 + $0x70] sm:$0xff]  ;;  %v499_v46 = vlaneseq }
   0xc   :  { %208 = vmatpush.xpose.msra.mxu0 %v191_v0  ;;  %2724 = vmatpush.xpose.msra.mxu2 %v191_v0  ;;  %v189_v2 = vld [vmem:[#allocation7 + $0x68] sm:$0xff]  ;;  %v188_v3 = vld [vmem:[#allocation7 + $0x60] sm:$0xff]  ;;  %v187_v4 = vld [vmem:[#allocation7 + $0x58] sm:$0xff] }
   0xd   :  { %v186_v5 = vld [vmem:[#allocation7 + $0x50] sm:$0xff]  ;;  %v185_v6 = vld [vmem:[#allocation7 + $0x48] sm:$0xff]  ;;  %v184_v7 = vld [vmem:[#allocation7 + $0x40] sm:$0xff]  ;;  %v3134_v47 = vshrl.u32 %v499_v46, 7  ;;  %v3136_v48 = vand.u32 127, %v499_v46 }
   0xe   :  { %v183_v8 = vld [vmem:[#allocation7 + $0x38] sm:$0xff]  ;;  %v182_v9 = vld [vmem:[#allocation7 + $0x30] sm:$0xff]  ;;  %v181_v10 = vld [vmem:[#allocation7 + $0x28] sm:$0xff] }
   0xf   :  { %v180_v11 = vld [vmem:[#allocation7 + $0x20] sm:$0xff]  ;;  %v179_v12 = vld [vmem:[#allocation7 + $0x18] sm:$0xff]  ;;  %v178_v13 = vld [vmem:[#allocation7 + $0x10] sm:$0xff]  ;;  %v710_v50 = vand.u32 7, %v3134_v47  ;;  %v3140_v51 = vand.u32 7, %v3136_v48  ;;  %vm572_vm0 = vcmp.ne.s32.totalorder %v3134_v47, %v3136_v48  ;;  %vm636_vm1 = vcmp.lt.s32.totalorder %v3136_v48, 16 }
  0x10   :  { %209 = vmatpush.xpose.msra.mxu0 %v190_v1  ;;  %2725 = vmatpush.xpose.msra.mxu2 %v190_v1  ;;  %v177_v14 = vld [vmem:[#allocation7 + $0x8] sm:$0xff]  ;;  %v176_v15 = vld [vmem:[#allocation7] sm:$0xff]  ;;  %v146_v20 = vld [vmem:[#allocation5 + $0x10] sm:$0xff]  ;;  %v516_v52 = vadd.s32 128, %v3134_v47  ;;  %v501_v56 = vadd.s32 8, %v3134_v47  ;;  %v517_v60 = vadd.s32 136, %v3134_v47 }
  0x11   :  { %v144_v16 = vld [vmem:[#allocation5] sm:$0xff]  ;;  %v145_v18 = vld [vmem:[#allocation5 + $0x8] sm:$0xff]  ;;  %v162_v21 = vld [vmem:[#allocation5 + $0x90] sm:$0xff]  ;;  %vm1114_vm3 = vcmp.eq.s32.totalorder %v710_v50, %v3140_v51  ;;  %v521_v1 = vadd.s32 168, %v3134_v47 }
  0x12   :  { %v160_v17 = vld [vmem:[#allocation5 + $0x80] sm:$0xff]  ;;  %v161_v19 = vld [vmem:[#allocation5 + $0x88] sm:$0xff]  ;;  %v163_v22 = vld [vmem:[#allocation5 + $0x98] sm:$0xff]  ;;  %v822_v53 = vand.u32 7, %v516_v52  ;;  %vm574_vm6 = vcmp.ne.s32.totalorder %v501_v56, %v3136_v48  ;;  %v717_v63 = vand.u32 7, %v501_v56 }
  0x13   :  { %v147_v23 = vld [vmem:[#allocation5 + $0x18] sm:$0xff]  ;;  %v164_v24 = vld [vmem:[#allocation5 + $0xa0] sm:$0xff]  ;;  %v149_v26 = vld [vmem:[#allocation5 + $0x28] sm:$0xff] }
  0x14   :  { %210 = vmatpush.xpose.msra.mxu0 %v189_v2  ;;  %2726 = vmatpush.xpose.msra.mxu2 %v189_v2  ;;  %v148_v25 = vld [vmem:[#allocation5 + $0x20] sm:$0xff]  ;;  %v165_v27 = vld [vmem:[#allocation5 + $0xa8] sm:$0xff]  ;;  %v166_v28 = vld [vmem:[#allocation5 + $0xb0] sm:$0xff]  ;;  %vm1146_vm5 = vcmp.eq.s32.totalorder %v822_v53, %v3140_v51  ;;  %v502_v2 = vadd.s32 16, %v3134_v47  ;;  %vm1116_vm9 = vcmp.eq.s32.totalorder %v717_v63, %v3140_v51  ;;  %v505_v53 = vadd.s32 40, %v3134_v47 }
  0x15   :  { %v150_v29 = vld [vmem:[#allocation5 + $0x30] sm:$0xff]  ;;  %v167_v30 = vld [vmem:[#allocation5 + $0xb8] sm:$0xff]  ;;  %v152_v32 = vld [vmem:[#allocation5 + $0x40] sm:$0xff] }
  0x16   :  { %v151_v31 = vld [vmem:[#allocation5 + $0x38] sm:$0xff]  ;;  %v168_v33 = vld [vmem:[#allocation5 + $0xc0] sm:$0xff]  ;;  %v153_v34 = vld [vmem:[#allocation5 + $0x48] sm:$0xff]  ;;  %vm576_vm10 = vcmp.ne.s32.totalorder %v502_v2, %v3136_v48 }
  0x17   :  { %v169_v35 = vld [vmem:[#allocation5 + $0xc8] sm:$0xff]  ;;  %v154_v36 = vld [vmem:[#allocation5 + $0x50] sm:$0xff]  ;;  %v155_v38 = vld [vmem:[#allocation5 + $0x58] sm:$0xff] }
  0x18   :  { %211 = vmatpush.xpose.msra.mxu0 %v188_v3  ;;  %2727 = vmatpush.xpose.msra.mxu2 %v188_v3  ;;  %v170_v37 = vld [vmem:[#allocation5 + $0xd0] sm:$0xff]  ;;  %v171_v39 = vld [vmem:[#allocation5 + $0xd8] sm:$0xff]  ;;  %v156_v40 = vld [vmem:[#allocation5 + $0x60] sm:$0xff] }
  0x19   :  { %v172_v41 = vld [vmem:[#allocation5 + $0xe0] sm:$0xff]  ;;  %v157_v42 = vld [vmem:[#allocation5 + $0x68] sm:$0xff]  ;;  %v158_v44 = vld [vmem:[#allocation5 + $0x70] sm:$0xff] }
  0x1a   :  { %v173_v43 = vld [vmem:[#allocation5 + $0xe8] sm:$0xff]  ;;  %v174_v45 = vld [vmem:[#allocation5 + $0xf0] sm:$0xff]  ;;  %v159_v49 = vld [vmem:[#allocation5 + $0x78] sm:$0xff] }
  0x1b   :  { %vm642_vm2 = vmand %vm572_vm0, %vm636_vm1 }
  0x1c   :  { %212 = vmatpush.xpose.msra.mxu0 %v187_v4  ;;  %2728 = vmatpush.xpose.msra.mxu2 %v187_v4  ;;  %vm1178_vm4 = vmand %vm642_vm2, %vm1114_vm3 }
  0x1d   :  { %vm1210_vm7 = vmand %vm636_vm1, %vm1146_vm5 }
  0x1e   :  { %vm3160_vm8 = vmand %vm574_vm6, %vm636_vm1 }
  0x1f   :  { %vm1180_vm12 = vmand %vm3160_vm8, %vm1116_vm9 }
  0x20   :  { %213 = vmatpush.xpose.msra.mxu0 %v186_v5  ;;  %2729 = vmatpush.xpose.msra.mxu2 %v186_v5  ;;  %vm3183_vm13 = vmand %vm576_vm10, %vm636_vm1 }
  0x24   :  { %214 = vmatpush.xpose.msra.mxu0 %v185_v6  ;;  %2730 = vmatpush.xpose.msra.mxu2 %v185_v6  ;;  %v829_v6 = vand.u32 7, %v517_v60 }
  0x26   :  { %vm1148_vm11 = vcmp.eq.s32.totalorder %v829_v6, %v3140_v51 }
  0x27   :  { %vm1212_vm14 = vmand %vm636_vm1, %vm1148_vm11 }
  0x28   :  { %215 = vmatpush.xpose.msra.mxu0 %v184_v7  ;;  %2731 = vmatpush.xpose.msra.mxu2 %v184_v7 }
  0x2c   :  { %216 = vmatpush.xpose.msra.mxu0 %v183_v8  ;;  %2732 = vmatpush.xpose.msra.mxu2 %v183_v8 }
  0x30   :  { %217 = vmatpush.xpose.msra.mxu0 %v182_v9  ;;  %2733 = vmatpush.xpose.msra.mxu2 %v182_v9 }
  0x34   :  { %218 = vmatpush.xpose.msra.mxu0 %v181_v10  ;;  %2734 = vmatpush.xpose.msra.mxu2 %v181_v10  ;;  %v518_v10 = vadd.s32 144, %v3134_v47 }
  0x38   :  { %219 = vmatpush.xpose.msra.mxu0 %v180_v11  ;;  %2735 = vmatpush.xpose.msra.mxu2 %v180_v11 }
  0x3c   :  { %220 = vmatpush.xpose.msra.mxu0 %v179_v12  ;;  %2736 = vmatpush.xpose.msra.mxu2 %v179_v12 }
  0x40   :  { %221 = vmatpush.xpose.msra.mxu0 %v178_v13  ;;  %2737 = vmatpush.xpose.msra.mxu2 %v178_v13 }
  0x44   :  { %222 = vmatpush.xpose.msra.mxu0 %v177_v14  ;;  %2738 = vmatpush.xpose.msra.mxu2 %v177_v14 }
  0x48   :  { %223 = vmatpush.xpose.msra.mxu0 %v176_v15  ;;  %2739 = vmatpush.xpose.msra.mxu2 %v176_v15 }
  0x4b   :  { %224 = vmatmul.f32.vlgmr.msra.gmra.mxu0 %v144_v16  ;;  %272 = vmatmul.f32.vlgmr.msra.gmra.mxu2 %v160_v17  ;;  %v836_v17 = vand.u32 7, %v518_v10 }
  0x4d   :  { %vm1150_vm15 = vcmp.eq.s32.totalorder %v836_v17, %v3140_v51 }
  0x53   :  { %227 = vmatmul.f32.gmra.mxu0 %v145_v18  ;;  %275 = vmatmul.f32.gmra.mxu2 %v161_v19 }
  0x5b   :  { %230 = vmatmul.f32.gmra.mxu0 %v146_v20  ;;  %278 = vmatmul.f32.gmra.mxu2 %v162_v21  ;;  %v724_v20 = vand.u32 7, %v502_v2  ;;  %v519_v21 = vadd.s32 152, %v3134_v47 }
  0x5d   :  { %vm1118_vm0 = vcmp.eq.s32.totalorder %v724_v20, %v3140_v51 }
  0x5e   :  { %vm1182_vm3 = vmand %vm3183_vm13, %vm1118_vm0  ;;  %vm582_vm0 = vcmp.ne.s32.totalorder %v505_v53, %v3136_v48 }
  0x63   :  { %281 = vmatmul.f32.gmra.mxu2 %v163_v22  ;;  %233 = vmatmul.f32.gmra.mxu0 %v147_v23 }
  0x6b   :  { %284 = vmatmul.f32.gmra.mxu2 %v164_v24  ;;  %236 = vmatmul.f32.gmra.mxu0 %v148_v25  ;;  %v503_v24 = vadd.s32 24, %v3134_v47 }
  0x73   :  { %239 = vmatmul.f32.gmra.mxu0 %v149_v26  ;;  %287 = vmatmul.f32.gmra.mxu2 %v165_v27  ;;  %v843_v27 = vand.u32 7, %v519_v21  ;;  %v522_v21 = vadd.s32 176, %v3134_v47 }
  0x75   :  { %vm1152_vm5 = vcmp.eq.s32.totalorder %v843_v27, %v3140_v51 }
  0x7b   :  { %290 = vmatmul.f32.gmra.mxu2 %v166_v28  ;;  %242 = vmatmul.f32.gmra.mxu0 %v150_v29 }
  0x83   :  { %293 = vmatmul.f32.gmra.mxu2 %v167_v30  ;;  %245 = vmatmul.f32.gmra.mxu0 %v151_v31  ;;  %v731_v31 = vand.u32 7, %v503_v24 }
  0x8b   :  { %248 = vmatmul.f32.gmra.mxu0 %v152_v32  ;;  %296 = vmatmul.f32.gmra.mxu2 %v168_v33  ;;  %v504_v32 = vadd.s32 32, %v3134_v47 }
  0x8d   :  { %vm580_vm9 = vcmp.ne.s32.totalorder %v504_v32, %v3136_v48 }
  0x8e   :  { %vm3241_vm11 = vmand %vm580_vm9, %vm636_vm1 }
  0x93   :  { %251 = vmatmul.f32.gmra.mxu0 %v153_v34  ;;  %299 = vmatmul.f32.gmra.mxu2 %v169_v35 }
  0x9b   :  { %254 = vmatmul.f32.gmra.mxu0 %v154_v36  ;;  %302 = vmatmul.f32.gmra.mxu2 %v170_v37  ;;  %v738_v37 = vand.u32 7, %v504_v32 }
  0xa3   :  { %257 = vmatmul.f32.gmra.mxu0 %v155_v38  ;;  %305 = vmatmul.f32.gmra.mxu2 %v171_v39  ;;  %v520_v38 = vadd.s32 160, %v3134_v47 }
  0xa5   :  { %v850_v46 = vand.u32 7, %v520_v38 }
  0xab   :  { %260 = vmatmul.f32.gmra.mxu0 %v156_v40  ;;  %308 = vmatmul.f32.gmra.mxu2 %v172_v41 }
  0xb3   :  { %263 = vmatmul.f32.gmra.mxu0 %v157_v42  ;;  %311 = vmatmul.f32.gmra.mxu2 %v173_v43 }
  0xbb   :  { %266 = vmatmul.f32.gmra.mxu0 %v158_v44  ;;  %314 = vmatmul.f32.gmra.mxu2 %v174_v45 }
  0xc3   :  { %269 = vmatmul.f32.gmra.mxu0 %v159_v49 }
  0xc8   :  { %v225_v54 = vpop.f32.mrf.mxu0 }
  0xc9   :  { %v434_v55 = vmul.f32 14.285714, %v225_v54 }
  0xcb   :  { %v2171_v57 = vsel %vm1178_vm4, %v434_v55, 0.0  ;;  %v3150_v58 = vsel %vm642_vm2, %v434_v55, -1e+30  ;;  %vm3205_vm2 = vmand %vm636_vm1, %vm1150_vm15  ;;  %vm578_vm4 = vcmp.ne.s32.totalorder %v503_v24, %v3136_v48 }
  0xcc   :  { %2236 = vadd.xlane.f32.xlu1 %v2171_v57  ;;  %v1338_v59 = vmax.f32 %v3150_v58, -1e+30  ;;  %vm3218_vm6 = vmand %vm578_vm4, %vm636_vm1 }
  0xce   :  { %v273_v61 = vpop.f32.mrf.mxu2  ;;  %1339 = vmax.xlane.f32.xlu0 %v1338_v59  ;;  %v745_v59 = vand.u32 7, %v505_v53 }
  0xcf   :  { %v466_v62 = vmul.f32 14.285714, %v273_v61 }
  0xd0   :  { %v228_v0 = vpop.f32.mrf.mxu0 }
  0xd1   :  { %v436_v3 = vmul.f32 14.285714, %v228_v0  ;;  %v2203_v4 = vsel %vm1210_vm7, %v466_v62, 0.0  ;;  %v3167_v5 = vsel %vm636_vm1, %v466_v62, -1e+30  ;;  %vm3223_vm7 = vcmp.eq.s32.totalorder %v731_v31, %v3140_v51 }
  0xd2   :  { %2284 = vadd.xlane.f32.xlu2 %v2203_v4  ;;  %v1386_v7 = vmax.f32 %v3167_v5, -1e+30  ;;  %vm1184_vm10 = vmand %vm3218_vm6, %vm3223_vm7 }
  0xd3   :  { %v3172_v8 = vsel %vm3160_vm8, %v436_v3, -1e+30  ;;  %v2173_v16 = vsel %vm1180_vm12, %v436_v3, 0.0  ;;  %vm1216_vm8 = vmand %vm636_vm1, %vm1152_vm5  ;;  %vm1122_vm12 = vcmp.eq.s32.totalorder %v738_v37, %v3140_v51  ;;  %v175_v3 = vld [vmem:[#allocation5 + $0xf8] sm:$0xff] }
  0xd4   :  { %1387 = vmax.xlane.f32.xlu1 %v1386_v7  ;;  %v1341_v9 = vmax.f32 %v3172_v8, -1e+30  ;;  %317 = vmatmul.f32.gmra.mxu2 %v175_v3 }
  0xd6   :  { %v276_v11 = vpop.f32.mrf.mxu2  ;;  %1342 = vmax.xlane.f32.xlu0 %v1341_v9  ;;  %v857_v9 = vand.u32 7, %v521_v1  ;;  %v3110_v1 = vmov 0.0  }
  0xd7   :  { %v468_v12 = vmul.f32 14.285714, %v276_v11 }
  0xd8   :  { %v231_v14 = vpop.f32.mrf.mxu0  ;;  %vm1156_vm5 = vcmp.eq.s32.totalorder %v857_v9, %v3140_v51 }
  0xd9   :  { %v438_v15 = vmul.f32 14.285714, %v231_v14  ;;  %v2205_v18 = vsel %vm1212_vm14, %v468_v12, 0.0  ;;  %v3197_v23 = vsel %vm636_vm1, %v468_v12, -1e+30  ;;  %vm1154_vm14 = vcmp.eq.s32.totalorder %v850_v46, %v3140_v51 }
  0xda   :  { %2239 = vadd.xlane.f32.xlu2 %v2173_v16  ;;  %v1389_v28 = vmax.f32 %v3197_v23, -1e+30  ;;  %vm1218_vm15 = vmand %vm636_vm1, %vm1154_vm14 }
  0xdb   :  { %v3191_v19 = vsel %vm3183_vm13, %v438_v15, -1e+30  ;;  %v2175_v34 = vsel %vm1182_vm3, %v438_v15, 0.0  ;;  %vm1186_vm13 = vmand %vm3241_vm11, %vm1122_vm12  ;;  %vm1124_vm3 = vcmp.eq.s32.totalorder %v745_v59, %v3140_v51  ;;  %v506_v15 = vadd.s32 48, %v3134_v47 }
  0xdc   :  { %v1344_v22 = vmax.f32 %v3191_v19, -1e+30  ;;  %v524_v59 = vadd.s32 192, %v3134_v47 }
  0xdd   :  { %vm584_vm7 = vcmp.ne.s32.totalorder %v506_v15, %v3136_v48  ;;  %v752_v20 = vand.u32 7, %v506_v15 }
  0xde   :  { %v279_v25 = vpop.f32.mrf.mxu2  ;;  %2287 = vadd.xlane.f32.xlu0 %v2205_v18  ;;  %1345 = vmax.xlane.f32.xlu1 %v1344_v22 }
  0xdf   :  { %v470_v26 = vmul.f32 14.285714, %v279_v25  ;;  %vm1126_vm9 = vcmp.eq.s32.totalorder %v752_v20, %v3140_v51 }
  0xe0   :  { %v234_v30 = vpop.f32.mrf.mxu0 }
  0xe1   :  { %v2207_v33 = vsel %vm3205_vm2, %v470_v26, 0.0  ;;  %v440_v41 = vmul.f32 14.285714, %v234_v30  ;;  %v3237_v44 = vsel %vm636_vm1, %v470_v26, -1e+30  ;;  %vm3265_vm2 = vmand %vm582_vm0, %vm636_vm1  ;;  %v864_v30 = vand.u32 7, %v522_v21 }
  0xe2   :  { %1390 = vmax.xlane.f32.xlu2 %v1389_v28  ;;  %v1392_v52 = vmax.f32 %v3237_v44, -1e+30  ;;  %vm1188_vm4 = vmand %vm3265_vm2, %vm1124_vm3  ;;  %v523_v28 = vadd.s32 184, %v3134_v47 }
  0xe3   :  { %v2177_v49 = vsel %vm1184_vm10, %v440_v41, 0.0  ;;  %v3255_v57 = vsel %vm3218_vm6, %v440_v41, -1e+30  ;;  %vm1220_vm6 = vmand %vm636_vm1, %vm1156_vm5 }
  0xe4   :  { %v1347_v62 = vmax.f32 %v3255_v57, -1e+30 }
  0xe6   :  { %v282_v39 = vpop.f32.mrf.mxu2  ;;  %2242 = vadd.xlane.f32.xlu0 %v2175_v34  ;;  %2290 = vadd.xlane.f32.xlu1 %v2207_v33  ;;  %v871_v33 = vand.u32 7, %v523_v28  ;;  %v507_v34 = vadd.s32 56, %v3134_v47 }
  0xe7   :  { %v472_v40 = vmul.f32 14.285714, %v282_v39 }
  0xe8   :  { %v237_v42 = vpop.f32.mrf.mxu0  ;;  %v759_v39 = vand.u32 7, %v507_v34  ;;  %vm586_vm14 = vcmp.ne.s32.totalorder %v507_v34, %v3136_v48 }
  0xe9   :  { %v2209_v43 = vsel %vm1216_vm8, %v472_v40, 0.0  ;;  %v442_v50 = vmul.f32 14.285714, %v237_v42  ;;  %v3276_v7 = vsel %vm636_vm1, %v472_v40, -1e+30  ;;  %vm3297_vm8 = vmand %vm584_vm7, %vm636_vm1  ;;  %v508_v40 = vadd.s32 64, %v3134_v47 }
  0xea   :  { %2293 = vadd.xlane.f32.xlu2 %v2209_v43  ;;  %v1395_v12 = vmax.f32 %v3276_v7, -1e+30  ;;  %vm1190_vm10 = vmand %vm3297_vm8, %vm1126_vm9  ;;  %vm47_vm7 = vcmask 7168  }
  0xeb   :  { %v2179_v56 = vsel %vm1186_vm13, %v442_v50, 0.0  ;;  %v3260_v61 = vsel %vm3241_vm11, %v442_v50, -1e+30  ;;  %vm1158_vm11 = vcmp.eq.s32.totalorder %v864_v30, %v3140_v51  ;;  %vm1160_vm13 = vcmp.eq.s32.totalorder %v871_v33, %v3140_v51  ;;  %vm3330_vm0 = vmand %vm586_vm14, %vm636_vm1  ;;  %112 = vst.msk [vmem:[#allocation4] sm:$0xff] %vm47_vm7, %v3110_v1 }
  0xec   :  { %v1350_v2 = vmax.f32 %v3260_v61, -1e+30  ;;  %vm1222_vm12 = vmand %vm636_vm1, %vm1158_vm11  ;;  %vm588_vm3 = vcmp.ne.s32.totalorder %v508_v40, %v3136_v48  ;;  %80 = vst.msk [vmem:[#allocation3] sm:$0xff] %vm47_vm7, %v3110_v1  ;;  %v511_v30 = vadd.s32 88, %v3134_v47 }
  0xed   :  { %vm3341_vm5 = vmand %vm588_vm3, %vm636_vm1  ;;  %81 = vst.msk [vmem:[#allocation3 + $0x8] sm:$0xff] %vm47_vm7, %v3110_v1 }
  0xee   :  { %1393 = vmax.xlane.f32.xlu0 %v1392_v52  ;;  %2245 = vadd.xlane.f32.xlu1 %v2177_v49  ;;  %v285_v54 = vpop.f32.mrf.mxu2  ;;  %v766_v49 = vand.u32 7, %v508_v40  ;;  %82 = vst.msk [vmem:[#allocation3 + $0x10] sm:$0xff] %vm47_vm7, %v3110_v1  ;;  %v3111_v40 = vmov -1e+30  }
  0xef   :  { %v474_v55 = vmul.f32 14.285714, %v285_v54  ;;  %83 = vst.msk [vmem:[#allocation3 + $0x18] sm:$0xff] %vm47_vm7, %v3110_v1 }
  0xf0   :  { %v240_v63 = vpop.f32.mrf.mxu0  ;;  %84 = vst.msk [vmem:[#allocation3 + $0x20] sm:$0xff] %vm47_vm7, %v3110_v1 }
  0xf1   :  { %v2211_v60 = vsel %vm1218_vm15, %v474_v55, 0.0  ;;  %v444_v4 = vmul.f32 14.285714, %v240_v63  ;;  %v3281_v14 = vsel %vm636_vm1, %v474_v55, -1e+30  ;;  %vm1224_vm15 = vmand %vm636_vm1, %vm1160_vm13  ;;  %85 = vst.msk [vmem:[#allocation3 + $0x28] sm:$0xff] %vm47_vm7, %v3110_v1 }
  0xf2   :  { %2248 = vadd.xlane.f32.xlu2 %v2179_v56  ;;  %v1398_v17 = vmax.f32 %v3281_v14, -1e+30  ;;  %86 = vst.msk [vmem:[#allocation3 + $0x30] sm:$0xff] %vm47_vm7, %v3110_v1 }
  0xf3   :  { %v2181_v10 = vsel %vm1188_vm4, %v444_v4, 0.0  ;;  %v3304_v29 = vsel %vm3265_vm2, %v444_v4, -1e+30  ;;  %vm1128_vm2 = vcmp.eq.s32.totalorder %v759_v39, %v3140_v51  ;;  %87 = vst.msk [vmem:[#allocation3 + $0x38] sm:$0xff] %vm47_vm7, %v3110_v1 }
  0xf4   :  { %v1353_v32 = vmax.f32 %v3304_v29, -1e+30  ;;  %vm1192_vm4 = vmand %vm3330_vm0, %vm1128_vm2  ;;  %88 = vst.msk [vmem:[#allocation3 + $0x40] sm:$0xff] %vm47_vm7, %v3110_v1 }
  0xf5   :  { %89 = vst.msk [vmem:[#allocation3 + $0x48] sm:$0xff] %vm47_vm7, %v3110_v1 }
  0xf6   :  { %2296 = vadd.xlane.f32.xlu0 %v2211_v60  ;;  %1348 = vmax.xlane.f32.xlu1 %v1347_v62  ;;  %v288_v6 = vpop.f32.mrf.mxu2  ;;  %90 = vst.msk [vmem:[#allocation3 + $0x50] sm:$0xff] %vm47_vm7, %v3110_v1 }
  0xf7   :  { %v476_v11 = vmul.f32 14.285714, %v288_v6  ;;  %91 = vst.msk [vmem:[#allocation3 + $0x58] sm:$0xff] %vm47_vm7, %v3110_v1 }
  0xf8   :  { %v243_v13 = vpop.f32.mrf.mxu0  ;;  %92 = vst.msk [vmem:[#allocation3 + $0x60] sm:$0xff] %vm47_vm7, %v3110_v1 }
  0xf9   :  { %v3287_v16 = vsel %vm636_vm1, %v476_v11, -1e+30  ;;  %v2213_v24 = vsel %vm1220_vm6, %v476_v11, 0.0  ;;  %v446_v25 = vmul.f32 14.285714, %v243_v13  ;;  %vm3346_vm6 = vcmp.eq.s32.totalorder %v766_v49, %v3140_v51  ;;  %93 = vst.msk [vmem:[#allocation3 + $0x68] sm:$0xff] %vm47_vm7, %v3110_v1 }
  0xfa   :  { %1351 = vmax.xlane.f32.xlu2 %v1350_v2  ;;  %v1401_v22 = vmax.f32 %v3287_v16, -1e+30  ;;  %v878_v2 = vand.u32 7, %v524_v59  ;;  %v509_v11 = vadd.s32 72, %v3134_v47  ;;  %94 = vst.msk [vmem:[#allocation3 + $0x70] sm:$0xff] %vm47_vm7, %v3110_v1 }
  0xfb   :  { %v3309_v31 = vsel %vm3297_vm8, %v446_v25, -1e+30  ;;  %v2183_v38 = vsel %vm1190_vm10, %v446_v25, 0.0  ;;  %vm1194_vm8 = vmand %vm3341_vm5, %vm3346_vm6  ;;  %95 = vst.msk [vmem:[#allocation3 + $0x78] sm:$0xff] %vm47_vm7, %v3110_v1  ;;  %v512_v25 = vadd.s32 96, %v3134_v47 }
  0xfc   :  { %v1356_v35 = vmax.f32 %v3309_v31, -1e+30  ;;  %vm1162_vm9 = vcmp.eq.s32.totalorder %v878_v2, %v3140_v51  ;;  %vm590_vm11 = vcmp.ne.s32.totalorder %v509_v11, %v3136_v48  ;;  %96 = vst.msk [vmem:[#allocation3 + $0x80] sm:$0xff] %vm47_vm7, %v3110_v1 }
  0xfd   :  { %vm3389_vm10 = vmand %vm636_vm1, %vm1162_vm9  ;;  %97 = vst.msk [vmem:[#allocation3 + $0x88] sm:$0xff] %vm47_vm7, %v3110_v1 }
  0xfe   :  { %1396 = vmax.xlane.f32.xlu1 %v1395_v12  ;;  %2251 = vadd.xlane.f32.xlu0 %v2181_v10  ;;  %v291_v18 = vpop.f32.mrf.mxu2  ;;  %98 = vst.msk [vmem:[#allocation3 + $0x90] sm:$0xff] %vm47_vm7, %v3110_v1 }
  0xff   :  { %v478_v37 = vmul.f32 14.285714, %v291_v18  ;;  %v525_v18 = vadd.s32 200, %v3134_v47  ;;  %99 = vst.msk [vmem:[#allocation3 + $0x98] sm:$0xff] %vm47_vm7, %v3110_v1 }
 0x100   :  { %v246_v27 = vpop.f32.mrf.mxu0  ;;  %100 = vst.msk [vmem:[#allocation3 + $0xa0] sm:$0xff] %vm47_vm7, %v3110_v1 }
 0x101   :  { %v2215_v43 = vsel %vm1222_vm12, %v478_v37, 0.0  ;;  %v3324_v45 = vsel %vm636_vm1, %v478_v37, -1e+30  ;;  %v448_v50 = vmul.f32 14.285714, %v246_v27  ;;  %vm3408_vm12 = vmand %vm590_vm11, %vm636_vm1  ;;  %v885_v28 = vand.u32 7, %v525_v18 }
 0x102   :  { %1399 = vmax.xlane.f32.xlu2 %v1398_v17  ;;  %v1404_v52 = vmax.f32 %v3324_v45, -1e+30  ;;  %v773_v17 = vand.u32 7, %v509_v11  ;;  %v510_v37 = vadd.s32 80, %v3134_v47  ;;  %101 = vst.msk [vmem:[#allocation3 + $0xa8] sm:$0xff] %vm47_vm7, %v3110_v1  ;;  %vm596_vm11 = vcmp.ne.s32.totalorder %v512_v25, %v3136_v48 }
 0x103   :  { %v2185_v60 = vsel %vm1192_vm4, %v448_v50, 0.0  ;;  %v3353_v63 = vsel %vm3330_vm0, %v448_v50, -1e+30  ;;  %vm594_vm0 = vcmp.ne.s32.totalorder %v511_v30, %v3136_v48  ;;  %102 = vst.msk [vmem:[#allocation3 + $0xb0] sm:$0xff] %vm47_vm7, %v3110_v1 }
 0x104   :  { %v1359_v3 = vmax.f32 %v3353_v63, -1e+30  ;;  %vm3419_vm13 = vcmp.eq.s32.totalorder %v773_v17, %v3140_v51  ;;  %vm3463_vm3 = vmand %vm594_vm0, %vm636_vm1  ;;  %v780_v46 = vand.u32 7, %v510_v37  ;;  %vm592_vm6 = vcmp.ne.s32.totalorder %v510_v37, %v3136_v48  ;;  %103 = vst.msk [vmem:[#allocation3 + $0xb8] sm:$0xff] %vm47_vm7, %v3110_v1 }
 0x105   :  { %vm1196_vm14 = vmand %vm3408_vm12, %vm3419_vm13  ;;  %104 = vst.msk [vmem:[#allocation3 + $0xc0] sm:$0xff] %vm47_vm7, %v3110_v1  ;;  %v514_v37 = vadd.s32 112, %v3134_v47 }
 0x106   :  { %2299 = vadd.xlane.f32.xlu1 %v2213_v24  ;;  %1402 = vmax.xlane.f32.xlu0 %v1401_v22  ;;  %v294_v36 = vpop.f32.mrf.mxu2  ;;  %105 = vst.msk [vmem:[#allocation3 + $0xc8] sm:$0xff] %vm47_vm7, %v3110_v1  ;;  %vm1134_vm9 = vcmp.eq.s32.totalorder %v780_v46, %v3140_v51 }
 0x107   :  { %v480_v42 = vmul.f32 14.285714, %v294_v36  ;;  %106 = vst.msk [vmem:[#allocation3 + $0xd0] sm:$0xff] %vm47_vm7, %v3110_v1 }
 0x108   :  { %v249_v41 = vpop.f32.mrf.mxu0  ;;  %107 = vst.msk [vmem:[#allocation3 + $0xd8] sm:$0xff] %vm47_vm7, %v3110_v1 }
 0x109   :  { %v2217_v54 = vsel %vm1224_vm15, %v480_v42, 0.0  ;;  %v450_v62 = vmul.f32 14.285714, %v249_v41  ;;  %v3372_v10 = vsel %vm636_vm1, %v480_v42, -1e+30  ;;  %vm1164_vm15 = vcmp.eq.s32.totalorder %v885_v28, %v3140_v51  ;;  %108 = vst.msk [vmem:[#allocation3 + $0xe0] sm:$0xff] %vm47_vm7, %v3110_v1 }
 0x10a   :  { %1354 = vmax.xlane.f32.xlu2 %v1353_v32  ;;  %v1407_v13 = vmax.f32 %v3372_v10, -1e+30  ;;  %vm3455_vm2 = vmand %vm636_vm1, %vm1164_vm15  ;;  %109 = vst.msk [vmem:[#allocation3 + $0xe8] sm:$0xff] %vm47_vm7, %v3110_v1  ;;  %v794_v28 = vand.u32 7, %v512_v25  ;;  %vm600_vm15 = vcmp.ne.s32.totalorder %v514_v37, %v3136_v48 }
 0x10b   :  { %v2187_v4 = vsel %vm1194_vm8, %v450_v62, 0.0  ;;  %v3416_v26 = vsel %vm3341_vm5, %v450_v62, -1e+30  ;;  %vm662_vm8 = vmand %vm592_vm6, %vm636_vm1  ;;  %110 = vst.msk [vmem:[#allocation3 + $0xf0] sm:$0xff] %vm47_vm7, %v3110_v1 }
 0x10c   :  { %v1362_v34 = vmax.f32 %v3416_v26, -1e+30  ;;  %111 = vst.msk [vmem:[#allocation3 + $0xf8] sm:$0xff] %vm47_vm7, %v3110_v1  ;;  %vm1138_vm13 = vcmp.eq.s32.totalorder %v794_v28, %v3140_v51 }
 0x10d   :  { %113 = vst.msk [vmem:[#allocation4 + $0x8] sm:$0xff] %vm47_vm7, %v3110_v1 }
 0x10e   :  { %2254 = vadd.xlane.f32.xlu1 %v2183_v38  ;;  %1357 = vmax.xlane.f32.xlu0 %v1356_v35  ;;  %v297_v53 = vpop.f32.mrf.mxu2  ;;  %v787_v35 = vand.u32 7, %v511_v30  ;;  %114 = vst.msk [vmem:[#allocation4 + $0x10] sm:$0xff] %vm47_vm7, %v3110_v1 }
 0x10f   :  { %v482_v6 = vmul.f32 14.285714, %v297_v53  ;;  %115 = vst.msk [vmem:[#allocation4 + $0x18] sm:$0xff] %vm47_vm7, %v3110_v1 }
 0x110   :  { %v252_v0 = vpop.f32.mrf.mxu0  ;;  %vm3468_vm4 = vcmp.eq.s32.totalorder %v787_v35, %v3140_v51  ;;  %116 = vst.msk [vmem:[#allocation4 + $0x20] sm:$0xff] %vm47_vm7, %v3110_v1 }
 0x111   :  { %v3382_v12 = vsel %vm636_vm1, %v482_v6, -1e+30  ;;  %v452_v22 = vmul.f32 14.285714, %v252_v0  ;;  %v2219_v24 = vsel %vm3389_vm10, %v482_v6, 0.0  ;;  %vm1200_vm5 = vmand %vm3463_vm3, %vm3468_vm4  ;;  %117 = vst.msk [vmem:[#allocation4 + $0x28] sm:$0xff] %vm47_vm7, %v3110_v1 }
 0x112   :  { %2302 = vadd.xlane.f32.xlu2 %v2215_v43  ;;  %v1410_v20 = vmax.f32 %v3382_v12, -1e+30  ;;  %vm1198_vm10 = vmand %vm662_vm8, %vm1134_vm9  ;;  %118 = vst.msk [vmem:[#allocation4 + $0x30] sm:$0xff] %vm47_vm7, %v3110_v1  ;;  %v808_v43 = vand.u32 7, %v514_v37 }
 0x113   :  { %v3432_v33 = vsel %vm3408_vm12, %v452_v22, -1e+30  ;;  %v2189_v39 = vsel %vm1196_vm14, %v452_v22, 0.0  ;;  %119 = vst.msk [vmem:[#allocation4 + $0x38] sm:$0xff] %vm47_vm7, %v3110_v1  ;;  %vm666_vm12 = vmand %vm596_vm11, %vm636_vm1 }
 0x114   :  { %v1365_v36 = vmax.f32 %v3432_v33, -1e+30  ;;  %120 = vst.msk [vmem:[#allocation4 + $0x40] sm:$0xff] %vm47_vm7, %v3110_v1  ;;  %vm1202_vm14 = vmand %vm666_vm12, %vm1138_vm13 }
 0x115   :  { %121 = vst.msk [vmem:[#allocation4 + $0x48] sm:$0xff] %vm47_vm7, %v3110_v1 }
 0x116   :  { %1405 = vmax.xlane.f32.xlu1 %v1404_v52  ;;  %2305 = vadd.xlane.f32.xlu0 %v2217_v54  ;;  %v300_v9 = vpop.f32.mrf.mxu2  ;;  %122 = vst.msk [vmem:[#allocation4 + $0x50] sm:$0xff] %vm47_vm7, %v3110_v1 }
 0x117   :  { %v484_v38 = vmul.f32 14.285714, %v300_v9  ;;  %123 = vst.msk [vmem:[#allocation4 + $0x58] sm:$0xff] %vm47_vm7, %v3110_v1 }
 0x118   :  { %v255_v21 = vpop.f32.mrf.mxu0  ;;  %124 = vst.msk [vmem:[#allocation4 + $0x60] sm:$0xff] %vm47_vm7, %v3110_v1 }
 0x119   :  { %v2221_v49 = vsel %vm3455_vm2, %v484_v38, 0.0  ;;  %v3480_v52 = vsel %vm636_vm1, %v484_v38, -1e+30  ;;  %v454_v59 = vmul.f32 14.285714, %v255_v21  ;;  %125 = vst.msk [vmem:[#allocation4 + $0x68] sm:$0xff] %vm47_vm7, %v3110_v1  ;;  %vm3634_vm2 = vmand %vm600_vm15, %vm636_vm1 }
 0x11a   :  { %2257 = vadd.xlane.f32.xlu2 %v2185_v60  ;;  %v1413_v54 = vmax.f32 %v3480_v52, -1e+30  ;;  %126 = vst.msk [vmem:[#allocation4 + $0x70] sm:$0xff] %vm47_vm7, %v3110_v1  ;;  %v513_v38 = vadd.s32 104, %v3134_v47 }
 0x11b   :  { %v2191_v62 = vsel %vm1198_vm10, %v454_v59, 0.0  ;;  %v3518_v0 = vsel %vm662_vm8, %v454_v59, -1e+30  ;;  %127 = vst.msk [vmem:[#allocation4 + $0x78] sm:$0xff] %vm47_vm7, %v3110_v1 }
 0x11c   :  { %128 = vst.msk [vmem:[#allocation4 + $0x80] sm:$0xff] %vm47_vm7, %v3110_v1  ;;  %v801_v46 = vand.u32 7, %v513_v38  ;;  %vm598_vm0 = vcmp.ne.s32.totalorder %v513_v38, %v3136_v48 }
 0x11d   :  { %129 = vst.msk [vmem:[#allocation4 + $0x88] sm:$0xff] %vm47_vm7, %v3110_v1  ;;  %vm668_vm6 = vmand %vm598_vm0, %vm636_vm1 }
 0x11e   :  { %1360 = vmax.xlane.f32.xlu1 %v1359_v3  ;;  %2260 = vadd.xlane.f32.xlu0 %v2187_v4  ;;  %v3426_v32 = vpop.f32.mrf.mxu2  ;;  %v1368_v3 = vmax.f32 %v3518_v0, -1e+30  ;;  %v2139_v4 = vld [vmem:[#allocation4] sm:$0xff]  ;;  %130 = vst.msk [vmem:[#allocation4 + $0x90] sm:$0xff] %vm47_vm7, %v3110_v1  ;;  %vm1140_vm4 = vcmp.eq.s32.totalorder %v801_v46, %v3140_v51 }
 0x11f   :  { %v3535_v6 = vmul.f32 14.285714, %v3426_v32  ;;  %131 = vst.msk [vmem:[#allocation4 + $0x98] sm:$0xff] %vm47_vm7, %v3110_v1  ;;  %vm1204_vm8 = vmand %vm668_vm6, %vm1140_vm4 }
 0x120   :  { %v258_v41 = vpop.f32.mrf.mxu0  ;;  %132 = vst.msk [vmem:[#allocation4 + $0xa0] sm:$0xff] %vm47_vm7, %v3110_v1 }
 0x121   :  { %v456_v50 = vmul.f32 14.285714, %v258_v41  ;;  %4544 = vst [vmem:[#allocation12_spill] sm:$0xff] %v3535_v6 }
 0x122   :  { %1408 = vmax.xlane.f32.xlu2 %v1407_v13  ;;  %v3549_v13 = vsel %vm636_vm1, %v3535_v6, -1e+30  ;;  %133 = vst.msk [vmem:[#allocation4 + $0xa8] sm:$0xff] %vm47_vm7, %v3110_v1 }
 0x123   :  { %v2193_v55 = vsel %vm1200_vm5, %v456_v50, 0.0  ;;  %v1416_v15 = vmax.f32 %v3549_v13, -1e+30  ;;  %v3574_v18 = vsel %vm3463_vm3, %v456_v50, -1e+30  ;;  %134 = vst.msk [vmem:[#allocation4 + $0xb0] sm:$0xff] %vm47_vm7, %v3110_v1  ;;  %vm1142_vm3 = vcmp.eq.s32.totalorder %v808_v43, %v3140_v51 }
 0x124   :  { %v1371_v21 = vmax.f32 %v3574_v18, -1e+30  ;;  %135 = vst.msk [vmem:[#allocation4 + $0xb8] sm:$0xff] %vm47_vm7, %v3110_v1  ;;  %vm1206_vm5 = vmand %vm3634_vm2, %vm1142_vm3 }
 0x125   :  { %136 = vst.msk [vmem:[#allocation4 + $0xc0] sm:$0xff] %vm47_vm7, %v3110_v1 }
 0x126   :  { %2308 = vadd.xlane.f32.xlu1 %v2219_v24  ;;  %1411 = vmax.xlane.f32.xlu0 %v1410_v20  ;;  %v306_v53 = vpop.f32.mrf.mxu2  ;;  %137 = vst.msk [vmem:[#allocation4 + $0xc8] sm:$0xff] %vm47_vm7, %v3110_v1 }
 0x127   :  { %v3496_v56 = vmul.f32 14.285714, %v306_v53  ;;  %138 = vst.msk [vmem:[#allocation4 + $0xd0] sm:$0xff] %vm47_vm7, %v3110_v1 }
 0x128   :  { %v261_v17 = vpop.f32.mrf.mxu0  ;;  %139 = vst.msk [vmem:[#allocation4 + $0xd8] sm:$0xff] %vm47_vm7, %v3110_v1 }
 0x129   :  { %4543 = vst [vmem:[#allocation11_spill] sm:$0xff] %v3496_v56  ;;  %v3512_v60 = vsel %vm636_vm1, %v3496_v56, -1e+30  ;;  %v458_v22 = vmul.f32 14.285714, %v261_v17 }
 0x12a   :  { %1363 = vmax.xlane.f32.xlu2 %v1362_v34  ;;  %v1419_v2 = vmax.f32 %v3512_v60, -1e+30  ;;  %140 = vst.msk [vmem:[#allocation4 + $0xe0] sm:$0xff] %vm47_vm7, %v3110_v1 }
 0x12b   :  { %v3598_v32 = vsel %vm666_vm12, %v458_v22, -1e+30  ;;  %v2195_v35 = vsel %vm1202_vm14, %v458_v22, 0.0  ;;  %141 = vst.msk [vmem:[#allocation4 + $0xe8] sm:$0xff] %vm47_vm7, %v3110_v1 }
 0x12c   :  { %v1374_v34 = vmax.f32 %v3598_v32, -1e+30  ;;  %142 = vst.msk [vmem:[#allocation4 + $0xf0] sm:$0xff] %vm47_vm7, %v3110_v1 }
 0x12d   :  { %143 = vst.msk [vmem:[#allocation4 + $0xf8] sm:$0xff] %vm47_vm7, %v3110_v1 }
 0x12e   :  { %2263 = vadd.xlane.f32.xlu1 %v2189_v39  ;;  %1366 = vmax.xlane.f32.xlu0 %v1365_v36  ;;  %v309_v20 = vpop.f32.mrf.mxu2  ;;  %48 = vst.msk [vmem:[#allocation2] sm:$0xff] %vm47_vm7, %v3111_v40 }
 0x12f   :  { %v3609_v36 = vmul.f32 14.285714, %v309_v20  ;;  %49 = vst.msk [vmem:[#allocation2 + $0x8] sm:$0xff] %vm47_vm7, %v3111_v40 }
 0x130   :  { %v264_v27 = vpop.f32.mrf.mxu0  ;;  %50 = vst.msk [vmem:[#allocation2 + $0x10] sm:$0xff] %vm47_vm7, %v3111_v40 }
 0x131   :  { %v3630_v53 = vsel %vm636_vm1, %v3609_v36, -1e+30  ;;  %51 = vst.msk [vmem:[#allocation2 + $0x18] sm:$0xff] %vm47_vm7, %v3111_v40 }
 0x132   :  { %2311 = vadd.xlane.f32.xlu2 %v2221_v49  ;;  %v460_v49 = vmul.f32 14.285714, %v264_v27  ;;  %52 = vst.msk [vmem:[#allocation2 + $0x20] sm:$0xff] %vm47_vm7, %v3111_v40 }
 0x133   :  { %53 = vst.msk [vmem:[#allocation2 + $0x28] sm:$0xff] %vm47_vm7, %v3111_v40 }
 0x134   :  { %54 = vst.msk [vmem:[#allocation2 + $0x30] sm:$0xff] %vm47_vm7, %v3111_v40 }
 0x135   :  { %55 = vst.msk [vmem:[#allocation2 + $0x38] sm:$0xff] %vm47_vm7, %v3111_v40 }
 0x136   :  { %1414 = vmax.xlane.f32.xlu1 %v1413_v54  ;;  %2269 = vadd.xlane.f32.xlu0 %v2193_v55  ;;  %v312_v39 = vpop.f32.mrf.mxu2  ;;  %v1422_v55 = vmax.f32 %v3630_v53, -1e+30  ;;  %56 = vst.msk [vmem:[#allocation2 + $0x40] sm:$0xff] %vm47_vm7, %v3111_v40 }
 0x137   :  { %57 = vst.msk [vmem:[#allocation2 + $0x48] sm:$0xff] %vm47_vm7, %v3111_v40  ;;  %v3693_v28 = vmul.f32 14.285714, %v312_v39  ;;  %v515_v39 = vadd.s32 120, %v3134_v47 }
 0x138   :  { %v267_v50 = vpop.f32.mrf.mxu0  ;;  %58 = vst.msk [vmem:[#allocation2 + $0x50] sm:$0xff] %vm47_vm7, %v3111_v40 }
 0x139   :  { %v3625_v1 = vmul.f32 14.285714, %v267_v50  ;;  %4549 = vst [vmem:[#allocation15_spill] sm:$0xff] %v3693_v28  ;;  %v3710_v43 = vsel %vm636_vm1, %v3693_v28, -1e+30  ;;  %vm602_vm9 = vcmp.ne.s32.totalorder %v515_v39, %v3136_v48  ;;  %v2140_v28 = vld [vmem:[#allocation4 + $0x8] sm:$0xff] }
 0x13a   :  { %2266 = vadd.xlane.f32.xlu2 %v2191_v62  ;;  %59 = vst.msk [vmem:[#allocation2 + $0x58] sm:$0xff] %vm47_vm7, %v3111_v40  ;;  %v1425_v50 = vmax.f32 %v3710_v43, -1e+30  ;;  %vm672_vm10 = vmand %vm602_vm9, %vm636_vm1 }
 0x13b   :  { %v2199_v62 = vsel %vm1206_vm5, %v3625_v1, 0.0  ;;  %60 = vst.msk [vmem:[#allocation2 + $0x60] sm:$0xff] %vm47_vm7, %v3111_v40 }
 0x13c   :  { %61 = vst.msk [vmem:[#allocation2 + $0x68] sm:$0xff] %vm47_vm7, %v3111_v40 }
 0x13d   :  { %62 = vst.msk [vmem:[#allocation2 + $0x70] sm:$0xff] %vm47_vm7, %v3111_v40 }
 0x13e   :  { %1369 = vmax.xlane.f32.xlu1 %v1368_v3  ;;  %1420 = vmax.xlane.f32.xlu0 %v1419_v2  ;;  %v2197_v2 = vsel %vm1204_vm8, %v460_v49, 0.0  ;;  %v3656_v3 = vld [vmem:[#allocation2] sm:$0xff]  ;;  %63 = vst.msk [vmem:[#allocation2 + $0x78] sm:$0xff] %vm47_vm7, %v3111_v40 }
 0x13f   :  { %v2237_v9 = vpop.xlane.xlu1 %2236  ;;  %64 = vst.msk [vmem:[#allocation2 + $0x80] sm:$0xff] %vm47_vm7, %v3111_v40 }
 0x140   :  { %v2331_v11 = vadd.f32 %v2237_v9, %v2139_v4  ;;  %v315_v4 = vpop.f32.mrf.mxu2  ;;  %v3660_v9 = vsel %vm668_vm6, %v460_v49, -1e+30  ;;  %v270_v38 = vpop.f32.mrf.mxu0  ;;  %65 = vst.msk [vmem:[#allocation2 + $0x88] sm:$0xff] %vm47_vm7, %v3111_v40 }
 0x141   :  { %v3581_v24 = vpop.xlane.xlu0 %1339  ;;  %4547 = vst [vmem:[#allocation13_spill] sm:$0xff] %v3660_v9  ;;  %v3670_v17 = vmul.f32 14.285714, %v315_v4  ;;  %v1377_v25 = vmax.f32 %v3660_v9, -1e+30  ;;  %v2143_v9 = vld [vmem:[#allocation4 + $0x20] sm:$0xff] }
 0x142   :  { %2363 = vst.msk [vmem:[#allocation4] sm:$0xff] %vm47_vm7, %v2331_v11  ;;  %1417 = vmax.xlane.f32.xlu2 %v1416_v15  ;;  %v3664_v11 = vmax.f32 %v3656_v3, %v3581_v24  ;;  %v3668_v15 = vld [vmem:[#allocation2 + $0x8] sm:$0xff] }
 0x143   :  { %4548 = vst [vmem:[#allocation14_spill] sm:$0xff] %v3670_v17  ;;  %v3689_v27 = vsel %vm636_vm1, %v3670_v17, -1e+30  ;;  %v2141_v17 = vld [vmem:[#allocation4 + $0x10] sm:$0xff] }
 0x144   :  { %2395 = vst.msk [vmem:[#allocation2] sm:$0xff] %vm47_vm7, %v3664_v11 }
 0x145   :  { %v3595_v30 = vpop.xlane.xlu2 %2284  ;;  %66 = vst.msk [vmem:[#allocation2 + $0x90] sm:$0xff] %vm47_vm7, %v3111_v40 }
 0x146   :  { %2272 = vadd.xlane.f32.xlu1 %v2195_v35  ;;  %1375 = vmax.xlane.f32.xlu0 %v1374_v34  ;;  %v1428_v35 = vmax.f32 %v3689_v27, -1e+30  ;;  %67 = vst.msk [vmem:[#allocation2 + $0x98] sm:$0xff] %vm47_vm7, %v3111_v40 }
 0x147   :  { %v3617_v41 = vpop.xlane.xlu1 %1387  ;;  %68 = vst.msk [vmem:[#allocation2 + $0xa0] sm:$0xff] %vm47_vm7, %v3111_v40  ;;  %v3758_v54 = vld [vmem:[#allocation2 + $0x88] sm:$0xff] }
 0x148   :  { %69 = vst.msk [vmem:[#allocation2 + $0xa8] sm:$0xff] %vm47_vm7, %v3111_v40 }
 0x149   :  { %v1343_v42 = vpop.xlane.xlu0 %1342  ;;  %70 = vst.msk [vmem:[#allocation2 + $0xb0] sm:$0xff] %vm47_vm7, %v3111_v40 }
 0x14a   :  { %1372 = vmax.xlane.f32.xlu2 %v1371_v21  ;;  %v3679_v22 = vmax.f32 %v3668_v15, %v1343_v42  ;;  %v464_v42 = vmul.f32 14.285714, %v270_v38  ;;  %71 = vst.msk [vmem:[#allocation2 + $0xb8] sm:$0xff] %vm47_vm7, %v3111_v40  ;;  %v3749_v38 = vld [vmem:[#allocation2 + $0x80] sm:$0xff] }
 0x14b   :  { %4551 = vst [vmem:[#allocation17_spill] sm:$0xff] %v3749_v38 }
 0x14c   :  { %72 = vst.msk [vmem:[#allocation2 + $0xc0] sm:$0xff] %vm47_vm7, %v3111_v40  ;;  %v3765_v24 = vld [vmem:[#allocation2 + $0x90] sm:$0xff] }
 0x14d   :  { %v3647_v59 = vpop.xlane.xlu2 %2239  ;;  %4552 = vst [vmem:[#allocation18_spill] sm:$0xff] %v3758_v54 }
 0x14e   :  { %1423 = vmax.xlane.f32.xlu1 %v1422_v55  ;;  %2278 = vadd.xlane.f32.xlu0 %v2199_v62  ;;  %v815_v55 = vand.u32 7, %v515_v39  ;;  %v3726_v62 = vsel %vm672_vm10, %v464_v42, -1e+30  ;;  %73 = vst.msk [vmem:[#allocation2 + $0xc8] sm:$0xff] %vm47_vm7, %v3111_v40 }
 0x14f   :  { %74 = vst.msk [vmem:[#allocation2 + $0xd0] sm:$0xff] %vm47_vm7, %v3111_v40 }
 0x150   :  { %vm1144_vm11 = vcmp.eq.s32.totalorder %v815_v55, %v3140_v51  ;;  %v3112_v55 = vmov 0   ;;  %75 = vst.msk [vmem:[#allocation2 + $0xd8] sm:$0xff] %vm47_vm7, %v3111_v40 }
 0x151   :  { %v3672_v20 = vpop.xlane.xlu0 %2287  ;;  %v3674_v21 = vpop.xlane.xlu1 %1345  ;;  %vm1208_vm12 = vmand %vm672_vm10, %vm1144_vm11  ;;  %2765 = vset.pattern.permute.xlu0 %v3112_v55  ;;  %2764 = vset.pattern.permute.xlu1 %v3112_v55  ;;  %76 = vst.msk [vmem:[#allocation2 + $0xe0] sm:$0xff] %vm47_vm7, %v3111_v40 }
 0x152   :  { %2275 = vadd.xlane.f32.xlu2 %v2197_v2  ;;  %v1383_v2 = vmax.f32 %v3726_v62, -1e+30  ;;  %77 = vst.msk [vmem:[#allocation2 + $0xe8] sm:$0xff] %vm47_vm7, %v3111_v40 }
 0x153   :  { %2763 = vset.pattern.permute.xlu2 %v3112_v55  ;;  %78 = vst.msk [vmem:[#allocation2 + $0xf0] sm:$0xff] %vm47_vm7, %v3111_v40  ;;  %v3789_v55 = vld [vmem:[#allocation2 + $0x10] sm:$0xff] }
 0x154   :  { %4554 = vst [vmem:[#allocation20_spill] sm:$0xff] %v3789_v55 }
 0x155   :  { %v1391_v37 = vpop.xlane.xlu2 %1390  ;;  %79 = vst.msk [vmem:[#allocation2 + $0xf8] sm:$0xff] %vm47_vm7, %v3111_v40  ;;  %v2157_v40 = vld [vmem:[#allocation4 + $0x90] sm:$0xff] }
 0x156   :  { %1378 = vmax.xlane.f32.xlu1 %v1377_v25  ;;  %1429 = vmax.xlane.f32.xlu0 %v1428_v35  ;;  %v2201_v25 = vsel %vm1208_vm12, %v464_v42, 0.0  ;;  %v3741_v35 = vsel %vm3634_vm2, %v3625_v1, -1e+30  ;;  %v3756_v1 = vmax.f32 %v3749_v38, %v3617_v41  ;;  %v3785_v41 = vld [vmem:[#allocation2 + $0x18] sm:$0xff]  ;;  %v3805_v38 = vld [vmem:[#allocation2 + $0x20] sm:$0xff]  ;;  %2396 = vst.msk [vmem:[#allocation2 + $0x8] sm:$0xff] %vm47_vm7, %v3679_v22 }
 0x157   :  { %4550 = vst [vmem:[#allocation16_spill] sm:$0xff] %v3741_v35 }
 0x158   :  { %2411 = vst.msk [vmem:[#allocation2 + $0x80] sm:$0xff] %vm47_vm7, %v3756_v1 }
 0x159   :  { %v3715_v46 = vpop.xlane.xlu0 %2242  ;;  %v3717_v49 = vpop.xlane.xlu1 %2290  ;;  %4556 = vst [vmem:[#allocation22_spill] sm:$0xff] %v3805_v38 }
 0x15a   :  { %1426 = vmax.xlane.f32.xlu2 %v1425_v50  ;;  %v1380_v50 = vmax.f32 %v3741_v35, -1e+30  ;;  %v3803_v35 = vmax.f32 %v3789_v55, %v3674_v21  ;;  %v2349_v21 = vadd.f32 %v3717_v49, %v2157_v40 }
 0x15c   :  { %4555 = vst [vmem:[#allocation21_spill] sm:$0xff] %v3803_v35 }
 0x15d   :  { %v3734_v4 = vpop.xlane.xlu2 %2293  ;;  %2397 = vst.msk [vmem:[#allocation2 + $0x10] sm:$0xff] %vm47_vm7, %v3803_v35 }
 0x15e   :  { %2281 = vadd.xlane.f32.xlu1 %v2201_v25  ;;  %1384 = vmax.xlane.f32.xlu0 %v1383_v2  ;;  %v2155_v2 = vld [vmem:[#allocation4 + $0x80] sm:$0xff]  ;;  %v3763_v25 = vmax.f32 %v3758_v54, %v1391_v37  ;;  %2381 = vst.msk [vmem:[#allocation4 + $0x90] sm:$0xff] %vm47_vm7, %v2349_v21 }
 0x160   :  { %4553 = vst [vmem:[#allocation19_spill] sm:$0xff] %v3763_v25 }
 0x161   :  { %v1394_v39 = vpop.xlane.xlu0 %1393  ;;  %v2246_v42 = vpop.xlane.xlu1 %2245  ;;  %2412 = vst.msk [vmem:[#allocation2 + $0x88] sm:$0xff] %vm47_vm7, %v3763_v25 }
 0x162   :  { %1381 = vmax.xlane.f32.xlu2 %v1380_v50  ;;  %v3772_v34 = vmax.f32 %v3765_v24, %v1394_v39  ;;  %v2347_v50 = vadd.f32 %v3595_v30, %v2155_v2  ;;  %v2156_v39 = vld [vmem:[#allocation4 + $0x88] sm:$0xff]  ;;  %v2332_v30 = vadd.f32 %v3647_v59, %v2140_v28  ;;  %v2158_v59 = vld [vmem:[#allocation4 + $0x98] sm:$0xff]  ;;  %v2333_v28 = vadd.f32 %v3715_v46, %v2141_v17 }
 0x163   :  { %v2348_v6 = vadd.f32 %v3672_v20, %v2156_v39  ;;  %v2350_v55 = vadd.f32 %v3734_v4, %v2158_v59  ;;  %v3829_v59 = vld [vmem:[#allocation2 + $0x98] sm:$0xff]  ;;  %v2144_v17 = vld [vmem:[#allocation4 + $0x28] sm:$0xff] }
 0x164   :  { %2379 = vst.msk [vmem:[#allocation4 + $0x80] sm:$0xff] %vm47_vm7, %v2347_v50  ;;  %v2142_v50 = vld [vmem:[#allocation4 + $0x18] sm:$0xff] }
 0x165   :  { %v2249_v37 = vpop.xlane.xlu2 %2248  ;;  %2364 = vst.msk [vmem:[#allocation4 + $0x8] sm:$0xff] %vm47_vm7, %v2332_v30  ;;  %v2159_v30 = vld [vmem:[#allocation4 + $0xa0] sm:$0xff] }
 0x166   :  { %2380 = vst.msk [vmem:[#allocation4 + $0x88] sm:$0xff] %vm47_vm7, %v2348_v6  ;;  %v2334_v6 = vadd.f32 %v2246_v42, %v2142_v50  ;;  %v2335_v40 = vadd.f32 %v2249_v37, %v2143_v9 }
 0x167   :  { %2365 = vst.msk [vmem:[#allocation4 + $0x10] sm:$0xff] %vm47_vm7, %v2333_v28  ;;  %v3845_v28 = vld [vmem:[#allocation2 + $0xa8] sm:$0xff] }
 0x168   :  { %2382 = vst.msk [vmem:[#allocation4 + $0x98] sm:$0xff] %vm47_vm7, %v2350_v55 }
 0x169   :  { %v2297_v2 = vpop.xlane.xlu0 %2296  ;;  %v1349_v54 = vpop.xlane.xlu1 %1348  ;;  %4558 = vst [vmem:[#allocation24_spill] sm:$0xff] %v3829_v59 }
 0x16a   :  { %v3797_v56 = vmax.f32 %v3785_v41, %v1349_v54  ;;  %v2351_v4 = vadd.f32 %v2297_v2, %v2159_v30  ;;  %2413 = vst.msk [vmem:[#allocation2 + $0x90] sm:$0xff] %vm47_vm7, %v3772_v34  ;;  %v2160_v2 = vld [vmem:[#allocation4 + $0xa8] sm:$0xff] }
 0x16b   :  { %2366 = vst.msk [vmem:[#allocation4 + $0x18] sm:$0xff] %vm47_vm7, %v2334_v6 }
 0x16c   :  { %2367 = vst.msk [vmem:[#allocation4 + $0x20] sm:$0xff] %vm47_vm7, %v2335_v40 }
 0x16d   :  { %v1352_v54 = vpop.xlane.xlu2 %1351  ;;  %2383 = vst.msk [vmem:[#allocation4 + $0xa0] sm:$0xff] %vm47_vm7, %v2351_v4 }
 0x16e   :  { %v3816_v39 = vmax.f32 %v3805_v38, %v1352_v54  ;;  %v3831_v54 = vld [vmem:[#allocation2 + $0xa0] sm:$0xff]  ;;  %2398 = vst.msk [vmem:[#allocation2 + $0x18] sm:$0xff] %vm47_vm7, %v3797_v56 }
 0x16f   :  { %4559 = vst [vmem:[#allocation25_spill] sm:$0xff] %v3831_v54  ;;  %v2147_v38 = vld [vmem:[#allocation4 + $0x40] sm:$0xff] }
 0x170   :  { %4557 = vst [vmem:[#allocation23_spill] sm:$0xff] %v3816_v39 }
 0x171   :  { %v1397_v46 = vpop.xlane.xlu1 %1396  ;;  %v2252_v49 = vpop.xlane.xlu0 %2251  ;;  %2399 = vst.msk [vmem:[#allocation2 + $0x20] sm:$0xff] %vm47_vm7, %v3816_v39 }
 0x172   :  { %1569 = vperm.xlu0 %2765, %v3679_v22   ;;  %v3838_v9 = vmax.f32 %v3829_v59, %v1397_v46  ;;  %v2336_v55 = vadd.f32 %v2252_v49, %v2144_v17  ;;  %v3861_v46 = vld [vmem:[#allocation2 + $0x28] sm:$0xff] }
 0x173   :  { %4562 = vst [vmem:[#allocation28_spill] sm:$0xff] %v3861_v46 }
 0x174   :  { %4560 = vst [vmem:[#allocation26_spill] sm:$0xff] %v3838_v9 }
 0x175   :  { %v1400_v42 = vpop.xlane.xlu2 %1399  ;;  %2414 = vst.msk [vmem:[#allocation2 + $0x98] sm:$0xff] %vm47_vm7, %v3838_v9 }
 0x176   :  { %v3841_v37 = vmax.f32 %v3831_v54, %v1400_v42  ;;  %2368 = vst.msk [vmem:[#allocation4 + $0x28] sm:$0xff] %vm47_vm7, %v2336_v55  ;;  %v2145_v42 = vld [vmem:[#allocation4 + $0x30] sm:$0xff] }
 0x177   :  { %1644 = vperm.xlu1 %2764, %v3756_v1   ;;  %v3873_v55 = vld [vmem:[#allocation2 + $0x30] sm:$0xff] }
 0x178   :  { %4561 = vst [vmem:[#allocation27_spill] sm:$0xff] %v3841_v37 }
 0x179   :  { %v2300_v50 = vpop.xlane.xlu1 %2299  ;;  %v1403_v30 = vpop.xlane.xlu0 %1402  ;;  %2415 = vst.msk [vmem:[#allocation2 + $0xa0] sm:$0xff] %vm47_vm7, %v3841_v37 }
 0x17a   :  { %v2352_v17 = vadd.f32 %v2300_v50, %v2160_v2  ;;  %v3856_v6 = vmax.f32 %v3845_v28, %v1403_v30  ;;  %1649 = vperm.xlu0 %2765, %v3763_v25   ;;  %1564 = vperm.xlu2 %2763, %v3664_v11   ;;  %4564 = vst [vmem:[#allocation30_spill] sm:$0xff] %v3873_v55 }
 0x17c   :  { %2384 = vst.msk [vmem:[#allocation4 + $0xa8] sm:$0xff] %vm47_vm7, %v2352_v17  ;;  %v2161_v17 = vld [vmem:[#allocation4 + $0xb0] sm:$0xff] }
 0x17d   :  { %v1355_v40 = vpop.xlane.xlu2 %1354  ;;  %2416 = vst.msk [vmem:[#allocation2 + $0xa8] sm:$0xff] %vm47_vm7, %v3856_v6 }
 0x17e   :  { %v3871_v4 = vmax.f32 %v3861_v46, %v1355_v40  ;;  %v3887_v46 = vld [vmem:[#allocation2 + $0xb0] sm:$0xff]  ;;  %v3897_v40 = vld [vmem:[#allocation2 + $0x38] sm:$0xff] }
 0x17f   :  { %4566 = vst [vmem:[#allocation32_spill] sm:$0xff] %v3887_v46 }
 0x180   :  { %4563 = vst [vmem:[#allocation29_spill] sm:$0xff] %v3871_v4 }
 0x181   :  { %2400 = vst.msk [vmem:[#allocation2 + $0x28] sm:$0xff] %vm47_vm7, %v3871_v4  ;;  %v2255_v2 = vpop.xlane.xlu1 %2254  ;;  %v1358_v50 = vpop.xlane.xlu0 %1357 }
 0x182   :  { %v2337_v30 = vadd.f32 %v2255_v2, %v2145_v42  ;;  %v3878_v21 = vmax.f32 %v3873_v55, %v1358_v50  ;;  %1664 = vperm.xlu0 %2765, %v3841_v37   ;;  %1654 = vperm.xlu2 %2763, %v3772_v34   ;;  %v2162_v42 = vld [vmem:[#allocation4 + $0xb8] sm:$0xff]  ;;  %4568 = vst [vmem:[#allocation34_spill] sm:$0xff] %v3897_v40  ;;  %v3957_v55 = vld [vmem:[#allocation2 + $0xc8] sm:$0xff] }
 0x183   :  { %4578 = vst [vmem:[#allocation44_spill] sm:$0xff] %v3957_v55 }
 0x184   :  { %4565 = vst [vmem:[#allocation31_spill] sm:$0xff] %v3878_v21 }
 0x185   :  { %2369 = vst.msk [vmem:[#allocation4 + $0x30] sm:$0xff] %vm47_vm7, %v2337_v30  ;;  %v2303_v49 = vpop.xlane.xlu2 %2302  ;;  %v2146_v30 = vld [vmem:[#allocation4 + $0x38] sm:$0xff] }
 0x186   :  { %2401 = vst.msk [vmem:[#allocation2 + $0x30] sm:$0xff] %vm47_vm7, %v3878_v21  ;;  %v2353_v20 = vadd.f32 %v2303_v49, %v2161_v17 }
 0x188   :  { %2385 = vst.msk [vmem:[#allocation4 + $0xb0] sm:$0xff] %vm47_vm7, %v2353_v20 }
 0x189   :  { %v1406_v2 = vpop.xlane.xlu1 %1405  ;;  %v2306_v50 = vpop.xlane.xlu0 %2305 }
 0x18a   :  { %v3891_v37 = vmax.f32 %v3887_v46, %v1406_v2  ;;  %v2354_v54 = vadd.f32 %v2306_v50, %v2162_v42  ;;  %1579 = vperm.xlu2 %2763, %v3797_v56   ;;  %v3904_v50 = vld [vmem:[#allocation2 + $0xb8] sm:$0xff]  ;;  %v318_v46 = vpop.f32.mrf.mxu2 }
 0x18b   :  { %4570 = vst [vmem:[#allocation36_spill] sm:$0xff] %v3904_v50 }
 0x18c   :  { %4567 = vst [vmem:[#allocation33_spill] sm:$0xff] %v3891_v37 }
 0x18d   :  { %2417 = vst.msk [vmem:[#allocation2 + $0xb0] sm:$0xff] %vm47_vm7, %v3891_v37  ;;  %v2258_v49 = vpop.xlane.xlu2 %2257 }
 0x18e   :  { %2386 = vst.msk [vmem:[#allocation4 + $0xb8] sm:$0xff] %vm47_vm7, %v2354_v54  ;;  %v2338_v17 = vadd.f32 %v2258_v49, %v2146_v30  ;;  %v3912_v49 = vmul.f32 14.285714, %v318_v46 }
 0x190   :  { %2370 = vst.msk [vmem:[#allocation4 + $0x38] sm:$0xff] %vm47_vm7, %v2338_v17  ;;  %v2163_v17 = vld [vmem:[#allocation4 + $0xc0] sm:$0xff]  ;;  %v3927_v46 = vsel %vm636_vm1, %v3912_v49, -1e+30 }
 0x191   :  { %v1361_v20 = vpop.xlane.xlu1 %1360  ;;  %v2261_v25 = vpop.xlane.xlu0 %2260  ;;  %4573 = vst [vmem:[#allocation39_spill] sm:$0xff] %v3927_v46 }
 0x192   :  { %v3901_v2 = vmax.f32 %v3897_v40, %v1361_v20  ;;  %v2339_v42 = vadd.f32 %v2261_v25, %v2147_v38  ;;  %1584 = vperm.xlu2 %2763, %v3816_v39   ;;  %v3914_v20 = vld [vmem:[#allocation2 + $0xc0] sm:$0xff] }
 0x193   :  { %4572 = vst [vmem:[#allocation38_spill] sm:$0xff] %v3914_v20 }
 0x194   :  { %4569 = vst [vmem:[#allocation35_spill] sm:$0xff] %v3901_v2 }
 0x195   :  { %2402 = vst.msk [vmem:[#allocation2 + $0x38] sm:$0xff] %vm47_vm7, %v3901_v2  ;;  %v1409_v54 = vpop.xlane.xlu2 %1408 }
 0x196   :  { %2371 = vst.msk [vmem:[#allocation4 + $0x40] sm:$0xff] %vm47_vm7, %v2339_v42  ;;  %v3910_v30 = vmax.f32 %v3904_v50, %v1409_v54  ;;  %v3930_v54 = vld [vmem:[#allocation2 + $0x40] sm:$0xff]  ;;  %v3941_v50 = vld [vmem:[#allocation2 + $0x48] sm:$0xff] }
 0x197   :  { %4574 = vst [vmem:[#allocation40_spill] sm:$0xff] %v3930_v54 }
 0x198   :  { %4571 = vst [vmem:[#allocation37_spill] sm:$0xff] %v3910_v30  ;;  %1679 = vperm.xlu0 %2765, %v3910_v30  }
 0x199   :  { %2418 = vst.msk [vmem:[#allocation2 + $0xb8] sm:$0xff] %vm47_vm7, %v3910_v30  ;;  %v2309_v25 = vpop.xlane.xlu1 %2308  ;;  %v1412_v40 = vpop.xlane.xlu0 %1411  ;;  %v2148_v30 = vld [vmem:[#allocation4 + $0x48] sm:$0xff] }
 0x19a   :  { %v2355_v42 = vadd.f32 %v2309_v25, %v2163_v17  ;;  %v3922_v39 = vmax.f32 %v3914_v20, %v1412_v40  ;;  %1669 = vperm.xlu2 %2763, %v3856_v6   ;;  %v1431_v40 = vmax.f32 %v3927_v46, -1e+30  ;;  %4576 = vst [vmem:[#allocation42_spill] sm:$0xff] %v3941_v50 }
 0x19c   :  { %2387 = vst.msk [vmem:[#allocation4 + $0xc0] sm:$0xff] %vm47_vm7, %v2355_v42 }
 0x19d   :  { %2419 = vst.msk [vmem:[#allocation2 + $0xc0] sm:$0xff] %vm47_vm7, %v3922_v39  ;;  %v1364_v17 = vpop.xlane.xlu2 %1363 }
 0x19e   :  { %v3939_v25 = vmax.f32 %v3930_v54, %v1364_v17  ;;  %v2164_v17 = vld [vmem:[#allocation4 + $0xc8] sm:$0xff] }
 0x1a0   :  { %4575 = vst [vmem:[#allocation41_spill] sm:$0xff] %v3939_v25  ;;  %1604 = vperm.xlu0 %2765, %v3939_v25  }
 0x1a1   :  { %2403 = vst.msk [vmem:[#allocation2 + $0x40] sm:$0xff] %vm47_vm7, %v3939_v25  ;;  %v2264_v42 = vpop.xlane.xlu1 %2263  ;;  %v1367_v38 = vpop.xlane.xlu0 %1366  ;;  %1432 = vmax.xlane.f32.xlu1 %v1431_v40  ;;  %v2150_v40 = vld [vmem:[#allocation4 + $0x58] sm:$0xff] }
 0x1a2   :  { %v2340_v20 = vadd.f32 %v2264_v42, %v2148_v30  ;;  %v3949_v46 = vmax.f32 %v3941_v50, %v1367_v38  ;;  %1594 = vperm.xlu2 %2763, %v3878_v21   ;;  %v3971_v50 = vld [vmem:[#allocation2 + $0xd8] sm:$0xff] }
 0x1a3   :  { %4581 = vst [vmem:[#allocation47_spill] sm:$0xff] %v3971_v50 }
 0x1a4   :  { %4577 = vst [vmem:[#allocation43_spill] sm:$0xff] %v3949_v46 }
 0x1a5   :  { %2372 = vst.msk [vmem:[#allocation4 + $0x48] sm:$0xff] %vm47_vm7, %v2340_v20  ;;  %v2312_v54 = vpop.xlane.xlu2 %2311  ;;  %v2149_v20 = vld [vmem:[#allocation4 + $0x50] sm:$0xff] }
 0x1a6   :  { %2404 = vst.msk [vmem:[#allocation2 + $0x48] sm:$0xff] %vm47_vm7, %v3949_v46  ;;  %v2356_v25 = vadd.f32 %v2312_v54, %v2164_v17 }
 0x1a8   :  { %2388 = vst.msk [vmem:[#allocation4 + $0xc8] sm:$0xff] %vm47_vm7, %v2356_v25  ;;  %v3969_v25 = vld [vmem:[#allocation2 + $0x50] sm:$0xff] }
 0x1a9   :  { %v1415_v30 = vpop.xlane.xlu1 %1414  ;;  %v2270_v38 = vpop.xlane.xlu0 %2269  ;;  %4580 = vst [vmem:[#allocation46_spill] sm:$0xff] %v3969_v25 }
 0x1aa   :  { %v3961_v42 = vmax.f32 %v3957_v55, %v1415_v30  ;;  %v2342_v21 = vadd.f32 %v2270_v38, %v2150_v40  ;;  %1684 = vperm.xlu2 %2763, %v3922_v39   ;;  %v3981_v55 = vld [vmem:[#allocation2 + $0xd0] sm:$0xff] }
 0x1ab   :  { %4584 = vst [vmem:[#allocation50_spill] sm:$0xff] %v3981_v55 }
 0x1ac   :  { %4579 = vst [vmem:[#allocation45_spill] sm:$0xff] %v3961_v42 }
 0x1ad   :  { %2420 = vst.msk [vmem:[#allocation2 + $0xc8] sm:$0xff] %vm47_vm7, %v3961_v42  ;;  %v2267_v54 = vpop.xlane.xlu2 %2266 }
 0x1ae   :  { %2374 = vst.msk [vmem:[#allocation4 + $0x58] sm:$0xff] %vm47_vm7, %v2342_v21  ;;  %v2341_v17 = vadd.f32 %v2267_v54, %v2149_v20 }
 0x1b0   :  { %2373 = vst.msk [vmem:[#allocation4 + $0x50] sm:$0xff] %vm47_vm7, %v2341_v17 }
 0x1b1   :  { %v1370_v40 = vpop.xlane.xlu1 %1369  ;;  %v1421_v30 = vpop.xlane.xlu0 %1420 }
 0x1b2   :  { %v3975_v38 = vmax.f32 %v3969_v25, %v1370_v40  ;;  %v3978_v59 = vmax.f32 %v3971_v50, %v1421_v30  ;;  %1609 = vperm.xlu2 %2763, %v3949_v46   ;;  %v2151_v40 = vld [vmem:[#allocation4 + $0x60] sm:$0xff] }
 0x1b3   :  { %v3994_v30 = vld [vmem:[#allocation2 + $0x60] sm:$0xff] }
 0x1b4   :  { %4582 = vst [vmem:[#allocation48_spill] sm:$0xff] %v3975_v38 }
 0x1b5   :  { %4583 = vst [vmem:[#allocation49_spill] sm:$0xff] %v3978_v59  ;;  %v1418_v54 = vpop.xlane.xlu2 %1417 }
 0x1b6   :  { %2405 = vst.msk [vmem:[#allocation2 + $0x50] sm:$0xff] %vm47_vm7, %v3975_v38  ;;  %v3992_v17 = vmax.f32 %v3981_v55, %v1418_v54  ;;  %v4006_v54 = vld [vmem:[#allocation2 + $0x58] sm:$0xff] }
 0x1b7   :  { %2422 = vst.msk [vmem:[#allocation2 + $0xd8] sm:$0xff] %vm47_vm7, %v3978_v59 }
 0x1b8   :  { %4585 = vst [vmem:[#allocation51_spill] sm:$0xff] %v3992_v17  ;;  %1694 = vperm.xlu0 %2765, %v3992_v17  }
 0x1b9   :  { %4586 = vst [vmem:[#allocation52_spill] sm:$0xff] %v3994_v30  ;;  %v2273_v21 = vpop.xlane.xlu1 %2272  ;;  %v1376_v20 = vpop.xlane.xlu0 %1375 }
 0x1ba   :  { %2421 = vst.msk [vmem:[#allocation2 + $0xd0] sm:$0xff] %vm47_vm7, %v3992_v17  ;;  %v2343_v25 = vadd.f32 %v2273_v21, %v2151_v40  ;;  %v4002_v50 = vmax.f32 %v3994_v30, %v1376_v20  ;;  %1574 = vperm.xlu1 %2764, %v3803_v35   ;;  %1699 = vperm.xlu2 %2763, %v3978_v59   ;;  %v4016_v20 = vld [vmem:[#allocation2 + $0xe0] sm:$0xff]  ;;  %v2153_v40 = vld [vmem:[#allocation4 + $0x70] sm:$0xff] }
 0x1bb   :  { %4588 = vst [vmem:[#allocation54_spill] sm:$0xff] %v4006_v54 }
 0x1bc   :  { %4587 = vst [vmem:[#allocation53_spill] sm:$0xff] %v4002_v50 }
 0x1bd   :  { %2375 = vst.msk [vmem:[#allocation4 + $0x60] sm:$0xff] %vm47_vm7, %v2343_v25  ;;  %v1373_v17 = vpop.xlane.xlu2 %1372 }
 0x1be   :  { %2407 = vst.msk [vmem:[#allocation2 + $0x60] sm:$0xff] %vm47_vm7, %v4002_v50  ;;  %v4014_v21 = vmax.f32 %v4006_v54, %v1373_v17  ;;  %v2152_v17 = vld [vmem:[#allocation4 + $0x68] sm:$0xff] }
 0x1bf   :  { %4590 = vst [vmem:[#allocation56_spill] sm:$0xff] %v4016_v20  ;;  %v4033_v54 = vld [vmem:[#allocation2 + $0x68] sm:$0xff] }
 0x1c0   :  { %4589 = vst [vmem:[#allocation55_spill] sm:$0xff] %v4014_v21  ;;  %1619 = vperm.xlu0 %2765, %v4014_v21  }
 0x1c1   :  { %2406 = vst.msk [vmem:[#allocation2 + $0x58] sm:$0xff] %vm47_vm7, %v4014_v21  ;;  %v1424_v25 = vpop.xlane.xlu1 %1423  ;;  %v2279_v46 = vpop.xlane.xlu0 %2278 }
 0x1c2   :  { %v4024_v35 = vmax.f32 %v4016_v20, %v1424_v25  ;;  %v2345_v30 = vadd.f32 %v2279_v46, %v2153_v40  ;;  %1659 = vperm.xlu1 %2764, %v3838_v9   ;;  %1624 = vperm.xlu2 %2763, %v4002_v50   ;;  %4592 = vst [vmem:[#allocation58_spill] sm:$0xff] %v4033_v54  ;;  %v4035_v25 = vld [vmem:[#allocation2 + $0xf0] sm:$0xff]  ;;  %v4059_v20 = vld [vmem:[#allocation2 + $0x78] sm:$0xff] }
 0x1c3   :  { %4593 = vst [vmem:[#allocation59_spill] sm:$0xff] %v4035_v25 }
 0x1c4   :  { %4591 = vst [vmem:[#allocation57_spill] sm:$0xff] %v4024_v35 }
 0x1c5   :  { %2423 = vst.msk [vmem:[#allocation2 + $0xe0] sm:$0xff] %vm47_vm7, %v4024_v35  ;;  %v2276_v55 = vpop.xlane.xlu2 %2275 }
 0x1c6   :  { %2377 = vst.msk [vmem:[#allocation4 + $0x70] sm:$0xff] %vm47_vm7, %v2345_v30  ;;  %v2344_v21 = vadd.f32 %v2276_v55, %v2152_v17  ;;  %v4074_v30 = vld [vmem:[#allocation2 + $0x70] sm:$0xff] }
 0x1c7   :  { %4597 = vst [vmem:[#allocation63_spill] sm:$0xff] %v4059_v20 }
 0x1c8   :  { %2376 = vst.msk [vmem:[#allocation4 + $0x68] sm:$0xff] %vm47_vm7, %v2344_v21  ;;  %v4052_v21 = vld [vmem:[#allocation2 + $0xe8] sm:$0xff] }
 0x1c9   :  { %v1379_v46 = vpop.xlane.xlu1 %1378  ;;  %v1430_v40 = vpop.xlane.xlu0 %1429  ;;  %4595 = vst [vmem:[#allocation61_spill] sm:$0xff] %v4052_v21 }
 0x1ca   :  { %v4039_v9 = vmax.f32 %v4033_v54, %v1379_v46  ;;  %v4042_v59 = vmax.f32 %v4035_v25, %v1430_v40  ;;  %1589 = vperm.xlu1 %2764, %v3871_v4   ;;  %v2154_v40 = vld [vmem:[#allocation4 + $0x78] sm:$0xff]  ;;  %4599 = vst [vmem:[#allocation65_spill] sm:$0xff] %v4074_v30  ;;  %v200_v25 = vld [vmem:[#allocation7 + $0xc0] sm:$0xff] }
 0x1cc   :  { %4594 = vst [vmem:[#allocation60_spill] sm:$0xff] %v4042_v59  ;;  %1714 = vperm.xlu2 %2763, %v4042_v59  }
 0x1cd   :  { %2408 = vst.msk [vmem:[#allocation2 + $0x68] sm:$0xff] %vm47_vm7, %v4039_v9  ;;  %v1427_v17 = vpop.xlane.xlu2 %1426 }
 0x1ce   :  { %2425 = vst.msk [vmem:[#allocation2 + $0xf0] sm:$0xff] %vm47_vm7, %v4042_v59  ;;  %v4057_v46 = vmax.f32 %v4052_v21, %v1427_v17  ;;  %v207_v21 = vld [vmem:[#allocation7 + $0xf8] sm:$0xff]  ;;  %v205_v17 = vld [vmem:[#allocation7 + $0xe8] sm:$0xff] }
 0x1cf   :  { %2740 = vmatpush.xpose.msra.mxu3 %v207_v21  ;;  %321 = vmatpush.xpose.msra.mxu1 %v207_v21 }
 0x1d0   :  { %4596 = vst [vmem:[#allocation62_spill] sm:$0xff] %v4057_v46  ;;  %1709 = vperm.xlu0 %2765, %v4057_v46  }
 0x1d1   :  { %2424 = vst.msk [vmem:[#allocation2 + $0xe8] sm:$0xff] %vm47_vm7, %v4057_v46  ;;  %v2282_v55 = vpop.xlane.xlu1 %2281  ;;  %v1385_v54 = vpop.xlane.xlu0 %1384  ;;  %v204_v46 = vld [vmem:[#allocation7 + $0xe0] sm:$0xff] }
 0x1d2   :  { %v2346_v4 = vadd.f32 %v2282_v55, %v2154_v40  ;;  %v4067_v59 = vmax.f32 %v4059_v20, %v1385_v54  ;;  %1674 = vperm.xlu1 %2764, %v3891_v37   ;;  %v206_v54 = vld [vmem:[#allocation7 + $0xf0] sm:$0xff] }
 0x1d3   :  { %2741 = vmatpush.xpose.msra.mxu3 %v206_v54  ;;  %322 = vmatpush.xpose.msra.mxu1 %v206_v54  ;;  %v202_v37 = vld [vmem:[#allocation7 + $0xd0] sm:$0xff]  ;;  %v201_v54 = vld [vmem:[#allocation7 + $0xc8] sm:$0xff] }
 0x1d4   :  { %4598 = vst [vmem:[#allocation64_spill] sm:$0xff] %v4067_v59  ;;  %1639 = vperm.xlu2 %2763, %v4067_v59  }
 0x1d5   :  { %2378 = vst.msk [vmem:[#allocation4 + $0x78] sm:$0xff] %vm47_vm7, %v2346_v4  ;;  %v1382_v55 = vpop.xlane.xlu2 %1381 }
 0x1d6   :  { %2410 = vst.msk [vmem:[#allocation2 + $0x78] sm:$0xff] %vm47_vm7, %v4067_v59  ;;  %v4079_v40 = vmax.f32 %v4074_v30, %v1382_v55  ;;  %v203_v55 = vld [vmem:[#allocation7 + $0xd8] sm:$0xff] }
 0x1d7   :  { %2742 = vmatpush.xpose.msra.mxu3 %v205_v17  ;;  %323 = vmatpush.xpose.msra.mxu1 %v205_v17 }
 0x1d8   :  { %4600 = vst [vmem:[#allocation66_spill] sm:$0xff] %v4079_v40  ;;  %1634 = vperm.xlu0 %2765, %v4079_v40  }
 0x1d9   :  { %2409 = vst.msk [vmem:[#allocation2 + $0x70] sm:$0xff] %vm47_vm7, %v4079_v40 }
 0x1da   :  { %1599 = vperm.xlu1 %2764, %v3901_v2  }
 0x1db   :  { %2743 = vmatpush.xpose.msra.mxu3 %v204_v46  ;;  %324 = vmatpush.xpose.msra.mxu1 %v204_v46 }
 0x1dd   :  { %v1565_v21 = vpop.permute.xlu2 %1564 }
 0x1de   :  { %v1722_v46 = vsub.f32 %v3150_v58, %v1565_v21 }
 0x1df   :  { %2744 = vmatpush.xpose.msra.mxu3 %v203_v55  ;;  %325 = vmatpush.xpose.msra.mxu1 %v203_v55 }
 0x1e2   :  { %1689 = vperm.xlu1 %2764, %v3961_v42   ;;  %v1723_v42 = vsub.f32 -1e+30, %v1565_v21  ;;  %v198_v21 = vld [vmem:[#allocation7 + $0xb0] sm:$0xff] }
 0x1e3   :  { %2745 = vmatpush.xpose.msra.mxu3 %v202_v37  ;;  %326 = vmatpush.xpose.msra.mxu1 %v202_v37  ;;  %v1786_v37 = vmul.f32 1.442695, %v1722_v46 }
 0x1e4   :  { %v1570_v4 = vpop.permute.xlu0 %1569 }
 0x1e5   :  { %v1655_v30 = vpop.permute.xlu2 %1654  ;;  %v1724_v40 = vsub.f32 %v3172_v8, %v1570_v4  ;;  %v1725_v2 = vsub.f32 -1e+30, %v1570_v4  ;;  %v1788_v4 = vmul.f32 1.442695, %v1723_v42 }
 0x1e6   :  { %v1758_v55 = vsub.f32 %v3237_v44, %v1655_v30  ;;  %v1759_v8 = vsub.f32 -1e+30, %v1655_v30 }
 0x1e7   :  { %v1790_v59 = vmul.f32 1.442695, %v1724_v40  ;;  %2746 = vmatpush.xpose.msra.mxu3 %v201_v54  ;;  %v1792_v17 = vmul.f32 1.442695, %v1725_v2  ;;  %327 = vmatpush.xpose.msra.mxu1 %v201_v54 }
 0x1e8   :  { %v1858_v2 = vmul.f32 1.442695, %v1758_v55  ;;  %v1860_v54 = vmul.f32 1.442695, %v1759_v8 }
 0x1e9   :  { %2766 = vpow2.f32 %v1790_v59  ;;  %v1645_v40 = vpop.permute.xlu1 %1644 }
 0x1ea   :  { %1614 = vperm.xlu1 %2764, %v3975_v38   ;;  %2768 = vpow2.f32 %v1792_v17  ;;  %v199_v38 = vld [vmem:[#allocation7 + $0xb8] sm:$0xff]  ;;  %v1754_v44 = vsub.f32 %v3167_v5, %v1645_v40  ;;  %v1755_v30 = vsub.f32 -1e+30, %v1645_v40  ;;  %v197_v40 = vld [vmem:[#allocation7 + $0xa8] sm:$0xff] }
 0x1eb   :  { %2747 = vmatpush.xpose.msra.mxu3 %v200_v25  ;;  %328 = vmatpush.xpose.msra.mxu1 %v200_v25  ;;  %2770 = vpow2.f32 %v1786_v37 }
 0x1ec   :  { %2772 = vpow2.f32 %v1788_v4  ;;  %v1850_v17 = vmul.f32 1.442695, %v1754_v44 }
 0x1ed   :  { %v1580_v20 = vpop.permute.xlu2 %1579  ;;  %2774 = vpow2.f32 %v1858_v2 }
 0x1ee   :  { %v1728_v25 = vsub.f32 %v3255_v57, %v1580_v20  ;;  %2776 = vpow2.f32 %v1860_v54  ;;  %v1729_v42 = vsub.f32 -1e+30, %v1580_v20  ;;  %v196_v20 = vld [vmem:[#allocation7 + $0xa0] sm:$0xff] }
 0x1ef   :  { %2748 = vmatpush.xpose.msra.mxu3 %v199_v38  ;;  %329 = vmatpush.xpose.msra.mxu1 %v199_v38  ;;  %v2767_v58 = vpop.eup %2766  ;;  %v1852_v38 = vmul.f32 1.442695, %v1755_v30  ;;  %2778 = vpow2.f32 %v1850_v17 }
 0x1f0   :  { %v2769_v59 = vpop.eup %2768  ;;  %v1798_v8 = vmul.f32 1.442695, %v1728_v25  ;;  %v1800_v37 = vmul.f32 1.442695, %v1729_v42 }
 0x1f1   :  { %v1981_v46 = vadd.f32 %v2769_v59, %v2767_v58  ;;  %v2771_v55 = vpop.eup %2770  ;;  %2780 = vpow2.f32 %v1852_v38  ;;  %v195_v59 = vld [vmem:[#allocation7 + $0x98] sm:$0xff] }
 0x1f2   :  { %1704 = vperm.xlu1 %2764, %v4024_v35   ;;  %v2773_v5 = vpop.eup %2772  ;;  %2782 = vpow2.f32 %v1798_v8  ;;  %v194_v8 = vld [vmem:[#allocation7 + $0x90] sm:$0xff] }
 0x1f3   :  { %2749 = vmatpush.xpose.msra.mxu3 %v198_v21  ;;  %330 = vmatpush.xpose.msra.mxu1 %v198_v21  ;;  %v2775_v35 = vpop.eup %2774  ;;  %v1978_v54 = vadd.f32 %v2773_v5, %v2771_v55  ;;  %2784 = vpow2.f32 %v1800_v37  ;;  %v193_v37 = vld [vmem:[#allocation7 + $0x88] sm:$0xff] }
 0x1f4   :  { %v2777_v57 = vpop.eup %2776 }
 0x1f5   :  { %v4093_v50 = vpop.permute.xlu2 %1584  ;;  %v2032_v44 = vadd.f32 %v2777_v57, %v2775_v35  ;;  %v2779_v30 = vpop.eup %2778 }
 0x1f7   :  { %2750 = vmatpush.xpose.msra.mxu3 %v197_v40  ;;  %331 = vmatpush.xpose.msra.mxu1 %v197_v40  ;;  %v2781_v25 = vpop.eup %2780 }
 0x1f8   :  { %v2026_v55 = vadd.f32 %v2781_v25, %v2779_v30 }
 0x1fa   :  { %1629 = vperm.xlu1 %2764, %v4039_v9  }
 0x1fb   :  { %2751 = vmatpush.xpose.msra.mxu3 %v196_v20  ;;  %332 = vmatpush.xpose.msra.mxu1 %v196_v20 }
 0x1fd   :  { %1982 = vadd.xlane.f32.xlu2 %v1981_v46  ;;  %v1670_v4 = vpop.permute.xlu2 %1669  ;;  %v2783_v46 = vpop.eup %2782 }
 0x1fe   :  { %v1764_v2 = vsub.f32 %v3287_v16, %v1670_v4  ;;  %v1765_v58 = vsub.f32 -1e+30, %v1670_v4  ;;  %v2785_v38 = vpop.eup %2784 }
 0x1ff   :  { %2752 = vmatpush.xpose.msra.mxu3 %v195_v59  ;;  %333 = vmatpush.xpose.msra.mxu1 %v195_v59  ;;  %v1987_v5 = vadd.f32 %v2785_v38, %v2783_v46  ;;  %v3022_v46 = vld [vmem:[#allocation5 + $0x80] sm:$0xff] }
 0x200   :  { %v1870_v21 = vmul.f32 1.442695, %v1764_v2  ;;  %v1872_v42 = vmul.f32 1.442695, %v1765_v58 }
 0x202   :  { %1979 = vadd.xlane.f32.xlu0 %v1978_v54  ;;  %2786 = vpow2.f32 %v1870_v21  ;;  %v192_v54 = vld [vmem:[#allocation7 + $0x80] sm:$0xff] }
 0x203   :  { %2788 = vpow2.f32 %v1872_v42  ;;  %2753 = vmatpush.xpose.msra.mxu3 %v194_v8  ;;  %334 = vmatpush.xpose.msra.mxu1 %v194_v8  ;;  %v3023_v8 = vld [vmem:[#allocation5] sm:$0xff] }
 0x205   :  { %2033 = vadd.xlane.f32.xlu2 %v2032_v44  ;;  %v1595_v17 = vpop.permute.xlu2 %1594  ;;  %v4101_v44 = vld [vmem:[#allocation2 + $0xf8] sm:$0xff] }
 0x206   :  { %v1734_v16 = vsub.f32 %v3309_v31, %v1595_v17  ;;  %v1735_v35 = vsub.f32 -1e+30, %v1595_v17 }
 0x207   :  { %2754 = vmatpush.xpose.msra.mxu3 %v193_v37  ;;  %335 = vmatpush.xpose.msra.mxu1 %v193_v37 }
 0x208   :  { %v1810_v4 = vmul.f32 1.442695, %v1734_v16  ;;  %v1812_v40 = vmul.f32 1.442695, %v1735_v35  ;;  %v2787_v20 = vpop.eup %2786 }
 0x209   :  { %v2789_v2 = vpop.eup %2788 }
 0x20a   :  { %2027 = vadd.xlane.f32.xlu0 %v2026_v55  ;;  %2790 = vpow2.f32 %v1810_v4  ;;  %v2041_v59 = vadd.f32 %v2789_v2, %v2787_v20  ;;  %v3025_v2 = vld [vmem:[#allocation5 + $0x8] sm:$0xff] }
 0x20b   :  { %2792 = vpow2.f32 %v1812_v40  ;;  %2755 = vmatpush.xpose.msra.mxu3 %v192_v54  ;;  %336 = vmatpush.xpose.msra.mxu1 %v192_v54 }
 0x20d   :  { %1988 = vadd.xlane.f32.xlu2 %v1987_v5  ;;  %v1685_v57 = vpop.permute.xlu2 %1684 }
 0x20e   :  { %v1770_v31 = vsub.f32 %v3382_v12, %v1685_v57  ;;  %v1771_v58 = vsub.f32 -1e+30, %v1685_v57  ;;  %385 = vmatmul.f32.vlgmr.msra.gmra.mxu3 %v3022_v46  ;;  %337 = vmatmul.f32.vlgmr.msra.gmra.mxu1 %v3023_v8  ;;  %v3024_v57 = vld [vmem:[#allocation5 + $0x88] sm:$0xff]  ;;  %v3027_v46 = vld [vmem:[#allocation5 + $0x10] sm:$0xff] }
 0x210   :  { %v1882_v21 = vmul.f32 1.442695, %v1770_v31  ;;  %v1884_v42 = vmul.f32 1.442695, %v1771_v58  ;;  %v2791_v38 = vpop.eup %2790 }
 0x211   :  { %v2793_v16 = vpop.eup %2792 }
 0x212   :  { %2794 = vpow2.f32 %v1882_v21  ;;  %v1996_v5 = vadd.f32 %v2793_v16, %v2791_v38  ;;  %v1650_v16 = vpop.permute.xlu0 %1649 }
 0x213   :  { %2796 = vpow2.f32 %v1884_v42  ;;  %v3026_v42 = vld [vmem:[#allocation5 + $0x90] sm:$0xff] }
 0x214   :  { %v1433_v30 = vpop.xlane.xlu1 %1432 }
 0x215   :  { %v4104_v25 = vmax.f32 %v4101_v44, %v1433_v30  ;;  %2042 = vadd.xlane.f32.xlu2 %v2041_v59  ;;  %v1610_v17 = vpop.permute.xlu2 %1609 }
 0x216   :  { %v1740_v55 = vsub.f32 %v3432_v33, %v1610_v17  ;;  %v1741_v35 = vsub.f32 -1e+30, %v1610_v17  ;;  %388 = vmatmul.f32.gmra.mxu3 %v3024_v57  ;;  %340 = vmatmul.f32.gmra.mxu1 %v3025_v2 }
 0x217   :  { %v1497_v12 = vsub.f32 %v4101_v44, %v4104_v25  ;;  %2426 = vst.msk [vmem:[#allocation2 + $0xf8] sm:$0xff] %vm47_vm7, %v4104_v25  ;;  %1719 = vperm.xlu1 %2764, %v4104_v25  }
 0x218   :  { %v1822_v37 = vmul.f32 1.442695, %v1740_v55  ;;  %v1824_v4 = vmul.f32 1.442695, %v1741_v35  ;;  %v2795_v20 = vpop.eup %2794 }
 0x219   :  { %v2797_v54 = vpop.eup %2796 }
 0x21a   :  { %2798 = vpow2.f32 %v1822_v37  ;;  %v2050_v59 = vadd.f32 %v2797_v54, %v2795_v20  ;;  %v3028_v20 = vld [vmem:[#allocation5 + $0x98] sm:$0xff] }
 0x21b   :  { %2800 = vpow2.f32 %v1824_v4  ;;  %v1757_v4 = vsub.f32 -1e+30, %v1650_v16 }
 0x21d   :  { %1997 = vadd.xlane.f32.xlu2 %v1996_v5  ;;  %v1700_v40 = vpop.permute.xlu2 %1699  ;;  %v1756_v5 = vsub.f32 %v3197_v23, %v1650_v16  ;;  %v3030_v16 = vld [vmem:[#allocation5 + $0xa0] sm:$0xff] }
 0x21e   :  { %v1776_v31 = vsub.f32 %v3512_v60, %v1700_v40  ;;  %v1777_v58 = vsub.f32 -1e+30, %v1700_v40  ;;  %391 = vmatmul.f32.gmra.mxu3 %v3026_v42  ;;  %343 = vmatmul.f32.gmra.mxu1 %v3027_v46 }
 0x220   :  { %v1894_v33 = vmul.f32 1.442695, %v1776_v31  ;;  %v1896_v30 = vmul.f32 1.442695, %v1777_v58  ;;  %v2799_v17 = vpop.eup %2798  ;;  %v3029_v31 = vld [vmem:[#allocation5 + $0x18] sm:$0xff] }
 0x221   :  { %v2801_v38 = vpop.eup %2800 }
 0x222   :  { %2802 = vpow2.f32 %v1894_v33  ;;  %v2005_v60 = vadd.f32 %v2801_v38, %v2799_v17  ;;  %v1856_v33 = vmul.f32 1.442695, %v1757_v4  ;;  %v3031_v4 = vld [vmem:[#allocation5 + $0x20] sm:$0xff] }
 0x223   :  { %2804 = vpow2.f32 %v1896_v30 }
 0x225   :  { %2051 = vadd.xlane.f32.xlu2 %v2050_v59  ;;  %v1625_v21 = vpop.permute.xlu2 %1624  ;;  %v1854_v59 = vmul.f32 1.442695, %v1756_v5 }
 0x226   :  { %v1746_v8 = vsub.f32 %v3598_v32, %v1625_v21  ;;  %v1747_v55 = vsub.f32 -1e+30, %v1625_v21  ;;  %394 = vmatmul.f32.gmra.mxu3 %v3028_v20  ;;  %346 = vmatmul.f32.gmra.mxu1 %v3029_v31 }
 0x228   :  { %v1834_v37 = vmul.f32 1.442695, %v1746_v8  ;;  %v1836_v40 = vmul.f32 1.442695, %v1747_v55  ;;  %v2803_v2 = vpop.eup %2802 }
 0x229   :  { %v2805_v32 = vpop.eup %2804 }
 0x22a   :  { %2806 = vpow2.f32 %v1834_v37  ;;  %v2059_v23 = vadd.f32 %v2805_v32, %v2803_v2 }
 0x22b   :  { %2808 = vpow2.f32 %v1836_v40 }
 0x22c   :  { %v1575_v35 = vpop.permute.xlu1 %1574  ;;  %2810 = vpow2.f32 %v1854_v59 }
 0x22d   :  { %2006 = vadd.xlane.f32.xlu2 %v2005_v60  ;;  %v1715_v57 = vpop.permute.xlu2 %1714  ;;  %v1726_v17 = vsub.f32 %v3191_v19, %v1575_v35  ;;  %2812 = vpow2.f32 %v1856_v33  ;;  %v1730_v60 = vsub.f32 %v3260_v61, %v4093_v50  ;;  %v1665_v19 = vpop.permute.xlu0 %1664 }
 0x22e   :  { %v1782_v54 = vsub.f32 %v3689_v27, %v1715_v57  ;;  %v1783_v58 = vsub.f32 -1e+30, %v1715_v57  ;;  %v1727_v27 = vsub.f32 -1e+30, %v1575_v35  ;;  %397 = vmatmul.f32.gmra.mxu3 %v3030_v16  ;;  %349 = vmatmul.f32.gmra.mxu1 %v3031_v4 }
 0x22f   :  { %v1794_v57 = vmul.f32 1.442695, %v1726_v17  ;;  %v1802_v31 = vmul.f32 1.442695, %v1730_v60 }
 0x230   :  { %v1906_v30 = vmul.f32 1.442695, %v1782_v54  ;;  %v1908_v21 = vmul.f32 1.442695, %v1783_v58  ;;  %v2807_v55 = vpop.eup %2806  ;;  %v1796_v20 = vmul.f32 1.442695, %v1727_v27 }
 0x231   :  { %v2809_v40 = vpop.eup %2808 }
 0x232   :  { %2814 = vpow2.f32 %v1906_v30  ;;  %v2811_v54 = vpop.eup %2810  ;;  %v2014_v61 = vadd.f32 %v2809_v40, %v2807_v55  ;;  %v1762_v30 = vsub.f32 %v3281_v14, %v1665_v19 }
 0x233   :  { %2816 = vpow2.f32 %v1908_v21  ;;  %v2813_v32 = vpop.eup %2812  ;;  %v1763_v21 = vsub.f32 -1e+30, %v1665_v19 }
 0x234   :  { %v1660_v42 = vpop.permute.xlu1 %1659  ;;  %v1866_v16 = vmul.f32 1.442695, %v1762_v30 }
 0x235   :  { %v1760_v46 = vsub.f32 %v3276_v7, %v1660_v42  ;;  %v1761_v38 = vsub.f32 -1e+30, %v1660_v42  ;;  %2060 = vadd.xlane.f32.xlu2 %v2059_v23  ;;  %v1640_v8 = vpop.permute.xlu2 %1639  ;;  %v1731_v7 = vsub.f32 -1e+30, %v4093_v50  ;;  %v1868_v55 = vmul.f32 1.442695, %v1763_v21 }
 0x236   :  { %v1752_v35 = vsub.f32 %v3726_v62, %v1640_v8  ;;  %v1753_v2 = vsub.f32 -1e+30, %v1640_v8  ;;  %v3032_v62 = vld [vmem:[#allocation5 + $0xa8] sm:$0xff]  ;;  %v4123_v8 = vpop.permute.xlu0 %1679 }
 0x237   :  { %v1862_v5 = vmul.f32 1.442695, %v1760_v46  ;;  %v1864_v37 = vmul.f32 1.442695, %v1761_v38  ;;  %v1804_v58 = vmul.f32 1.442695, %v1731_v7  ;;  %400 = vmatmul.f32.gmra.mxu3 %v3032_v62  ;;  %v2029_v46 = vadd.f32 %v2813_v32, %v2811_v54 }
 0x238   :  { %v2815_v33 = vpop.eup %2814  ;;  %v1846_v23 = vmul.f32 1.442695, %v1752_v35  ;;  %v1848_v42 = vmul.f32 1.442695, %v1753_v2  ;;  %v3033_v38 = vld [vmem:[#allocation5 + $0x28] sm:$0xff]  ;;  %v528_v2 = vadd.s32 224, %v3134_v47 }
 0x239   :  { %2818 = vpow2.f32 %v1862_v5  ;;  %v2817_v50 = vpop.eup %2816  ;;  %352 = vmatmul.f32.gmra.mxu1 %v3033_v38  ;;  %v3034_v54 = vld [vmem:[#allocation5 + $0xb0] sm:$0xff] }
 0x23a   :  { %2820 = vpow2.f32 %v1864_v37  ;;  %v2068_v5 = vadd.f32 %v2817_v50, %v2815_v33  ;;  %v3035_v33 = vld [vmem:[#allocation5 + $0x30] sm:$0xff]  ;;  %v906_v21 = vand.u32 7, %v528_v2 }
 0x23b   :  { %2822 = vpow2.f32 %v1794_v57 }
 0x23c   :  { %v1590_v59 = vpop.permute.xlu1 %1589  ;;  %2824 = vpow2.f32 %v1796_v20  ;;  %vm1170_vm13 = vcmp.eq.s32.totalorder %v906_v21, %v3140_v51  ;;  %v3039_v21 = vld [vmem:[#allocation5 + $0x40] sm:$0xff] }
 0x23d   :  { %2015 = vadd.xlane.f32.xlu2 %v2014_v61  ;;  %2826 = vpow2.f32 %v1802_v31  ;;  %v1732_v19 = vsub.f32 %v3304_v29, %v1590_v59  ;;  %v1733_v20 = vsub.f32 -1e+30, %v1590_v59  ;;  %vm4138_vm14 = vmand %vm636_vm1, %vm1170_vm13 }
 0x23e   :  { %2828 = vpow2.f32 %v1804_v58 }
 0x23f   :  { %v2819_v17 = vpop.eup %2818  ;;  %2830 = vpow2.f32 %v1846_v23  ;;  %403 = vmatmul.f32.gmra.mxu3 %v3034_v54  ;;  %v1806_v23 = vmul.f32 1.442695, %v1732_v19  ;;  %v1808_v50 = vmul.f32 1.442695, %v1733_v20 }
 0x240   :  { %v2821_v27 = vpop.eup %2820  ;;  %2832 = vpow2.f32 %v1848_v42 }
 0x241   :  { %2030 = vadd.xlane.f32.xlu1 %v2029_v46  ;;  %v2035_v14 = vadd.f32 %v2821_v27, %v2819_v17  ;;  %v2823_v60 = vpop.eup %2822  ;;  %2834 = vpow2.f32 %v1866_v16  ;;  %355 = vmatmul.f32.gmra.mxu1 %v3035_v33  ;;  %v1768_v46 = vsub.f32 %v3372_v10, %v4123_v8  ;;  %v1769_v16 = vsub.f32 -1e+30, %v4123_v8 }
 0x242   :  { %v2825_v37 = vpop.eup %2824  ;;  %2836 = vpow2.f32 %v1868_v55  ;;  %v3036_v55 = vld [vmem:[#allocation5 + $0xb8] sm:$0xff] }
 0x243   :  { %2036 = vadd.xlane.f32.xlu0 %v2035_v14  ;;  %v2827_v40 = vpop.eup %2826  ;;  %v1984_v58 = vadd.f32 %v2825_v37, %v2823_v60  ;;  %v531_v14 = vadd.s32 248, %v3134_v47  ;;  %v1878_v19 = vmul.f32 1.442695, %v1768_v46  ;;  %v1880_v8 = vmul.f32 1.442695, %v1769_v16 }
 0x244   :  { %v1675_v4 = vpop.permute.xlu1 %1674  ;;  %v2829_v35 = vpop.eup %2828 }
 0x245   :  { %v1766_v7 = vsub.f32 %v3324_v45, %v1675_v4  ;;  %v1767_v57 = vsub.f32 -1e+30, %v1675_v4  ;;  %2069 = vadd.xlane.f32.xlu2 %v2068_v5  ;;  %v2831_v31 = vpop.eup %2830  ;;  %v1990_v29 = vadd.f32 %v2829_v35, %v2827_v40  ;;  %v4128_v45 = vpop.permute.xlu0 %1604  ;;  %v3037_v4 = vld [vmem:[#allocation5 + $0x38] sm:$0xff]  ;;  %v927_v35 = vand.u32 7, %v531_v14 }
 0x246   :  { %v2833_v30 = vpop.eup %2832  ;;  %v1739_v33 = vsub.f32 -1e+30, %v4128_v45 }
 0x247   :  { %v1874_v61 = vmul.f32 1.442695, %v1766_v7  ;;  %v1876_v32 = vmul.f32 1.442695, %v1767_v57  ;;  %v2835_v59 = vpop.eup %2834  ;;  %v2023_v42 = vadd.f32 %v2833_v30, %v2831_v31  ;;  %406 = vmatmul.f32.gmra.mxu3 %v3036_v55  ;;  %v2227_v31 = vsel %vm4138_vm14, %v3609_v36, 0.0  ;;  %v3038_v30 = vld [vmem:[#allocation5 + $0xc0] sm:$0xff] }
 0x248   :  { %v2837_v62 = vpop.eup %2836  ;;  %vm1176_vm15 = vcmp.eq.s32.totalorder %v927_v35, %v3140_v51 }
 0x249   :  { %1985 = vadd.xlane.f32.xlu1 %v1984_v58  ;;  %2838 = vpow2.f32 %v1874_v61  ;;  %v2038_v37 = vadd.f32 %v2837_v62, %v2835_v59  ;;  %358 = vmatmul.f32.gmra.mxu1 %v3037_v4  ;;  %v1738_v61 = vsub.f32 %v3416_v26, %v4128_v45  ;;  %vm1240_vm0 = vmand %vm636_vm1, %vm1176_vm15  ;;  %v1820_v26 = vmul.f32 1.442695, %v1739_v33 }
 0x24a   :  { %2840 = vpow2.f32 %v1876_v32 }
 0x24b   :  { %1991 = vadd.xlane.f32.xlu0 %v1990_v29  ;;  %2842 = vpow2.f32 %v1806_v23 }
 0x24c   :  { %v1600_v17 = vpop.permute.xlu1 %1599  ;;  %2844 = vpow2.f32 %v1808_v50 }
 0x24d   :  { %v1736_v38 = vsub.f32 %v3353_v63, %v1600_v17  ;;  %v1737_v27 = vsub.f32 -1e+30, %v1600_v17  ;;  %2024 = vadd.xlane.f32.xlu2 %v2023_v42  ;;  %v1695_v7 = vpop.permute.xlu0 %1694  ;;  %v1818_v42 = vmul.f32 1.442695, %v1738_v61 }
 0x24e   :  { %v1775_v55 = vsub.f32 -1e+30, %v1695_v7 }
 0x24f   :  { %v1814_v60 = vmul.f32 1.442695, %v1736_v38  ;;  %v1816_v5 = vmul.f32 1.442695, %v1737_v27  ;;  %v2839_v10 = vpop.eup %2838  ;;  %409 = vmatmul.f32.gmra.mxu3 %v3038_v30  ;;  %v2233_v38 = vsel %vm1240_vm0, %v3912_v49, 0.0  ;;  %v1774_v27 = vsub.f32 %v3549_v13, %v1695_v7 }
 0x250   :  { %v2841_v40 = vpop.eup %2840  ;;  %v4603_v49 = vsub.f32 %v3668_v15, %v3679_v22  ;;  %v3042_v22 = vld [vmem:[#allocation5 + $0xd0] sm:$0xff] }
 0x251   :  { %2039 = vadd.xlane.f32.xlu1 %v2038_v37  ;;  %2846 = vpow2.f32 %v1814_v60  ;;  %v2044_v57 = vadd.f32 %v2841_v40, %v2839_v10  ;;  %v2843_v20 = vpop.eup %2842  ;;  %361 = vmatmul.f32.gmra.mxu1 %v3039_v21  ;;  %v3040_v60 = vld [vmem:[#allocation5 + $0xc8] sm:$0xff]  ;;  %v1890_v13 = vmul.f32 1.442695, %v1774_v27  ;;  %v3044_v27 = vld [vmem:[#allocation5 + $0xd8] sm:$0xff] }
 0x252   :  { %2848 = vpow2.f32 %v1816_v5  ;;  %v2845_v2 = vpop.eup %2844  ;;  %v3041_v40 = vld [vmem:[#allocation5 + $0x48] sm:$0xff]  ;;  %v1500_v63 = vmul.f32 1.442695, %v4603_v49 }
 0x253   :  { %2045 = vadd.xlane.f32.xlu0 %v2044_v57  ;;  %2850 = vpow2.f32 %v1878_v19  ;;  %v1993_v50 = vadd.f32 %v2845_v2, %v2843_v20 }
 0x254   :  { %v1690_v54 = vpop.permute.xlu1 %1689  ;;  %2852 = vpow2.f32 %v1880_v8  ;;  %v1892_v8 = vmul.f32 1.442695, %v1775_v55 }
 0x255   :  { %v1772_v32 = vsub.f32 %v3480_v52, %v1690_v54  ;;  %v1773_v58 = vsub.f32 -1e+30, %v1690_v54  ;;  %2320 = vadd.xlane.f32.xlu2 %v2227_v31  ;;  %v1620_v17 = vpop.permute.xlu0 %1619 }
 0x256   :  { %v1744_v2 = vsub.f32 %v3574_v18, %v1620_v17  ;;  %v1745_v15 = vsub.f32 -1e+30, %v1620_v17  ;;  %v4605_v18 = vsub.f32 %v3765_v24, %v3772_v34 }
 0x257   :  { %v1886_v23 = vmul.f32 1.442695, %v1772_v32  ;;  %v1888_v29 = vmul.f32 1.442695, %v1773_v58  ;;  %v2847_v36 = vpop.eup %2846  ;;  %412 = vmatmul.f32.gmra.mxu3 %v3040_v60  ;;  %v4604_v32 = vsub.f32 %v3656_v3, %v3664_v11  ;;  %v1915_v3 = vld [vmem:[#allocation3 + $0x8] sm:$0xff] }
 0x258   :  { %v2849_v59 = vpop.eup %2848  ;;  %v1830_v21 = vmul.f32 1.442695, %v1744_v2 }
 0x259   :  { %2854 = vpow2.f32 %v1886_v23  ;;  %1994 = vadd.xlane.f32.xlu1 %v1993_v50  ;;  %v1999_v52 = vadd.f32 %v2849_v59, %v2847_v36  ;;  %v2851_v45 = vpop.eup %2850  ;;  %364 = vmatmul.f32.gmra.mxu1 %v3041_v40  ;;  %v1498_v58 = vmul.f32 1.442695, %v4604_v32  ;;  %v4609_v40 = vsub.f32 %v3785_v41, %v3797_v56  ;;  %v1932_v56 = vld [vmem:[#allocation3 + $0x90] sm:$0xff]  ;;  %v4610_v41 = vld [vmem:[#allocation16_spill] sm:$0xff] }
 0x25a   :  { %2856 = vpow2.f32 %v1888_v29  ;;  %v2853_v62 = vpop.eup %2852  ;;  %v3043_v29 = vld [vmem:[#allocation5 + $0x50] sm:$0xff] }
 0x25b   :  { %2000 = vadd.xlane.f32.xlu0 %v1999_v52  ;;  %2858 = vpow2.f32 %v1818_v42  ;;  %v2047_v10 = vadd.f32 %v2853_v62, %v2851_v45  ;;  %v1832_v42 = vmul.f32 1.442695, %v1745_v15  ;;  %v4606_v62 = vld [vmem:[#allocation13_spill] sm:$0xff] }
 0x25c   :  { %v1615_v46 = vpop.permute.xlu1 %1614  ;;  %2860 = vpow2.f32 %v1820_v26 }
 0x25d   :  { %v1742_v16 = vsub.f32 %v3518_v0, %v1615_v46  ;;  %v1743_v14 = vsub.f32 -1e+30, %v1615_v46  ;;  %2329 = vadd.xlane.f32.xlu2 %v2233_v38  ;;  %v1710_v35 = vpop.permute.xlu0 %1709 }
 0x25e   :  { %v1780_v45 = vsub.f32 %v3710_v43, %v1710_v35  ;;  %v1781_v17 = vsub.f32 -1e+30, %v1710_v35 }
 0x25f   :  { %v2855_v5 = vpop.eup %2854  ;;  %v1826_v37 = vmul.f32 1.442695, %v1742_v16  ;;  %v1828_v4 = vmul.f32 1.442695, %v1743_v14  ;;  %415 = vmatmul.f32.gmra.mxu3 %v3042_v22  ;;  %v4607_v14 = vld [vmem:[#allocation17_spill] sm:$0xff]  ;;  %v3046_v22 = vld [vmem:[#allocation5 + $0xe0] sm:$0xff] }
 0x260   :  { %v2857_v19 = vpop.eup %2856  ;;  %v4608_v55 = vsub.f32 %v4607_v14, %v3756_v1  ;;  %v1904_v1 = vmul.f32 1.442695, %v1781_v17  ;;  %v527_v14 = vadd.s32 216, %v3134_v47 }
 0x261   :  { %2862 = vpow2.f32 %v1826_v37  ;;  %2048 = vadd.xlane.f32.xlu1 %v2047_v10  ;;  %v2053_v0 = vadd.f32 %v2857_v19, %v2855_v5  ;;  %v2859_v7 = vpop.eup %2858  ;;  %367 = vmatmul.f32.gmra.mxu1 %v3043_v29  ;;  %v3045_v10 = vld [vmem:[#allocation5 + $0x58] sm:$0xff]  ;;  %v1504_v19 = vmul.f32 1.442695, %v4609_v40  ;;  %v4611_v29 = vsub.f32 %v3845_v28, %v3856_v6 }
 0x262   :  { %2864 = vpow2.f32 %v1828_v4  ;;  %v2861_v57 = vpop.eup %2860  ;;  %v1530_v60 = vmul.f32 1.442695, %v4608_v55  ;;  %v1917_v28 = vld [vmem:[#allocation3 + $0x18] sm:$0xff] }
 0x263   :  { %2866 = vpow2.f32 %v1500_v63  ;;  %2054 = vadd.xlane.f32.xlu0 %v2053_v0  ;;  %v2002_v23 = vadd.f32 %v2861_v57, %v2859_v7  ;;  %v1914_v57 = vld [vmem:[#allocation3] sm:$0xff] }
 0x264   :  { %v1705_v20 = vpop.permute.xlu1 %1704  ;;  %2868 = vpow2.f32 %v1890_v13  ;;  %v1902_v13 = vmul.f32 1.442695, %v1780_v45 }
 0x265   :  { %v1778_v54 = vsub.f32 %v3630_v53, %v1705_v20  ;;  %v1779_v31 = vsub.f32 -1e+30, %v1705_v20  ;;  %2870 = vpow2.f32 %v1892_v8  ;;  %v1534_v53 = vmul.f32 1.442695, %v4605_v18  ;;  %v1635_v46 = vpop.permute.xlu0 %1634 }
 0x266   :  { %v1750_v2 = vsub.f32 %v4610_v41, %v1635_v46 }
 0x267   :  { %v2863_v61 = vpop.eup %2862  ;;  %v1898_v33 = vmul.f32 1.442695, %v1778_v54  ;;  %v1900_v30 = vmul.f32 1.442695, %v1779_v31  ;;  %418 = vmatmul.f32.gmra.mxu3 %v3044_v27  ;;  %v1751_v31 = vsub.f32 -1e+30, %v1635_v46 }
 0x268   :  { %v2865_v50 = vpop.eup %2864 }
 0x269   :  { %2872 = vpow2.f32 %v1898_v33  ;;  %2003 = vadd.xlane.f32.xlu1 %v2002_v23  ;;  %v2008_v36 = vadd.f32 %v2865_v50, %v2863_v61  ;;  %v2867_v59 = vpop.eup %2866  ;;  %370 = vmatmul.f32.gmra.mxu1 %v3045_v10  ;;  %v1540_v50 = vmul.f32 1.442695, %v4611_v29 }
 0x26a   :  { %2874 = vpow2.f32 %v1900_v30  ;;  %v2869_v26 = vpop.eup %2868  ;;  %v1947_v38 = vmul.f32 %v2867_v59, %v1915_v3  ;;  %v3047_v30 = vld [vmem:[#allocation5 + $0x60] sm:$0xff] }
 0x26b   :  { %2876 = vpow2.f32 %v1498_v58  ;;  %v2871_v11 = vpop.eup %2870  ;;  %2009 = vadd.xlane.f32.xlu0 %v2008_v36 }
 0x26c   :  { %2878 = vpow2.f32 %v1534_v53  ;;  %v1630_v52 = vpop.permute.xlu1 %1629  ;;  %v2056_v4 = vadd.f32 %v2871_v11, %v2869_v26  ;;  %v1844_v26 = vmul.f32 1.442695, %v1751_v31  ;;  %v1930_v11 = vld [vmem:[#allocation3 + $0x80] sm:$0xff] }
 0x26d   :  { %2880 = vpow2.f32 %v1830_v21  ;;  %v1748_v24 = vsub.f32 %v4606_v62, %v1630_v52  ;;  %v1749_v34 = vsub.f32 -1e+30, %v1630_v52  ;;  %v1842_v21 = vmul.f32 1.442695, %v1750_v2  ;;  %v3051_v2 = vld [vmem:[#allocation5 + $0x70] sm:$0xff] }
 0x26e   :  { %2882 = vpow2.f32 %v1832_v42 }
 0x26f   :  { %v2873_v16 = vpop.eup %2872  ;;  %v1838_v5 = vmul.f32 1.442695, %v1748_v24  ;;  %v1840_v37 = vmul.f32 1.442695, %v1749_v34  ;;  %421 = vmatmul.f32.gmra.mxu3 %v3046_v22  ;;  %v3048_v24 = vld [vmem:[#allocation5 + $0xe8] sm:$0xff] }
 0x270   :  { %v2875_v43 = vpop.eup %2874  ;;  %v1983_v49 = vpop.xlane.xlu2 %1982 }
 0x271   :  { %v2877_v63 = vpop.eup %2876  ;;  %2884 = vpow2.f32 %v1838_v5  ;;  %v2075_v0 = vadd.f32 %v1983_v49, %v1947_v38  ;;  %2057 = vadd.xlane.f32.xlu1 %v2056_v4  ;;  %v2062_v8 = vadd.f32 %v2875_v43, %v2873_v16  ;;  %373 = vmatmul.f32.gmra.mxu1 %v3047_v30  ;;  %v3049_v38 = vld [vmem:[#allocation5 + $0x68] sm:$0xff]  ;;  %v4613_v4 = vld [vmem:[#allocation31_spill] sm:$0xff] }
 0x272   :  { %v2879_v7 = vpop.eup %2878  ;;  %2886 = vpow2.f32 %v1840_v37  ;;  %v1946_v54 = vmul.f32 %v2877_v63, %v1914_v57  ;;  %v4612_v37 = vld [vmem:[#allocation30_spill] sm:$0xff]  ;;  %v2431_v63 = vld [vmem:[#allocation2 + $0x8] sm:$0xff] }
 0x273   :  { %v2881_v35 = vpop.eup %2880  ;;  %2888 = vpow2.f32 %v1530_v60  ;;  %2108 = vst.msk [vmem:[#allocation3 + $0x8] sm:$0xff] %vm47_vm7, %v2075_v0  ;;  %2063 = vadd.xlane.f32.xlu0 %v2062_v8  ;;  %v1964_v58 = vmul.f32 %v2879_v7, %v1932_v56  ;;  %v4614_v10 = vsub.f32 %v4612_v37, %v4613_v4  ;;  %v1935_v8 = vld [vmem:[#allocation3 + $0xa8] sm:$0xff]  ;;  %v899_v7 = vand.u32 7, %v527_v14  ;;  %v4622_v4 = vld [vmem:[#allocation11_spill] sm:$0xff] }
 0x274   :  { %v2883_v20 = vpop.eup %2882  ;;  %2890 = vpow2.f32 %v1504_v19 }
 0x275   :  { %2892 = vpow2.f32 %v1902_v13  ;;  %v1980_v15 = vpop.xlane.xlu0 %1979  ;;  %v2011_v33 = vadd.f32 %v2883_v20, %v2881_v35  ;;  %v1510_v43 = vmul.f32 1.442695, %v4614_v10  ;;  %v3050_v35 = vld [vmem:[#allocation5 + $0xf0] sm:$0xff]  ;;  %vm4188_vm2 = vcmp.eq.s32.totalorder %v899_v7, %v3140_v51 }
 0x276   :  { %2894 = vpow2.f32 %v1904_v1  ;;  %v2074_v32 = vadd.f32 %v1980_v15, %v1946_v54  ;;  %v2591_v1 = vld [vmem:[#allocation4 + $0x8] sm:$0xff]  ;;  %vm4206_vm3 = vmand %vm636_vm1, %vm4188_vm2 }
 0x277   :  { %v2885_v61 = vpop.eup %2884  ;;  %424 = vmatmul.f32.gmra.mxu3 %v3048_v24  ;;  %v2608_v24 = vld [vmem:[#allocation4 + $0x90] sm:$0xff]  ;;  %v2225_v10 = vsel %vm4206_vm3, %v4622_v4, 0.0  ;;  %v4631_v4 = vld [vmem:[#allocation52_spill] sm:$0xff] }
 0x278   :  { %v2887_v23 = vpop.eup %2886  ;;  %v2034_v18 = vpop.xlane.xlu2 %2033  ;;  %2107 = vst.msk [vmem:[#allocation3] sm:$0xff] %vm47_vm7, %v2074_v32 }
 0x279   :  { %v2889_v53 = vpop.eup %2888  ;;  %v2092_v36 = vadd.f32 %v2034_v18, %v1964_v58  ;;  %2012 = vadd.xlane.f32.xlu1 %v2011_v33  ;;  %v2017_v59 = vadd.f32 %v2887_v23, %v2885_v61  ;;  %376 = vmatmul.f32.gmra.mxu1 %v3049_v38  ;;  %v2430_v58 = vld [vmem:[#allocation2] sm:$0xff]  ;;  %v4617_v33 = vld [vmem:[#allocation38_spill] sm:$0xff]  ;;  %v530_v18 = vadd.s32 240, %v3134_v47 }
 0x27a   :  { %v2891_v42 = vpop.eup %2890  ;;  %v2463_v3 = vld [vmem:[#allocation3 + $0x8] sm:$0xff]  ;;  %v1962_v6 = vmul.f32 %v2889_v53, %v1930_v11  ;;  %v4618_v30 = vsub.f32 %v4617_v33, %v3922_v39  ;;  %v2448_v39 = vld [vmem:[#allocation2 + $0x90] sm:$0xff]  ;;  %v2593_v61 = vld [vmem:[#allocation4 + $0x18] sm:$0xff] }
 0x27b   :  { %v2893_v52 = vpop.eup %2892  ;;  %2896 = vlog2.f32 %v2463_v3  ;;  %2125 = vst.msk [vmem:[#allocation3 + $0x90] sm:$0xff] %vm47_vm7, %v2092_v36  ;;  %2018 = vadd.xlane.f32.xlu0 %v2017_v59  ;;  %v1949_v17 = vmul.f32 %v2891_v42, %v1917_v28  ;;  %v4619_v59 = vld [vmem:[#allocation39_spill] sm:$0xff]  ;;  %v920_v38 = vand.u32 7, %v530_v18  ;;  %v4626_v18 = vld [vmem:[#allocation14_spill] sm:$0xff] }
 0x27c   :  { %v2895_v45 = vpop.eup %2894  ;;  %2898 = vpow2.f32 %v1540_v50  ;;  %v1546_v23 = vmul.f32 1.442695, %v4618_v30  ;;  %v2590_v3 = vld [vmem:[#allocation4] sm:$0xff] }
 0x27d   :  { %2900 = vpow2.f32 %v1842_v21  ;;  %v2028_v62 = vpop.xlane.xlu0 %2027  ;;  %v2065_v46 = vadd.f32 %v2895_v45, %v2893_v52  ;;  %vm1174_vm4 = vcmp.eq.s32.totalorder %v920_v38, %v3140_v51  ;;  %v4630_v38 = vld [vmem:[#allocation12_spill] sm:$0xff] }
 0x27e   :  { %2902 = vpow2.f32 %v1844_v26  ;;  %v2090_v34 = vadd.f32 %v2028_v62, %v1962_v6  ;;  %v1920_v62 = vld [vmem:[#allocation3 + $0x30] sm:$0xff]  ;;  %vm1238_vm5 = vmand %vm636_vm1, %vm1174_vm4 }
 0x27f   :  { %v2462_v27 = vld [vmem:[#allocation3] sm:$0xff]  ;;  %427 = vmatmul.f32.gmra.mxu3 %v3050_v35 }
 0x280   :  { %v1989_v16 = vpop.xlane.xlu2 %1988  ;;  %2904 = vlog2.f32 %v2462_v27  ;;  %2123 = vst.msk [vmem:[#allocation3 + $0x80] sm:$0xff] %vm47_vm7, %v2090_v34  ;;  %v3052_v27 = vld [vmem:[#allocation5 + $0xf8] sm:$0xff]  ;;  %v2611_v34 = vld [vmem:[#allocation4 + $0xa8] sm:$0xff] }
 0x281   :  { %v2897_v55 = vpop.eup %2896  ;;  %v2077_v60 = vadd.f32 %v1989_v16, %v1949_v17  ;;  %2066 = vadd.xlane.f32.xlu1 %v2065_v46  ;;  %379 = vmatmul.f32.gmra.mxu1 %v3051_v2 }
 0x282   :  { %v2899_v5 = vpop.eup %2898  ;;  %v2497_v40 = vmul.f32 0.6931472, %v2897_v55  ;;  %v2480_v19 = vld [vmem:[#allocation3 + $0x90] sm:$0xff]  ;;  %v3053_v55 = vld [vmem:[#allocation5 + $0x78] sm:$0xff] }
 0x283   :  { %v2901_v49 = vpop.eup %2900  ;;  %2906 = vlog2.f32 %v2480_v19  ;;  %2110 = vst.msk [vmem:[#allocation3 + $0x18] sm:$0xff] %vm47_vm7, %v2077_v60  ;;  %v1967_v56 = vmul.f32 %v2899_v5, %v1935_v8 }
 0x284   :  { %v2903_v13 = vpop.eup %2902  ;;  %v2559_v0 = vadd.f32 %v2497_v40, %v2431_v63  ;;  %2908 = vpow2.f32 %v1510_v43  ;;  %v2446_v40 = vld [vmem:[#allocation2 + $0x80] sm:$0xff]  ;;  %v4623_v63 = vld [vmem:[#allocation42_spill] sm:$0xff] }
 0x285   :  { %v2020_v41 = vadd.f32 %v2903_v13, %v2901_v49  ;;  %v526_v49 = vadd.s32 208, %v3134_v47  ;;  %v4624_v13 = vld [vmem:[#allocation43_spill] sm:$0xff] }
 0x286   :  { %v2623_v57 = vsub.f32 %v2591_v1, %v2559_v0  ;;  %v2905_v20 = vpop.eup %2904  ;;  %v4625_v0 = vsub.f32 %v4623_v63, %v4624_v13  ;;  %v2436_v63 = vld [vmem:[#allocation2 + $0x30] sm:$0xff] }
 0x287   :  { %v2495_v31 = vmul.f32 0.6931472, %v2905_v20  ;;  %v2478_v15 = vld [vmem:[#allocation3 + $0x80] sm:$0xff]  ;;  %430 = vmatmul.f32.gmra.mxu3 %v3052_v27 }
 0x288   :  { %v2655_v54 = vsub.f32 0.0, %v2623_v57  ;;  %v2043_v22 = vpop.xlane.xlu2 %2042  ;;  %2910 = vlog2.f32 %v2478_v15  ;;  %v1516_v8 = vmul.f32 1.442695, %v4625_v0  ;;  %v2606_v20 = vld [vmem:[#allocation4 + $0x80] sm:$0xff]  ;;  %v4634_v0 = vld [vmem:[#allocation26_spill] sm:$0xff] }
 0x289   :  { %v2907_v32 = vpop.eup %2906  ;;  %v2095_v29 = vadd.f32 %v2043_v22, %v1967_v56  ;;  %v1720_v50 = vpop.permute.xlu1 %1719  ;;  %2021 = vadd.xlane.f32.xlu1 %v2020_v41  ;;  %v2558_v53 = vadd.f32 %v2495_v31, %v2430_v58  ;;  %382 = vmatmul.f32.gmra.mxu1 %v3053_v55  ;;  %v2433_v56 = vld [vmem:[#allocation2 + $0x18] sm:$0xff]  ;;  %v1938_v31 = vld [vmem:[#allocation3 + $0xc0] sm:$0xff] }
 0x28a   :  { %2687 = vst.msk [vmem:[%s4452_s2 + $0x8] sm:$0xff] %vm47_vm7, %v2655_v54  ;;  %v2531_v21 = vmul.f32 0.6931472, %v2907_v32  ;;  %v2465_v36 = vld [vmem:[#allocation3 + $0x18] sm:$0xff]  ;;  %v1784_v42 = vsub.f32 %v4619_v59, %v1720_v50  ;;  %v1785_v26 = vsub.f32 -1e+30, %v1720_v50  ;;  %v2909_v11 = vpop.eup %2908 }
 0x28b   :  { %2912 = vlog2.f32 %v2465_v36  ;;  %2128 = vst.msk [vmem:[#allocation3 + $0xa8] sm:$0xff] %vm47_vm7, %v2095_v29  ;;  %v2622_v52 = vsub.f32 %v2590_v3, %v2558_v53  ;;  %v1952_v14 = vmul.f32 %v2909_v11, %v1920_v62  ;;  %v338_v15 = vpop.f32.mrf.mxu1  ;;  %v892_v32 = vand.u32 7, %v526_v49  ;;  %v4628_v3 = vld [vmem:[#allocation49_spill] sm:$0xff] }
 0x28c   :  { %v2576_v45 = vadd.f32 %v2531_v21, %v2448_v39  ;;  %v1910_v28 = vmul.f32 1.442695, %v1784_v42  ;;  %v1912_v6 = vmul.f32 1.442695, %v1785_v26  ;;  %2914 = vpow2.f32 %v1546_v23  ;;  %v4627_v26 = vld [vmem:[#allocation47_spill] sm:$0xff] }
 0x28d   :  { %v2654_v17 = vsub.f32 0.0, %v2622_v52  ;;  %v2231_v53 = vsel %vm1238_vm5, %v4626_v18, 0.0  ;;  %vm1166_vm6 = vcmp.eq.s32.totalorder %v892_v32, %v3140_v51  ;;  %v529_v59 = vadd.s32 232, %v3134_v47  ;;  %v1923_v47 = vld [vmem:[#allocation3 + $0x48] sm:$0xff]  ;;  %v4642_v18 = vld [vmem:[#allocation59_spill] sm:$0xff] }
 0x28e   :  { %v2640_v46 = vsub.f32 %v2608_v24, %v2576_v45  ;;  %2916 = vpow2.f32 %v1910_v28  ;;  %v2911_v16 = vpop.eup %2910  ;;  %v4629_v39 = vsub.f32 %v4627_v26, %v4628_v3  ;;  %v2451_v28 = vld [vmem:[#allocation2 + $0xa8] sm:$0xff]  ;;  %vm1230_vm8 = vmand %vm636_vm1, %vm1166_vm6  ;;  %v2454_v26 = vld [vmem:[#allocation2 + $0xc0] sm:$0xff] }
 0x28f   :  { %2918 = vpow2.f32 %v1912_v6  ;;  %2686 = vst.msk [vmem:[%s4452_s2] sm:$0xff] %vm47_vm7, %v2654_v17  ;;  %v2527_v5 = vmul.f32 0.6931472, %v2911_v16  ;;  %v913_v17 = vand.u32 7, %v529_v59  ;;  %v2223_v27 = vsel %vm1230_vm8, %v4630_v38, 0.0 }
 0x290   :  { %v2672_v60 = vsub.f32 0.0, %v2640_v46  ;;  %v1998_v37 = vpop.xlane.xlu2 %1997  ;;  %v1552_v11 = vmul.f32 1.442695, %v4629_v39 }
 0x291   :  { %v2913_v43 = vpop.eup %2912  ;;  %v2080_v19 = vadd.f32 %v1998_v37, %v1952_v14  ;;  %2317 = vadd.xlane.f32.xlu1 %v2225_v10  ;;  %v2574_v7 = vadd.f32 %v2527_v5, %v2446_v40  ;;  %v386_v42 = vpop.f32.mrf.mxu3  ;;  %vm1172_vm9 = vcmp.eq.s32.totalorder %v913_v17, %v3140_v51  ;;  %v4632_v10 = vld [vmem:[#allocation53_spill] sm:$0xff] }
 0x292   :  { %2704 = vst.msk [vmem:[%s4452_s2 + $0x90] sm:$0xff] %vm47_vm7, %v2672_v60  ;;  %v2501_v1 = vmul.f32 0.6931472, %v2913_v43  ;;  %v2483_v57 = vld [vmem:[#allocation3 + $0xa8] sm:$0xff]  ;;  %v2915_v35 = vpop.eup %2914  ;;  %v4633_v43 = vsub.f32 %v4631_v4, %v4632_v10  ;;  %vm1236_vm10 = vmand %vm636_vm1, %vm1172_vm9 }
 0x293   :  { %2920 = vlog2.f32 %v2483_v57  ;;  %2113 = vst.msk [vmem:[#allocation3 + $0x30] sm:$0xff] %vm47_vm7, %v2080_v19  ;;  %v2638_v2 = vsub.f32 %v2606_v20, %v2574_v7  ;;  %v1970_v23 = vmul.f32 %v2915_v35, %v1938_v31  ;;  %v341_v24 = vpop.f32.mrf.mxu1  ;;  %v2596_v35 = vld [vmem:[#allocation4 + $0x30] sm:$0xff]  ;;  %v4636_v20 = vld [vmem:[#allocation18_spill] sm:$0xff]  ;;  %v4639_v31 = vld [vmem:[#allocation15_spill] sm:$0xff] }
 0x294   :  { %v2917_v41 = vpop.eup %2916  ;;  %v2561_v54 = vadd.f32 %v2501_v1, %v2433_v56  ;;  %2922 = vpow2.f32 %v1516_v8  ;;  %v1522_v40 = vmul.f32 1.442695, %v4633_v43  ;;  %v4635_v8 = vld [vmem:[#allocation24_spill] sm:$0xff]  ;;  %v1941_v1 = vld [vmem:[#allocation3 + $0xd8] sm:$0xff]  ;;  %v4637_v56 = vld [vmem:[#allocation19_spill] sm:$0xff]  ;;  %v2229_v15 = vsel %vm1236_vm10, %v4639_v31, 0.0 }
 0x295   :  { %v2919_v22 = vpop.eup %2918  ;;  %v2670_v58 = vsub.f32 0.0, %v2638_v2  ;;  %v1485_v51 = vsub.f32 %v4635_v8, %v4634_v0  ;;  %v4645_v24 = vld [vmem:[#allocation22_spill] sm:$0xff]  ;;  %v4649_v4 = vld [vmem:[#allocation64_spill] sm:$0xff] }
 0x296   :  { %v2625_v33 = vsub.f32 %v2593_v61, %v2561_v54  ;;  %v2071_v30 = vadd.f32 %v2919_v22, %v2917_v41  ;;  %v4638_v41 = vsub.f32 %v4636_v20, %v4637_v56  ;;  %v2599_v20 = vld [vmem:[#allocation4 + $0x48] sm:$0xff] }
 0x297   :  { %2702 = vst.msk [vmem:[%s4452_s2 + $0x80] sm:$0xff] %vm47_vm7, %v2670_v58  ;;  %v1536_v61 = vmul.f32 1.442695, %v1485_v51  ;;  %v1944_v51 = vld [vmem:[#allocation3 + $0xf0] sm:$0xff] }
 0x298   :  { %v2657_v29 = vsub.f32 0.0, %v2625_v33  ;;  %2072 = vadd.xlane.f32.xlu0 %v2071_v30  ;;  %v2052_v50 = vpop.xlane.xlu2 %2051  ;;  %v1532_v2 = vmul.f32 1.442695, %v4638_v41 }
 0x299   :  { %v2921_v21 = vpop.eup %2920  ;;  %v2098_v36 = vadd.f32 %v2052_v50, %v1970_v23  ;;  %2326 = vadd.xlane.f32.xlu1 %v2231_v53  ;;  %v389_v37 = vpop.f32.mrf.mxu3  ;;  %v4640_v23 = vld [vmem:[#allocation21_spill] sm:$0xff]  ;;  %v4643_v53 = vld [vmem:[#allocation60_spill] sm:$0xff] }
 0x29a   :  { %2689 = vst.msk [vmem:[%s4452_s2 + $0x18] sm:$0xff] %vm47_vm7, %v2657_v29  ;;  %v2537_v52 = vmul.f32 0.6931472, %v2921_v21  ;;  %v2468_v45 = vld [vmem:[#allocation3 + $0x30] sm:$0xff]  ;;  %v2923_v6 = vpop.eup %2922  ;;  %v4641_v29 = vld [vmem:[#allocation20_spill] sm:$0xff]  ;;  %v4644_v21 = vsub.f32 %v4642_v18, %v4643_v53  ;;  %v4648_v37 = vld [vmem:[#allocation63_spill] sm:$0xff] }
 0x29b   :  { %2924 = vlog2.f32 %v2468_v45  ;;  %2131 = vst.msk [vmem:[#allocation3 + $0xc0] sm:$0xff] %vm47_vm7, %v2098_v36  ;;  %v1955_v16 = vmul.f32 %v2923_v6, %v1923_v47  ;;  %v344_v57 = vpop.f32.mrf.mxu1  ;;  %v1468_v50 = vsub.f32 %v4641_v29, %v4640_v23  ;;  %v2614_v45 = vld [vmem:[#allocation4 + $0xc0] sm:$0xff]  ;;  %v4650_v10 = vsub.f32 %v4648_v37, %v4649_v4  ;;  %v1916_v23 = vld [vmem:[#allocation3 + $0x10] sm:$0xff] }
 0x29c   :  { %v2579_v62 = vadd.f32 %v2537_v52, %v2451_v28  ;;  %2926 = vpow2.f32 %v1552_v11  ;;  %v1558_v36 = vmul.f32 1.442695, %v4644_v21  ;;  %v1926_v11 = vld [vmem:[#allocation3 + $0x60] sm:$0xff]  ;;  %v4652_v57 = vld [vmem:[#allocation32_spill] sm:$0xff]  ;;  %v4656_v21 = vld [vmem:[#allocation29_spill] sm:$0xff] }
 0x29d   :  { %v1502_v28 = vmul.f32 1.442695, %v1468_v50  ;;  %v1528_v43 = vmul.f32 1.442695, %v4650_v10 }
 0x29e   :  { %v2643_v46 = vsub.f32 %v2611_v34, %v2579_v62  ;;  %v4646_v34 = vld [vmem:[#allocation23_spill] sm:$0xff] }
 0x29f   :  { %v4647_v17 = vsub.f32 %v4645_v24, %v4646_v34 }
 0x2a0   :  { %v2675_v14 = vsub.f32 0.0, %v2643_v46  ;;  %2314 = vadd.xlane.f32.xlu0 %v2223_v27  ;;  %v2007_v55 = vpop.xlane.xlu2 %2006 }
 0x2a1   :  { %v2925_v60 = vpop.eup %2924  ;;  %v2083_v5 = vadd.f32 %v2007_v55, %v1955_v16  ;;  %v392_v48 = vpop.f32.mrf.mxu3  ;;  %v1506_v46 = vmul.f32 1.442695, %v4647_v17  ;;  %v1931_v16 = vld [vmem:[#allocation3 + $0x88] sm:$0xff] }
 0x2a2   :  { %2707 = vst.msk [vmem:[%s4452_s2 + $0xa8] sm:$0xff] %vm47_vm7, %v2675_v14  ;;  %v2507_v19 = vmul.f32 0.6931472, %v2925_v60  ;;  %v2486_v49 = vld [vmem:[#allocation3 + $0xc0] sm:$0xff]  ;;  %v2927_v13 = vpop.eup %2926 }
 0x2a3   :  { %2928 = vlog2.f32 %v2486_v49  ;;  %2116 = vst.msk [vmem:[#allocation3 + $0x48] sm:$0xff] %vm47_vm7, %v2083_v5  ;;  %v1973_v22 = vmul.f32 %v2927_v13, %v1941_v1  ;;  %v347_v52 = vpop.f32.mrf.mxu1  ;;  %v2439_v49 = vld [vmem:[#allocation2 + $0x48] sm:$0xff]  ;;  %v4651_v1 = vld [vmem:[#allocation33_spill] sm:$0xff] }
 0x2a4   :  { %v2564_v7 = vadd.f32 %v2507_v19, %v2436_v63  ;;  %2930 = vpow2.f32 %v1522_v40  ;;  %v1933_v19 = vld [vmem:[#allocation3 + $0x98] sm:$0xff] }
 0x2a5   :  { %2932 = vpow2.f32 %v1532_v2  ;;  %v4653_v2 = vld [vmem:[#allocation25_spill] sm:$0xff]  ;;  %v1929_v52 = vld [vmem:[#allocation3 + $0x78] sm:$0xff] }
 0x2a6   :  { %v2628_v54 = vsub.f32 %v2596_v35, %v2564_v7  ;;  %v1488_v35 = vsub.f32 %v4652_v57, %v4651_v1  ;;  %v4660_v57 = vld [vmem:[#allocation36_spill] sm:$0xff] }
 0x2a8   :  { %v2660_v32 = vsub.f32 0.0, %v2628_v54  ;;  %2323 = vadd.xlane.f32.xlu0 %v2229_v15  ;;  %v2061_v58 = vpop.xlane.xlu2 %2060  ;;  %v4654_v54 = vld [vmem:[#allocation27_spill] sm:$0xff]  ;;  %v1542_v29 = vmul.f32 1.442695, %v1488_v35  ;;  %v4661_v35 = vld [vmem:[#allocation37_spill] sm:$0xff] }
 0x2a9   :  { %v2929_v33 = vpop.eup %2928  ;;  %v2101_v30 = vadd.f32 %v2061_v58, %v1973_v22  ;;  %v395_v60 = vpop.f32.mrf.mxu3  ;;  %v4655_v31 = vsub.f32 %v4653_v2, %v4654_v54 }
 0x2aa   :  { %2692 = vst.msk [vmem:[%s4452_s2 + $0x30] sm:$0xff] %vm47_vm7, %v2660_v32  ;;  %v2543_v59 = vmul.f32 0.6931472, %v2929_v33  ;;  %v2471_v42 = vld [vmem:[#allocation3 + $0x48] sm:$0xff]  ;;  %v2931_v3 = vpop.eup %2930  ;;  %v1934_v60 = vld [vmem:[#allocation3 + $0xa0] sm:$0xff] }
 0x2ab   :  { %2934 = vlog2.f32 %v2471_v42  ;;  %2134 = vst.msk [vmem:[#allocation3 + $0xd8] sm:$0xff] %vm47_vm7, %v2101_v30  ;;  %v1958_v62 = vmul.f32 %v2931_v3, %v1926_v11  ;;  %v2933_v47 = vpop.eup %2932  ;;  %v350_v7 = vpop.f32.mrf.mxu1  ;;  %v1538_v15 = vmul.f32 1.442695, %v4655_v31 }
 0x2ac   :  { %2936 = vpow2.f32 %v1536_v61  ;;  %v2582_v39 = vadd.f32 %v2543_v59, %v2454_v26  ;;  %v1963_v63 = vmul.f32 %v2933_v47, %v1931_v16  ;;  %v1918_v26 = vld [vmem:[#allocation3 + $0x20] sm:$0xff] }
 0x2ad   :  { %2938 = vpow2.f32 %v1558_v36  ;;  %v4657_v36 = vld [vmem:[#allocation28_spill] sm:$0xff]  ;;  %v2602_v7 = vld [vmem:[#allocation4 + $0x60] sm:$0xff] }
 0x2ae   :  { %v2646_v6 = vsub.f32 %v2614_v45, %v2582_v39  ;;  %2940 = vpow2.f32 %v1502_v28  ;;  %v1471_v59 = vsub.f32 %v4657_v36, %v4656_v21  ;;  %v4658_v28 = vld [vmem:[#allocation35_spill] sm:$0xff]  ;;  %v2449_v21 = vld [vmem:[#allocation2 + $0x98] sm:$0xff]  ;;  %v4663_v36 = vld [vmem:[#allocation44_spill] sm:$0xff] }
 0x2af   :  { %2942 = vpow2.f32 %v1506_v46 }
 0x2b0   :  { %v2678_v38 = vsub.f32 0.0, %v2646_v6  ;;  %v2016_v27 = vpop.xlane.xlu2 %2015  ;;  %2944 = vpow2.f32 %v1528_v43  ;;  %v4659_v6 = vld [vmem:[#allocation34_spill] sm:$0xff]  ;;  %v1508_v34 = vmul.f32 1.442695, %v1471_v59  ;;  %v4664_v59 = vld [vmem:[#allocation45_spill] sm:$0xff] }
 0x2b1   :  { %v2935_v14 = vpop.eup %2934  ;;  %v2086_v55 = vadd.f32 %v2016_v27, %v1958_v62  ;;  %v398_v18 = vpop.f32.mrf.mxu3  ;;  %2946 = vpow2.f32 %v1538_v15  ;;  %v1473_v62 = vsub.f32 %v4659_v6, %v4658_v28  ;;  %v2167_v15 = vld [vmem:[#allocation4 + $0xe0] sm:$0xff]  ;;  %v2609_v6 = vld [vmem:[#allocation4 + $0x98] sm:$0xff] }
 0x2b2   :  { %v2937_v5 = vpop.eup %2936  ;;  %2710 = vst.msk [vmem:[%s4452_s2 + $0xc0] sm:$0xff] %vm47_vm7, %v2678_v38  ;;  %v2513_v40 = vmul.f32 0.6931472, %v2935_v14  ;;  %v1919_v18 = vld [vmem:[#allocation3 + $0x28] sm:$0xff] }
 0x2b3   :  { %2119 = vst.msk [vmem:[#allocation3 + $0x60] sm:$0xff] %vm47_vm7, %v2086_v55  ;;  %v2939_v13 = vpop.eup %2938  ;;  %v1965_v41 = vmul.f32 %v2937_v5, %v1933_v19  ;;  %v1512_v37 = vmul.f32 1.442695, %v1473_v62  ;;  %v2442_v19 = vld [vmem:[#allocation2 + $0x60] sm:$0xff] }
 0x2b4   :  { %v2567_v0 = vadd.f32 %v2513_v40, %v2439_v49  ;;  %v2031_v8 = vpop.xlane.xlu1 %2030  ;;  %v1976_v58 = vmul.f32 %v2939_v13, %v1944_v51  ;;  %v2941_v33 = vpop.eup %2940 }
 0x2b5   :  { %v2091_v56 = vadd.f32 %v2031_v8, %v1963_v63  ;;  %v2943_v53 = vpop.eup %2942  ;;  %v1948_v3 = vmul.f32 %v2941_v33, %v1916_v23  ;;  %v1936_v63 = vld [vmem:[#allocation3 + $0xb0] sm:$0xff] }
 0x2b6   :  { %v2631_v22 = vsub.f32 %v2599_v20, %v2567_v0  ;;  %v2037_v61 = vpop.xlane.xlu0 %2036  ;;  %v2945_v39 = vpop.eup %2944  ;;  %v1950_v24 = vmul.f32 %v2943_v53, %v1918_v26  ;;  %v4662_v20 = vsub.f32 %v4660_v57, %v4661_v35  ;;  %v2607_v53 = vld [vmem:[#allocation4 + $0x88] sm:$0xff]  ;;  %v2592_v57 = vld [vmem:[#allocation4 + $0x10] sm:$0xff]  ;;  %v2434_v35 = vld [vmem:[#allocation2 + $0x20] sm:$0xff] }
 0x2b7   :  { %2124 = vst.msk [vmem:[#allocation3 + $0x88] sm:$0xff] %vm47_vm7, %v2091_v56  ;;  %v2093_v32 = vadd.f32 %v2037_v61, %v1965_v41  ;;  %v353_v45 = vpop.f32.mrf.mxu1  ;;  %v1961_v27 = vmul.f32 %v2945_v39, %v1929_v52  ;;  %v2947_v16 = vpop.eup %2946  ;;  %v2447_v61 = vld [vmem:[#allocation2 + $0x88] sm:$0xff] }
 0x2b8   :  { %v2663_v30 = vsub.f32 0.0, %v2631_v22  ;;  %v2070_v48 = vpop.xlane.xlu2 %2069  ;;  %v1966_v49 = vmul.f32 %v2947_v16, %v1934_v60  ;;  %v1544_v56 = vmul.f32 1.442695, %v4662_v20  ;;  %v4667_v16 = vld [vmem:[#allocation41_spill] sm:$0xff]  ;;  %v4669_v20 = vld [vmem:[#allocation46_spill] sm:$0xff] }
 0x2b9   :  { %2126 = vst.msk [vmem:[#allocation3 + $0x98] sm:$0xff] %vm47_vm7, %v2093_v32  ;;  %v2104_v50 = vadd.f32 %v2070_v48, %v1976_v58 }
 0x2ba   :  { %2695 = vst.msk [vmem:[%s4452_s2 + $0x48] sm:$0xff] %vm47_vm7, %v2663_v30  ;;  %v2474_v42 = vld [vmem:[#allocation3 + $0x60] sm:$0xff]  ;;  %v401_v10 = vpop.f32.mrf.mxu3 }
 0x2bb   :  { %2948 = vlog2.f32 %v2474_v42  ;;  %2137 = vst.msk [vmem:[#allocation3 + $0xf0] sm:$0xff] %vm47_vm7, %v2104_v50  ;;  %v4665_v42 = vsub.f32 %v4663_v36, %v4664_v59  ;;  %v4672_v59 = vld [vmem:[#allocation50_spill] sm:$0xff] }
 0x2bc   :  { %v1986_v11 = vpop.xlane.xlu1 %1985  ;;  %2950 = vpow2.f32 %v1542_v29 }
 0x2bd   :  { %v2076_v47 = vadd.f32 %v1986_v11, %v1948_v3  ;;  %v1548_v26 = vmul.f32 1.442695, %v4665_v42  ;;  %v4673_v42 = vld [vmem:[#allocation51_spill] sm:$0xff] }
 0x2be   :  { %v2479_v17 = vld [vmem:[#allocation3 + $0x88] sm:$0xff]  ;;  %v1992_v46 = vpop.xlane.xlu0 %1991 }
 0x2bf   :  { %2952 = vlog2.f32 %v2479_v17  ;;  %2109 = vst.msk [vmem:[#allocation3 + $0x10] sm:$0xff] %vm47_vm7, %v2076_v47  ;;  %v2078_v38 = vadd.f32 %v1992_v46, %v1950_v24  ;;  %v356_v8 = vpop.f32.mrf.mxu1  ;;  %v1921_v47 = vld [vmem:[#allocation3 + $0x38] sm:$0xff] }
 0x2c0   :  { %v2481_v14 = vld [vmem:[#allocation3 + $0x98] sm:$0xff]  ;;  %v2025_v55 = vpop.xlane.xlu2 %2024 }
 0x2c1   :  { %v2949_v5 = vpop.eup %2948  ;;  %2954 = vlog2.f32 %v2481_v14  ;;  %2111 = vst.msk [vmem:[#allocation3 + $0x20] sm:$0xff] %vm47_vm7, %v2078_v38  ;;  %v2089_v4 = vadd.f32 %v2025_v55, %v1961_v27  ;;  %v4666_v27 = vld [vmem:[#allocation40_spill] sm:$0xff] }
 0x2c2   :  { %2956 = vpow2.f32 %v1508_v34  ;;  %v2519_v43 = vmul.f32 0.6931472, %v2949_v5  ;;  %v2951_v40 = vpop.eup %2950  ;;  %v404_v39 = vpop.f32.mrf.mxu3  ;;  %v4668_v14 = vsub.f32 %v4666_v27, %v4667_v16  ;;  %v1922_v27 = vld [vmem:[#allocation3 + $0x40] sm:$0xff] }
 0x2c3   :  { %2122 = vst.msk [vmem:[#allocation3 + $0x78] sm:$0xff] %vm47_vm7, %v2089_v4  ;;  %2958 = vpow2.f32 %v1512_v37  ;;  %v1968_v31 = vmul.f32 %v2951_v40, %v1936_v63  ;;  %v2605_v39 = vld [vmem:[#allocation4 + $0x78] sm:$0xff] }
 0x2c4   :  { %v2570_v13 = vadd.f32 %v2519_v43, %v2442_v19  ;;  %v2040_v0 = vpop.xlane.xlu1 %2039  ;;  %v1514_v55 = vmul.f32 1.442695, %v4668_v14  ;;  %v2170_v43 = vld [vmem:[#allocation4 + $0xf8] sm:$0xff]  ;;  %v2432_v19 = vld [vmem:[#allocation2 + $0x10] sm:$0xff]  ;;  %v2610_v14 = vld [vmem:[#allocation4 + $0xa0] sm:$0xff] }
 0x2c5   :  { %v2953_v51 = vpop.eup %2952  ;;  %v2094_v1 = vadd.f32 %v2040_v0, %v1966_v49 }
 0x2c6   :  { %v2634_v41 = vsub.f32 %v2602_v7, %v2570_v13  ;;  %v2529_v2 = vmul.f32 0.6931472, %v2953_v51  ;;  %v2464_v54 = vld [vmem:[#allocation3 + $0x10] sm:$0xff]  ;;  %v2046_v32 = vpop.xlane.xlu0 %2045  ;;  %v1937_v7 = vld [vmem:[#allocation3 + $0xb8] sm:$0xff] }
 0x2c7   :  { %v2955_v22 = vpop.eup %2954  ;;  %2960 = vlog2.f32 %v2464_v54  ;;  %2127 = vst.msk [vmem:[#allocation3 + $0xa0] sm:$0xff] %vm47_vm7, %v2094_v1  ;;  %v2096_v29 = vadd.f32 %v2046_v32, %v1968_v31  ;;  %v359_v46 = vpop.f32.mrf.mxu1 }
 0x2c8   :  { %v2957_v58 = vpop.eup %2956  ;;  %v2666_v33 = vsub.f32 0.0, %v2634_v41  ;;  %v2575_v30 = vadd.f32 %v2529_v2, %v2447_v61  ;;  %v2533_v48 = vmul.f32 0.6931472, %v2955_v22  ;;  %v2466_v23 = vld [vmem:[#allocation3 + $0x20] sm:$0xff]  ;;  %v2321_v50 = vpop.xlane.xlu2 %2320 }
 0x2c9   :  { %2962 = vlog2.f32 %v2466_v23  ;;  %v2359_v3 = vadd.f32 %v2321_v50, %v2167_v15  ;;  %v2959_v28 = vpop.eup %2958  ;;  %2129 = vst.msk [vmem:[#allocation3 + $0xb0] sm:$0xff] %vm47_vm7, %v2096_v29  ;;  %v1951_v62 = vmul.f32 %v2957_v58, %v1919_v18  ;;  %v1939_v23 = vld [vmem:[#allocation3 + $0xc8] sm:$0xff] }
 0x2ca   :  { %2964 = vpow2.f32 %v1544_v56  ;;  %2698 = vst.msk [vmem:[%s4452_s2 + $0x60] sm:$0xff] %vm47_vm7, %v2666_v33  ;;  %v2639_v11 = vsub.f32 %v2607_v53, %v2575_v30  ;;  %v2577_v52 = vadd.f32 %v2533_v48, %v2449_v21  ;;  %v2477_v45 = vld [vmem:[#allocation3 + $0x78] sm:$0xff]  ;;  %v1953_v10 = vmul.f32 %v2959_v28, %v1921_v47  ;;  %v4670_v56 = vld [vmem:[#allocation48_spill] sm:$0xff]  ;;  %v407_v31 = vpop.f32.mrf.mxu3  ;;  %v2594_v33 = vld [vmem:[#allocation4 + $0x20] sm:$0xff] }
 0x2cb   :  { %2966 = vlog2.f32 %v2477_v45  ;;  %2391 = vst.msk [vmem:[#allocation4 + $0xe0] sm:$0xff] %vm47_vm7, %v2359_v3  ;;  %v4671_v41 = vsub.f32 %v4669_v20, %v4670_v56  ;;  %v2445_v30 = vld [vmem:[#allocation2 + $0x78] sm:$0xff]  ;;  %v2450_v47 = vld [vmem:[#allocation2 + $0xa0] sm:$0xff] }
 0x2cc   :  { %v2671_v24 = vsub.f32 0.0, %v2639_v11  ;;  %v2641_v34 = vsub.f32 %v2609_v6, %v2577_v52  ;;  %v1995_v17 = vpop.xlane.xlu1 %1994  ;;  %2968 = vpow2.f32 %v1548_v26  ;;  %v4674_v26 = vsub.f32 %v4672_v59, %v4673_v42  ;;  %v4678_v20 = vld [vmem:[#allocation54_spill] sm:$0xff]  ;;  %v4679_v56 = vld [vmem:[#allocation55_spill] sm:$0xff] }
 0x2cd   :  { %v2961_v38 = vpop.eup %2960  ;;  %v2079_v60 = vadd.f32 %v1995_v17, %v1951_v62  ;;  %v1518_v2 = vmul.f32 1.442695, %v4671_v41  ;;  %v4680_v41 = vsub.f32 %v4678_v20, %v4679_v56  ;;  %v2437_v42 = vld [vmem:[#allocation2 + $0x38] sm:$0xff] }
 0x2ce   :  { %2703 = vst.msk [vmem:[%s4452_s2 + $0x88] sm:$0xff] %vm47_vm7, %v2671_v24  ;;  %v2673_v5 = vsub.f32 0.0, %v2641_v34  ;;  %v2499_v37 = vmul.f32 0.6931472, %v2961_v38  ;;  %v2482_v4 = vld [vmem:[#allocation3 + $0xa0] sm:$0xff]  ;;  %v2001_v49 = vpop.xlane.xlu0 %2000 }
 0x2cf   :  { %v2963_v40 = vpop.eup %2962  ;;  %2970 = vlog2.f32 %v2482_v4  ;;  %2112 = vst.msk [vmem:[#allocation3 + $0x28] sm:$0xff] %vm47_vm7, %v2079_v60  ;;  %v2081_v8 = vadd.f32 %v2001_v49, %v1953_v10  ;;  %v362_v21 = vpop.f32.mrf.mxu1  ;;  %v1550_v3 = vmul.f32 1.442695, %v4674_v26  ;;  %v4676_v60 = vld [vmem:[#allocation57_spill] sm:$0xff] }
 0x2d0   :  { %v2965_v63 = vpop.eup %2964  ;;  %2705 = vst.msk [vmem:[%s4452_s2 + $0x98] sm:$0xff] %vm47_vm7, %v2673_v5  ;;  %v2560_v13 = vadd.f32 %v2499_v37, %v2432_v19  ;;  %v2503_v0 = vmul.f32 0.6931472, %v2963_v40  ;;  %v2330_v51 = vpop.xlane.xlu2 %2329  ;;  %2972 = vpow2.f32 %v1514_v55  ;;  %v2484_v32 = vld [vmem:[#allocation3 + $0xb0] sm:$0xff]  ;;  %v4675_v55 = vld [vmem:[#allocation56_spill] sm:$0xff] }
 0x2d1   :  { %v2967_v1 = vpop.eup %2966  ;;  %v2362_v54 = vadd.f32 %v2330_v51, %v2170_v43  ;;  %2114 = vst.msk [vmem:[#allocation3 + $0x38] sm:$0xff] %vm47_vm7, %v2081_v8  ;;  %2974 = vlog2.f32 %v2484_v32  ;;  %v1969_v48 = vmul.f32 %v2965_v63, %v1937_v7  ;;  %v4677_v5 = vsub.f32 %v4675_v55, %v4676_v60  ;;  %v2452_v49 = vld [vmem:[#allocation2 + $0xb0] sm:$0xff]  ;;  %v2435_v32 = vld [vmem:[#allocation2 + $0x28] sm:$0xff]  ;;  %v2453_v60 = vld [vmem:[#allocation2 + $0xb8] sm:$0xff] }
 0x2d2   :  { %v2624_v15 = vsub.f32 %v2592_v57, %v2560_v13  ;;  %v2562_v22 = vadd.f32 %v2503_v0, %v2434_v35  ;;  %v2525_v61 = vmul.f32 0.6931472, %v2967_v1  ;;  %v2969_v58 = vpop.eup %2968  ;;  %2976 = vpow2.f32 %v1518_v2  ;;  %v410_v10 = vpop.f32.mrf.mxu3  ;;  %v1924_v13 = vld [vmem:[#allocation3 + $0x50] sm:$0xff] }
 0x2d3   :  { %2394 = vst.msk [vmem:[#allocation4 + $0xf8] sm:$0xff] %vm47_vm7, %v2362_v54  ;;  %v1971_v62 = vmul.f32 %v2969_v58, %v1939_v23  ;;  %v1554_v37 = vmul.f32 1.442695, %v4677_v5  ;;  %v2612_v57 = vld [vmem:[#allocation4 + $0xb0] sm:$0xff]  ;;  %v1520_v2 = vmul.f32 1.442695, %v4680_v41 }
 0x2d4   :  { %v2656_v29 = vsub.f32 0.0, %v2624_v15  ;;  %v2626_v50 = vsub.f32 %v2594_v33, %v2562_v22  ;;  %v2573_v18 = vadd.f32 %v2525_v61, %v2445_v30  ;;  %v2049_v53 = vpop.xlane.xlu1 %2048 }
 0x2d5   :  { %v2971_v36 = vpop.eup %2970  ;;  %v2097_v11 = vadd.f32 %v2049_v53, %v1969_v48 }
 0x2d6   :  { %2688 = vst.msk [vmem:[%s4452_s2 + $0x10] sm:$0xff] %vm47_vm7, %v2656_v29  ;;  %v2658_v52 = vsub.f32 0.0, %v2626_v50  ;;  %v2637_v45 = vsub.f32 %v2605_v39, %v2573_v18  ;;  %v2535_v28 = vmul.f32 0.6931472, %v2971_v36  ;;  %v2467_v6 = vld [vmem:[#allocation3 + $0x28] sm:$0xff]  ;;  %v2055_v24 = vpop.xlane.xlu0 %2054  ;;  %v2973_v34 = vpop.eup %2972  ;;  %v1940_v29 = vld [vmem:[#allocation3 + $0xd0] sm:$0xff] }
 0x2d7   :  { %2978 = vlog2.f32 %v2467_v6  ;;  %2130 = vst.msk [vmem:[#allocation3 + $0xb8] sm:$0xff] %vm47_vm7, %v2097_v11  ;;  %v2099_v38 = vadd.f32 %v2055_v24, %v1971_v62  ;;  %v2975_v16 = vpop.eup %2974  ;;  %v1954_v63 = vmul.f32 %v2973_v34, %v1922_v27  ;;  %v365_v7 = vpop.f32.mrf.mxu1  ;;  %v2595_v50 = vld [vmem:[#allocation4 + $0x28] sm:$0xff]  ;;  %v4681_v18 = vld [vmem:[#allocation58_spill] sm:$0xff] }
 0x2d8   :  { %2690 = vst.msk [vmem:[%s4452_s2 + $0x20] sm:$0xff] %vm47_vm7, %v2658_v52  ;;  %v2669_v17 = vsub.f32 0.0, %v2637_v45  ;;  %v2578_v46 = vadd.f32 %v2535_v28, %v2450_v47  ;;  %2980 = vpow2.f32 %v1550_v3  ;;  %v2469_v4 = vld [vmem:[#allocation3 + $0x38] sm:$0xff]  ;;  %v2539_v40 = vmul.f32 0.6931472, %v2975_v16  ;;  %v2977_v19 = vpop.eup %2976  ;;  %v1942_v45 = vld [vmem:[#allocation3 + $0xe0] sm:$0xff] }
 0x2d9   :  { %2982 = vlog2.f32 %v2469_v4  ;;  %2132 = vst.msk [vmem:[#allocation3 + $0xc8] sm:$0xff] %vm47_vm7, %v2099_v38  ;;  %v1956_v22 = vmul.f32 %v2977_v19, %v1924_v13  ;;  %v4682_v53 = vsub.f32 %v4681_v18, %v4039_v9  ;;  %v2597_v9 = vld [vmem:[#allocation4 + $0x38] sm:$0xff]  ;;  %v2455_v7 = vld [vmem:[#allocation2 + $0xc8] sm:$0xff] }
 0x2da   :  { %2701 = vst.msk [vmem:[%s4452_s2 + $0x78] sm:$0xff] %vm47_vm7, %v2669_v17  ;;  %v2642_v43 = vsub.f32 %v2610_v14, %v2578_v46  ;;  %v2580_v8 = vadd.f32 %v2539_v40, %v2452_v49  ;;  %2984 = vpow2.f32 %v1554_v37  ;;  %v413_v59 = vpop.f32.mrf.mxu3  ;;  %v4683_v17 = vld [vmem:[#allocation61_spill] sm:$0xff]  ;;  %v4684_v46 = vld [vmem:[#allocation62_spill] sm:$0xff] }
 0x2db   :  { %v1524_v21 = vmul.f32 1.442695, %v4682_v53  ;;  %v4685_v38 = vsub.f32 %v4683_v17, %v4684_v46  ;;  %v1925_v40 = vld [vmem:[#allocation3 + $0x58] sm:$0xff]  ;;  %v2598_v59 = vld [vmem:[#allocation4 + $0x40] sm:$0xff] }
 0x2dc   :  { %v2674_v0 = vsub.f32 0.0, %v2642_v43  ;;  %v2004_v51 = vpop.xlane.xlu1 %2003  ;;  %v2644_v54 = vsub.f32 %v2612_v57, %v2580_v8  ;;  %v2613_v49 = vld [vmem:[#allocation4 + $0xb8] sm:$0xff]  ;;  %v1927_v57 = vld [vmem:[#allocation3 + $0x68] sm:$0xff] }
 0x2dd   :  { %v2979_v1 = vpop.eup %2978  ;;  %v2082_v35 = vadd.f32 %v2004_v51, %v1954_v63  ;;  %v1556_v27 = vmul.f32 1.442695, %v4685_v38 }
 0x2de   :  { %2706 = vst.msk [vmem:[%s4452_s2 + $0xa0] sm:$0xff] %vm47_vm7, %v2674_v0  ;;  %v2505_v31 = vmul.f32 0.6931472, %v2979_v1  ;;  %v2485_v15 = vld [vmem:[#allocation3 + $0xb8] sm:$0xff]  ;;  %v2981_v61 = vpop.eup %2980  ;;  %v2010_v58 = vpop.xlane.xlu0 %2009  ;;  %v2676_v30 = vsub.f32 0.0, %v2644_v54  ;;  %v2615_v54 = vld [vmem:[#allocation4 + $0xc8] sm:$0xff] }
 0x2df   :  { %2986 = vlog2.f32 %v2485_v15  ;;  %2115 = vst.msk [vmem:[#allocation3 + $0x40] sm:$0xff] %vm47_vm7, %v2082_v35  ;;  %v2983_v33 = vpop.eup %2982  ;;  %v2084_v23 = vadd.f32 %v2010_v58, %v1956_v22  ;;  %v1972_v52 = vmul.f32 %v2981_v61, %v1940_v29  ;;  %v368_v62 = vpop.f32.mrf.mxu1  ;;  %v4687_v15 = vld [vmem:[#allocation66_spill] sm:$0xff] }
 0x2e0   :  { %v2563_v48 = vadd.f32 %v2505_v31, %v2435_v32  ;;  %v2509_v36 = vmul.f32 0.6931472, %v2983_v33  ;;  %2988 = vpow2.f32 %v1520_v2  ;;  %2708 = vst.msk [vmem:[%s4452_s2 + $0xb0] sm:$0xff] %vm47_vm7, %v2676_v30  ;;  %v2487_v3 = vld [vmem:[#allocation3 + $0xc8] sm:$0xff]  ;;  %v2985_v39 = vpop.eup %2984  ;;  %v4686_v31 = vld [vmem:[#allocation65_spill] sm:$0xff] }
 0x2e1   :  { %2990 = vlog2.f32 %v2487_v3  ;;  %2117 = vst.msk [vmem:[#allocation3 + $0x50] sm:$0xff] %vm47_vm7, %v2084_v23  ;;  %v1974_v55 = vmul.f32 %v2985_v39, %v1942_v45  ;;  %v4688_v22 = vsub.f32 %v4686_v31, %v4687_v15  ;;  %v2600_v62 = vld [vmem:[#allocation4 + $0x50] sm:$0xff]  ;;  %v2603_v31 = vld [vmem:[#allocation4 + $0x68] sm:$0xff] }
 0x2e2   :  { %v2627_v26 = vsub.f32 %v2595_v50, %v2563_v48  ;;  %v2565_v11 = vadd.f32 %v2509_v36, %v2437_v42  ;;  %2992 = vpow2.f32 %v1524_v21  ;;  %v416_v63 = vpop.f32.mrf.mxu3  ;;  %v2438_v48 = vld [vmem:[#allocation2 + $0x40] sm:$0xff]  ;;  %v1943_v21 = vld [vmem:[#allocation3 + $0xe8] sm:$0xff]  ;;  %v2492_v15 = vld [vmem:[#allocation3 + $0xf0] sm:$0xff] }
 0x2e3   :  { %v1526_v61 = vmul.f32 1.442695, %v4688_v22 }
 0x2e4   :  { %v2659_v28 = vsub.f32 0.0, %v2627_v26  ;;  %v2058_v6 = vpop.xlane.xlu1 %2057  ;;  %v2629_v24 = vsub.f32 %v2597_v9, %v2565_v11  ;;  %v2440_v11 = vld [vmem:[#allocation2 + $0x50] sm:$0xff] }
 0x2e5   :  { %v2987_v47 = vpop.eup %2986  ;;  %v2100_v34 = vadd.f32 %v2058_v6, %v1972_v52 }
 0x2e6   :  { %2691 = vst.msk [vmem:[%s4452_s2 + $0x28] sm:$0xff] %vm47_vm7, %v2659_v28  ;;  %v2541_v16 = vmul.f32 0.6931472, %v2987_v47  ;;  %v2470_v14 = vld [vmem:[#allocation3 + $0x40] sm:$0xff]  ;;  %v2661_v5 = vsub.f32 0.0, %v2629_v24  ;;  %v2064_v37 = vpop.xlane.xlu0 %2063  ;;  %v2989_v4 = vpop.eup %2988 }
 0x2e7   :  { %2994 = vlog2.f32 %v2470_v14  ;;  %2133 = vst.msk [vmem:[#allocation3 + $0xd0] sm:$0xff] %vm47_vm7, %v2100_v34  ;;  %v2102_v43 = vadd.f32 %v2064_v37, %v1974_v55  ;;  %v2991_v19 = vpop.eup %2990  ;;  %v1957_v1 = vmul.f32 %v2989_v4, %v1925_v40  ;;  %v371_v41 = vpop.f32.mrf.mxu1  ;;  %v2458_v55 = vld [vmem:[#allocation2 + $0xe0] sm:$0xff] }
 0x2e8   :  { %v2581_v10 = vadd.f32 %v2541_v16, %v2453_v60  ;;  %2693 = vst.msk [vmem:[%s4452_s2 + $0x38] sm:$0xff] %vm47_vm7, %v2661_v5  ;;  %2996 = vpow2.f32 %v1556_v27  ;;  %v2545_v0 = vmul.f32 0.6931472, %v2991_v19  ;;  %v2472_v8 = vld [vmem:[#allocation3 + $0x50] sm:$0xff]  ;;  %v2993_v51 = vpop.eup %2992  ;;  %v2618_v4 = vld [vmem:[#allocation4 + $0xe0] sm:$0xff] }
 0x2e9   :  { %2135 = vst.msk [vmem:[#allocation3 + $0xe0] sm:$0xff] %vm47_vm7, %v2102_v43  ;;  %2998 = vlog2.f32 %v2472_v8  ;;  %v1959_v30 = vmul.f32 %v2993_v51, %v1927_v57  ;;  %v1928_v27 = vld [vmem:[#allocation3 + $0x70] sm:$0xff]  ;;  %v1560_v19 = vmul.f32 1.442695, %v1497_v12  ;;  %v2441_v8 = vld [vmem:[#allocation2 + $0x58] sm:$0xff] }
 0x2ea   :  { %v2645_v13 = vsub.f32 %v2613_v49, %v2581_v10  ;;  %v2583_v20 = vadd.f32 %v2545_v0, %v2455_v7  ;;  %3000 = vpow2.f32 %v1526_v61  ;;  %v419_v26 = vpop.f32.mrf.mxu3  ;;  %v2489_v49 = vld [vmem:[#allocation3 + $0xd8] sm:$0xff] }
 0x2eb   :  { %v2601_v57 = vld [vmem:[#allocation4 + $0x58] sm:$0xff] }
 0x2ec   :  { %v2677_v35 = vsub.f32 0.0, %v2645_v13  ;;  %v2013_v56 = vpop.xlane.xlu1 %2012  ;;  %v2647_v58 = vsub.f32 %v2615_v54, %v2583_v20  ;;  %v2443_v20 = vld [vmem:[#allocation2 + $0x68] sm:$0xff] }
 0x2ed   :  { %v2995_v2 = vpop.eup %2994  ;;  %v2085_v32 = vadd.f32 %v2013_v56, %v1957_v1 }
 0x2ee   :  { %2709 = vst.msk [vmem:[%s4452_s2 + $0xb8] sm:$0xff] %vm47_vm7, %v2677_v35  ;;  %v2511_v33 = vmul.f32 0.6931472, %v2995_v2  ;;  %v2019_v23 = vpop.xlane.xlu0 %2018  ;;  %v2997_v29 = vpop.eup %2996  ;;  %v2679_v50 = vsub.f32 0.0, %v2647_v58  ;;  %v2166_v35 = vld [vmem:[#allocation4 + $0xd8] sm:$0xff] }
 0x2ef   :  { %2118 = vst.msk [vmem:[#allocation3 + $0x58] sm:$0xff] %vm47_vm7, %v2085_v32  ;;  %v2087_v53 = vadd.f32 %v2019_v23, %v1959_v30  ;;  %v2999_v36 = vpop.eup %2998  ;;  %v1975_v52 = vmul.f32 %v2997_v29, %v1943_v21  ;;  %v374_v6 = vpop.f32.mrf.mxu1  ;;  %v1945_v30 = vld [vmem:[#allocation3 + $0xf8] sm:$0xff] }
 0x2f0   :  { %v2566_v18 = vadd.f32 %v2511_v33, %v2438_v48  ;;  %v2490_v42 = vld [vmem:[#allocation3 + $0xe0] sm:$0xff]  ;;  %2711 = vst.msk [vmem:[%s4452_s2 + $0xc8] sm:$0xff] %vm47_vm7, %v2679_v50  ;;  %v2515_v39 = vmul.f32 0.6931472, %v2999_v36  ;;  %v3001_v17 = vpop.eup %3000  ;;  %v2457_v21 = vld [vmem:[#allocation2 + $0xd8] sm:$0xff] }
 0x2f1   :  { %3002 = vlog2.f32 %v2490_v42  ;;  %2120 = vst.msk [vmem:[#allocation3 + $0x68] sm:$0xff] %vm47_vm7, %v2087_v53  ;;  %v1960_v37 = vmul.f32 %v3001_v17, %v1928_v27  ;;  %v2165_v17 = vld [vmem:[#allocation4 + $0xd0] sm:$0xff] }
 0x2f2   :  { %v2630_v3 = vsub.f32 %v2598_v59, %v2566_v18  ;;  %v2568_v9 = vadd.f32 %v2515_v39, %v2440_v11  ;;  %v422_v14 = vpop.f32.mrf.mxu3  ;;  %v2169_v18 = vld [vmem:[#allocation4 + $0xf0] sm:$0xff] }
 0x2f4   :  { %v2662_v45 = vsub.f32 0.0, %v2630_v3  ;;  %v2067_v28 = vpop.xlane.xlu1 %2066  ;;  %v2632_v24 = vsub.f32 %v2600_v62, %v2568_v9  ;;  %v2488_v3 = vld [vmem:[#allocation3 + $0xd0] sm:$0xff] }
 0x2f5   :  { %v2103_v47 = vadd.f32 %v2067_v28, %v1975_v52  ;;  %v2444_v28 = vld [vmem:[#allocation2 + $0x70] sm:$0xff] }
 0x2f6   :  { %2694 = vst.msk [vmem:[%s4452_s2 + $0x40] sm:$0xff] %vm47_vm7, %v2662_v45  ;;  %v2473_v34 = vld [vmem:[#allocation3 + $0x58] sm:$0xff]  ;;  %v2664_v38 = vsub.f32 0.0, %v2632_v24 }
 0x2f7   :  { %3004 = vlog2.f32 %v2473_v34  ;;  %2136 = vst.msk [vmem:[#allocation3 + $0xe8] sm:$0xff] %vm47_vm7, %v2103_v47  ;;  %v3003_v46 = vpop.eup %3002  ;;  %v377_v43 = vpop.f32.mrf.mxu1  ;;  %v2604_v47 = vld [vmem:[#allocation4 + $0x70] sm:$0xff] }
 0x2f8   :  { %v2551_v16 = vmul.f32 0.6931472, %v3003_v46  ;;  %2696 = vst.msk [vmem:[%s4452_s2 + $0x50] sm:$0xff] %vm47_vm7, %v2664_v38  ;;  %v2475_v60 = vld [vmem:[#allocation3 + $0x68] sm:$0xff] }
 0x2f9   :  { %3006 = vlog2.f32 %v2475_v60 }
 0x2fa   :  { %v2586_v5 = vadd.f32 %v2551_v16, %v2458_v55  ;;  %3008 = vlog2.f32 %v2489_v49  ;;  %v425_v44 = vpop.f32.mrf.mxu3  ;;  %v2460_v16 = vld [vmem:[#allocation2 + $0xf0] sm:$0xff]  ;;  %v2168_v49 = vld [vmem:[#allocation4 + $0xe8] sm:$0xff] }
 0x2fb   :  { %3010 = vpow2.f32 %v1560_v19 }
 0x2fc   :  { %v2022_v10 = vpop.xlane.xlu1 %2021  ;;  %v2650_v63 = vsub.f32 %v2618_v4, %v2586_v5 }
 0x2fd   :  { %v3005_v40 = vpop.eup %3004  ;;  %v2088_v13 = vadd.f32 %v2022_v10, %v1960_v37 }
 0x2fe   :  { %v2517_v0 = vmul.f32 0.6931472, %v3005_v40  ;;  %v2682_v51 = vsub.f32 0.0, %v2650_v63  ;;  %v2491_v14 = vld [vmem:[#allocation3 + $0xe8] sm:$0xff] }
 0x2ff   :  { %2121 = vst.msk [vmem:[#allocation3 + $0x70] sm:$0xff] %vm47_vm7, %v2088_v13  ;;  %v3007_v1 = vpop.eup %3006  ;;  %v380_v54 = vpop.f32.mrf.mxu1 }
 0x300   :  { %v2569_v7 = vadd.f32 %v2517_v0, %v2441_v8  ;;  %2714 = vst.msk [vmem:[%s4452_s2 + $0xe0] sm:$0xff] %vm47_vm7, %v2682_v51  ;;  %v2521_v12 = vmul.f32 0.6931472, %v3007_v1  ;;  %v3009_v61 = vpop.eup %3008  ;;  %v2456_v0 = vld [vmem:[#allocation2 + $0xd0] sm:$0xff] }
 0x301   :  { %v3011_v33 = vpop.eup %3010  ;;  %v2549_v23 = vmul.f32 0.6931472, %v3009_v61 }
 0x302   :  { %v2633_v25 = vsub.f32 %v2601_v57, %v2569_v7  ;;  %v2571_v41 = vadd.f32 %v2521_v12, %v2443_v20  ;;  %v428_v29 = vpop.f32.mrf.mxu3  ;;  %v1977_v50 = vmul.f32 %v3011_v33, %v1945_v30  ;;  %v2461_v57 = vld [vmem:[#allocation2 + $0xf8] sm:$0xff] }
 0x303   :  { %v2585_v39 = vadd.f32 %v2549_v23, %v2457_v21 }
 0x304   :  { %v2665_v56 = vsub.f32 0.0, %v2633_v25  ;;  %v2318_v2 = vpop.xlane.xlu1 %2317  ;;  %v2635_v32 = vsub.f32 %v2603_v31, %v2571_v41 }
 0x305   :  { %v2358_v22 = vadd.f32 %v2318_v2, %v2166_v35  ;;  %v2621_v35 = vld [vmem:[#allocation4 + $0xf8] sm:$0xff]  ;;  %v2459_v2 = vld [vmem:[#allocation2 + $0xe8] sm:$0xff] }
 0x306   :  { %2697 = vst.msk [vmem:[%s4452_s2 + $0x58] sm:$0xff] %vm47_vm7, %v2665_v56  ;;  %v2476_v58 = vld [vmem:[#allocation3 + $0x70] sm:$0xff]  ;;  %v2667_v48 = vsub.f32 0.0, %v2635_v32 }
 0x307   :  { %3012 = vlog2.f32 %v2476_v58  ;;  %2390 = vst.msk [vmem:[#allocation4 + $0xd8] sm:$0xff] %vm47_vm7, %v2358_v22  ;;  %v383_v42 = vpop.f32.mrf.mxu1 }
 0x308   :  { %3014 = vlog2.f32 %v2492_v15  ;;  %2699 = vst.msk [vmem:[%s4452_s2 + $0x68] sm:$0xff] %vm47_vm7, %v2667_v48 }
 0x309   :  { %3016 = vlog2.f32 %v2488_v3 }
 0x30a   :  { %v431_v46 = vpop.f32.mrf.mxu3 }
 0x30b   :  { %v2073_v53 = vpop.xlane.xlu0 %2072 }
 0x30c   :  { %v2105_v36 = vadd.f32 %v2073_v53, %v1977_v50  ;;  %v2327_v59 = vpop.xlane.xlu1 %2326 }
 0x30d   :  { %v3013_v26 = vpop.eup %3012  ;;  %v2361_v11 = vadd.f32 %v2327_v59, %v2169_v18 }
 0x30e   :  { %v3015_v52 = vpop.eup %3014  ;;  %v2523_v45 = vmul.f32 0.6931472, %v3013_v26  ;;  %v2617_v9 = vld [vmem:[#allocation4 + $0xd8] sm:$0xff]  ;;  %2138 = vst.msk [vmem:[#allocation3 + $0xf8] sm:$0xff] %vm47_vm7, %v2105_v36 }
 0x30f   :  { %v2649_v6 = vsub.f32 %v2617_v9, %v2585_v39  ;;  %2393 = vst.msk [vmem:[#allocation4 + $0xf0] sm:$0xff] %vm47_vm7, %v2361_v11  ;;  %v2555_v24 = vmul.f32 0.6931472, %v3015_v52  ;;  %v3017_v4 = vpop.eup %3016 }
 0x310   :  { %v2572_v62 = vadd.f32 %v2523_v45, %v2444_v28  ;;  %v2547_v40 = vmul.f32 0.6931472, %v3017_v4 }
 0x311   :  { %v2681_v34 = vsub.f32 0.0, %v2649_v6  ;;  %v2588_v37 = vadd.f32 %v2555_v24, %v2460_v16 }
 0x312   :  { %v2636_v38 = vsub.f32 %v2604_v47, %v2572_v62  ;;  %v2584_v1 = vadd.f32 %v2547_v40, %v2456_v0 }
 0x313   :  { %2713 = vst.msk [vmem:[%s4452_s2 + $0xd8] sm:$0xff] %vm47_vm7, %v2681_v34  ;;  %v2315_v27 = vpop.xlane.xlu0 %2314 }
 0x314   :  { %v2668_v55 = vsub.f32 0.0, %v2636_v38  ;;  %v2357_v60 = vadd.f32 %v2315_v27, %v2165_v17 }
 0x315   :  { %v2493_v5 = vld [vmem:[#allocation3 + $0xf8] sm:$0xff] }
 0x316   :  { %2700 = vst.msk [vmem:[%s4452_s2 + $0x70] sm:$0xff] %vm47_vm7, %v2668_v55  ;;  %3018 = vlog2.f32 %v2493_v5  ;;  %v2620_v10 = vld [vmem:[#allocation4 + $0xf0] sm:$0xff] }
 0x317   :  { %3020 = vlog2.f32 %v2491_v14  ;;  %v2652_v43 = vsub.f32 %v2620_v10, %v2588_v37  ;;  %2389 = vst.msk [vmem:[#allocation4 + $0xd0] sm:$0xff] %vm47_vm7, %v2357_v60 }
 0x319   :  { %v2684_v19 = vsub.f32 0.0, %v2652_v43 }
 0x31b   :  { %2716 = vst.msk [vmem:[%s4452_s2 + $0xf0] sm:$0xff] %vm47_vm7, %v2684_v19  ;;  %v2324_v63 = vpop.xlane.xlu0 %2323 }
 0x31c   :  { %v3019_v13 = vpop.eup %3018  ;;  %v2360_v8 = vadd.f32 %v2324_v63, %v2168_v49 }
 0x31d   :  { %v3021_v51 = vpop.eup %3020  ;;  %v2557_v7 = vmul.f32 0.6931472, %v3019_v13 }
 0x31e   :  { %v2616_v44 = vld [vmem:[#allocation4 + $0xd0] sm:$0xff]  ;;  %2392 = vst.msk [vmem:[#allocation4 + $0xe8] sm:$0xff] %vm47_vm7, %v2360_v8  ;;  %v2553_v20 = vmul.f32 0.6931472, %v3021_v51 }
 0x31f   :  { %v2589_v25 = vadd.f32 %v2557_v7, %v2461_v57  ;;  %v2648_v12 = vsub.f32 %v2616_v44, %v2584_v1 }
 0x320   :  { %v2587_v31 = vadd.f32 %v2553_v20, %v2459_v2 }
 0x321   :  { %v2653_v56 = vsub.f32 %v2621_v35, %v2589_v25  ;;  %v2680_v41 = vsub.f32 0.0, %v2648_v12 }
 0x323   :  { %v2685_v54 = vsub.f32 0.0, %v2653_v56  ;;  %2712 = vst.msk [vmem:[%s4452_s2 + $0xd0] sm:$0xff] %vm47_vm7, %v2680_v41 }
 0x325   :  { %2717 = vst.msk [vmem:[%s4452_s2 + $0xf8] sm:$0xff] %vm47_vm7, %v2685_v54  ;;  %v2619_v15 = vld [vmem:[#allocation4 + $0xe8] sm:$0xff] }
 0x326   :  { %v2651_v22 = vsub.f32 %v2619_v15, %v2587_v31 }
 0x328   :  { %v2683_v61 = vsub.f32 0.0, %v2651_v22 }
 0x32a   :  { %2715 = vst.msk [vmem:[%s4452_s2 + $0xe8] sm:$0xff] %vm47_vm7, %v2683_v61 }
 0x32b   :  { %2722 = vsyncpa [#allocation6], 1 }
 0x32c   :  { %2723 = vsyncpa [#allocation8], 1 }

</bundles_post_ra>
